<compile_context>
chip_gen: v7x
topology: tpu7x:2x2x1
jax: 0.10.0
libtpu: 0.0.40
codegen_flags: <defaults>
</compile_context>

<pallas_src>
import math

import jax
import jax.numpy as jnp
import numpy as np
from jax.experimental import pallas as pl
from jax.experimental.pallas import tpu as pltpu

WINDOW_SIZE = 11
SIGMA = 1.5

# Deterministic Gaussian window (same formula as the PyTorch `gaussian()`).
_g = [math.exp(-((x - WINDOW_SIZE // 2) ** 2) / (2.0 * SIGMA ** 2))
      for x in range(WINDOW_SIZE)]
_gsum = sum(_g)
GAUSS = [v / _gsum for v in _g]  # 1D normalized; 2D window = outer(GAUSS, GAUSS)

C1 = 0.01 ** 2
C2 = 0.03 ** 2


def _round_up(x, m):
    return ((x + m - 1) // m) * m


def _make_ssim_kernel(PB, TH, TW, H, W):
    """One grid step: PB packed planes x one (TH, TW) output tile."""

    def ssim_kernel(x1_ref, x2_ref, gv_ref, gh_ref, out_ref):
        gv = gv_ref[...]                       # (TH_al, THp_al) vertical band
        gh = gh_ref[...]                       # (TWp_al, TW_al) horizontal band
        TH_al = gv.shape[0]
        TW_al = gh.shape[1]

        # Valid output extent of this tile (edge tiles + lane/sublane padding).
        hi = pl.program_id(1)
        wi = pl.program_id(2)
        vh = jnp.minimum(TH, H - hi * TH)
        vw = jnp.minimum(TW, W - wi * TW)
        rows = jax.lax.broadcasted_iota(jnp.int32, (TH_al, 1), 0)
        cols = jax.lax.broadcasted_iota(jnp.int32, (1, TW_al), 1)
        mask = (rows < vh).astype(jnp.float32) * (cols < vw).astype(jnp.float32)

        def blur(p):
            # Separable 11-tap Gaussian as two banded matmuls on the MXU.
            # (Default matmul precision matched the 1e-5 reference tolerance.)
            t = jnp.dot(gv, p, preferred_element_type=jnp.float32)
            return jnp.dot(t, gh, preferred_element_type=jnp.float32)

        acc = jnp.zeros((1, 1), jnp.float32)
        for b in range(PB):                    # static unroll over packed planes
            x1 = x1_ref[b]                     # (THp_al, TWp_al)
            x2 = x2_ref[b]
            mu1 = blur(x1)
            mu2 = blur(x2)
            e11 = blur(x1 * x1)
            e22 = blur(x2 * x2)
            e12 = blur(x1 * x2)

            mu1_sq = mu1 * mu1
            mu2_sq = mu2 * mu2
            mu1_mu2 = mu1 * mu2
            sigma1_sq = e11 - mu1_sq
            sigma2_sq = e22 - mu2_sq
            sigma12 = e12 - mu1_mu2

            numer = (2.0 * mu1_mu2 + C1) * (2.0 * sigma12 + C2)
            denom = (mu1_sq + mu2_sq + C1) * (sigma1_sq + sigma2_sq + C2)
            # Division on the EUP: approx reciprocal + one Newton refinement.
            inv = pl.reciprocal(denom, approx=True)
            inv = inv * (2.0 - denom * inv)

            acc = acc + jnp.sum(numer * inv * mask, keepdims=True)

        # Tile-aligned (8,128) partial-sum output block per grid step:
        # no cross-iteration accumulator -> every grid axis is "parallel".
        out_ref[...] = jnp.broadcast_to(acc, out_ref.shape)

    return ssim_kernel


def ssim_pallas(img1, img2, window_size=WINDOW_SIZE, size_average=True,
                tile_h=256, tile_w=246, max_planes_per_step=8):
    """SSIM forward matching the PyTorch module (size_average=True path).

    tile_h / tile_w: per-step output tile; defaults target the 256x256 MXU of
    v6e/v7x.  Use tile_h=128, tile_w=118 on v5e (128x128 MXU).
    """
    assert window_size == WINDOW_SIZE
    # TODO(synk): only the default size_average=True reduction is implemented.
    assert size_average

    B, C, H, W = img1.shape
    pad = window_size // 2
    BC = B * C

    TH = min(tile_h, H)
    TW = min(tile_w, W)
    nH = -(-H // TH)
    nW = -(-W // TW)
    TH_al = _round_up(TH, 8)                 # blurred-tile sublane alignment
    TW_al = _round_up(TW, 128)               # blurred-tile lane alignment
    THp_al = _round_up(TH + 2 * pad, 8)      # halo-tile sublane alignment
    TWp_al = _round_up(TW + 2 * pad, 128)    # halo-tile lane alignment

    # Pack several planes per grid step when tiles are small (amortises the
    # per-step grid overhead); bounded by VMEM budget and unroll length.
    in_tile_bytes = 2 * 2 * THp_al * TWp_al * 4   # 2 images x double buffer
    PB = 1
    for d in range(1, min(BC, max_planes_per_step) + 1):
        if BC % d == 0 and d * in_tile_bytes <= (4 << 20):
            PB = d
    G = BC // PB

    # Per-tile shift-invariant banded Gaussian matrices (tiny; fetched once
    # thanks to the constant index_map).
    gauss = np.asarray(GAUSS, np.float32)
    gv = np.zeros((TH_al, THp_al), np.float32)
    for i in range(TH):
        gv[i, i:i + window_size] = gauss
    gh = np.zeros((TWp_al, TW_al), np.float32)
    for j in range(TW):
        gh[j:j + window_size, j] = gauss
    gv = jnp.asarray(gv)
    gh = jnp.asarray(gh)

    # Wrapper-side layout: one zero pad folds the conv halo, tile remainder and
    # lane/sublane alignment; then overlapping halo tiles are gathered so the
    # kernel uses plain, auto-pipelined blocks.
    # TODO(synk): fold pad + halo gather into in-kernel manual DMA
    # (pl.ANY + make_async_copy) to avoid the extra HBM round trip (v5e).
    Hpad = (nH - 1) * TH + THp_al
    Wpad = (nW - 1) * TW + TWp_al

    def _prep(x):
        x = x.astype(jnp.float32).reshape(BC, H, W)
        xp = jnp.pad(x, ((0, 0),
                         (pad, Hpad - H - pad),
                         (pad, Wpad - W - pad)))
        rows = []
        for hi in range(nH):
            cols = []
            for wi in range(nW):
                cols.append(xp[:, hi * TH:hi * TH + THp_al,
                               wi * TW:wi * TW + TWp_al])
            rows.append(jnp.stack(cols, axis=1))      # (BC, nW, THp_al, TWp_al)
        return jnp.stack(rows, axis=1)                # (BC, nH, nW, THp_al, TWp_al)

    x1t = _prep(img1)
    x2t = _prep(img2)

    plane_spec = pl.BlockSpec((PB, None, None, THp_al, TWp_al),
                              lambda g, hi, wi: (g, hi, wi, 0, 0))
    gv_spec = pl.BlockSpec((TH_al, THp_al), lambda g, hi, wi: (0, 0))
    gh_spec = pl.BlockSpec((TWp_al, TW_al), lambda g, hi, wi: (0, 0))
    out_spec = pl.BlockSpec((None, None, None, 8, 128),
                            lambda g, hi, wi: (g, hi, wi, 0, 0))

    # Explicit VMEM budget (v5e scoped default is only 16 MiB); stays well
    # under v7x's 64 MiB physical VMEM.
    interm_bytes = (14 * TH_al * TW_al + 2 * TH_al * TWp_al) * 4
    est = PB * in_tile_bytes + 2 * 4 * (gv.size + gh.size) + interm_bytes + (8 << 20)
    vmem_limit = int(min(48 << 20, max(32 << 20, est)))

    partial = pl.pallas_call(
        _make_ssim_kernel(PB, TH, TW, H, W),
        out_shape=jax.ShapeDtypeStruct((G, nH, nW, 8, 128), jnp.float32),
        grid_spec=pltpu.PrefetchScalarGridSpec(
            num_scalar_prefetch=0,
            grid=(G, nH, nW),
            in_specs=[plane_spec, plane_spec, gv_spec, gh_spec],
            out_specs=out_spec,
        ),
        compiler_params=pltpu.CompilerParams(
            dimension_semantics=("parallel", "parallel", "parallel"),
            vmem_limit_bytes=vmem_limit),
    )(x1t, x2t, gv, gh)

    total = jnp.sum(partial[..., 0, 0])
    return total / jnp.float32(B * C * H * W)


def ssim_reference(img1, img2, window_size=WINDOW_SIZE):
    """Pure-JAX reference (mirrors F.conv2d with groups=channel)."""
    B, C, H, W = img1.shape
    g = jnp.asarray(GAUSS, jnp.float32)
    w2d = jnp.outer(g, g)
    window = jnp.broadcast_to(w2d, (C, 1, window_size, window_size))
    pad = window_size // 2

    def conv(x):
        return jax.lax.conv_general_dilated(
            x, window, window_strides=(1, 1),
            padding=[(pad, pad), (pad, pad)],
            dimension_numbers=("NCHW", "OIHW", "NCHW"),
            feature_group_count=C,
            precision=jax.lax.Precision.HIGHEST)

    mu1, mu2 = conv(img1), conv(img2)
    mu1_sq, mu2_sq, mu1_mu2 = mu1 ** 2, mu2 ** 2, mu1 * mu2
    sigma1_sq = conv(img1 * img1) - mu1_sq
    sigma2_sq = conv(img2 * img2) - mu2_sq
    sigma12 = conv(img1 * img2) - mu1_mu2
    ssim_map = ((2 * mu1_mu2 + C1) * (2 * sigma12 + C2)) / (
        (mu1_sq + mu2_sq + C1) * (sigma1_sq + sigma2_sq + C2))
    return jnp.mean(ssim_map)


if __name__ == "__main__":
    key = jax.random.PRNGKey(0)
    k1, k2 = jax.random.split(key)
    B, C, H, W = 2, 4, 16, 16
    img1 = jax.random.uniform(k1, (B, C, H, W), dtype=jnp.float32)
    img2 = jax.random.uniform(k2, (B, C, H, W), dtype=jnp.float32)

    out = jax.block_until_ready(ssim_pallas(img1, img2))
    ref = jax.block_until_ready(ssim_reference(img1, img2))
    assert jnp.allclose(out, ref, atol=1e-5, rtol=1e-5), (out, ref)

    print("KERNEL_OK")
</pallas_src>

<mosaic_0001>
module attributes {stable_mosaic.version = 11 : i64} {
  func.func @ssim_kernel(%arg0: i32, %arg1: i32, %arg2: i32, %arg3: memref<8x1x1x32x128xf32, #tpu.memory_space<vmem>>, %arg4: memref<8x1x1x32x128xf32, #tpu.memory_space<vmem>>, %arg5: memref<16x32xf32, #tpu.memory_space<vmem>>, %arg6: memref<128x128xf32, #tpu.memory_space<vmem>>, %arg7: memref<1x1x1x8x128xf32, #tpu.memory_space<vmem>>) attributes {dimension_semantics = [#tpu.dimension_semantics<parallel>, #tpu.dimension_semantics<parallel>, #tpu.dimension_semantics<parallel>], iteration_bounds = array<i64: 1, 1, 1>, scalar_prefetch = 0 : i64, scratch_operands = 0 : i64, tpu.core_type = #tpu.core_type<tc>, window_params = [{transform_indices = @transform_0, window_bounds = array<i64: 8, 1, 1, 32, 128>}, {transform_indices = @transform_1, window_bounds = array<i64: 8, 1, 1, 32, 128>}, {pipeline_mode = #tpu.pipeline_mode<synchronous>, transform_indices = @transform_2, window_bounds = array<i64: 16, 32>}, {pipeline_mode = #tpu.pipeline_mode<synchronous>, transform_indices = @transform_3, window_bounds = array<i64: 128, 128>}, {transform_indices = @transform_4, window_bounds = array<i64: 1, 1, 1, 8, 128>}]} {
    %c0 = arith.constant 0 : index
    %c0_0 = arith.constant 0 : index
    %0 = vector.load %arg5[%c0, %c0_0] : memref<16x32xf32, #tpu.memory_space<vmem>>, vector<16x32xf32>
    %c0_1 = arith.constant 0 : index
    %c0_2 = arith.constant 0 : index
    %1 = vector.load %arg6[%c0_1, %c0_2] : memref<128x128xf32, #tpu.memory_space<vmem>>, vector<128x128xf32>
    %c16_i32 = arith.constant 16 : i32
    %2 = arith.muli %arg1, %c16_i32 : i32
    %c16_i32_3 = arith.constant 16 : i32
    %3 = arith.subi %c16_i32_3, %2 : i32
    %c16_i32_4 = arith.constant 16 : i32
    %4 = arith.minsi %c16_i32_4, %3 : i32
    %c16_i32_5 = arith.constant 16 : i32
    %5 = arith.muli %arg2, %c16_i32_5 : i32
    %c16_i32_6 = arith.constant 16 : i32
    %6 = arith.subi %c16_i32_6, %5 : i32
    %c16_i32_7 = arith.constant 16 : i32
    %7 = arith.minsi %c16_i32_7, %6 : i32
    %8 = tpu.iota {dimensions = array<i32: 0>} : vector<16x1xi32>
    %9 = tpu.iota {dimensions = array<i32: 1>} : vector<1x128xi32>
    %10 = vector.broadcast %4 : i32 to vector<16x1xi32>
    %11 = arith.cmpi slt, %8, %10 : vector<16x1xi32>
    %12 = arith.extui %11 : vector<16x1xi1> to vector<16x1xi32>
    %13 = arith.sitofp %12 : vector<16x1xi32> to vector<16x1xf32>
    %14 = vector.broadcast %7 : i32 to vector<1x128xi32>
    %15 = arith.cmpi slt, %9, %14 : vector<1x128xi32>
    %16 = arith.extui %15 : vector<1x128xi1> to vector<1x128xi32>
    %17 = arith.sitofp %16 : vector<1x128xi32> to vector<1x128xf32>
    %18 = vector.broadcast %13 : vector<16x1xf32> to vector<16x128xf32>
    %19 = vector.broadcast %17 : vector<1x128xf32> to vector<16x128xf32>
    %20 = arith.mulf %18, %19 : vector<16x128xf32>
    %cst = arith.constant 0.000000e+00 : f32
    %21 = vector.broadcast %cst : f32 to vector<1x1xf32>
    %c0_8 = arith.constant 0 : index
    %c0_9 = arith.constant 0 : index
    %c0_10 = arith.constant 0 : index
    %c0_11 = arith.constant 0 : index
    %c0_12 = arith.constant 0 : index
    %22 = vector.load %arg3[%c0_8, %c0_9, %c0_10, %c0_11, %c0_12] : memref<8x1x1x32x128xf32, #tpu.memory_space<vmem>>, vector<1x1x1x32x128xf32>
    %23 = vector.shape_cast %22 : vector<1x1x1x32x128xf32> to vector<32x128xf32>
    %c0_13 = arith.constant 0 : index
    %c0_14 = arith.constant 0 : index
    %c0_15 = arith.constant 0 : index
    %c0_16 = arith.constant 0 : index
    %c0_17 = arith.constant 0 : index
    %24 = vector.load %arg4[%c0_13, %c0_14, %c0_15, %c0_16, %c0_17] : memref<8x1x1x32x128xf32, #tpu.memory_space<vmem>>, vector<1x1x1x32x128xf32>
    %25 = vector.shape_cast %24 : vector<1x1x1x32x128xf32> to vector<32x128xf32>
    %cst_18 = arith.constant dense<0.000000e+00> : vector<16x128xf32>
    %26 = tpu.matmul %0, %23, %cst_18 {dimension_numbers = #tpu.dot_dimension_numbers<[1], [0], [0], [1], [0, 0, 1, 1], [], []>} : vector<16x32xf32>, vector<32x128xf32>, vector<16x128xf32> -> vector<16x128xf32>
    %cst_19 = arith.constant dense<0.000000e+00> : vector<16x128xf32>
    %27 = tpu.matmul %26, %1, %cst_19 {dimension_numbers = #tpu.dot_dimension_numbers<[1], [0], [0], [1], [0, 0, 1, 1], [], []>} : vector<16x128xf32>, vector<128x128xf32>, vector<16x128xf32> -> vector<16x128xf32>
    %cst_20 = arith.constant dense<0.000000e+00> : vector<16x128xf32>
    %28 = tpu.matmul %0, %25, %cst_20 {dimension_numbers = #tpu.dot_dimension_numbers<[1], [0], [0], [1], [0, 0, 1, 1], [], []>} : vector<16x32xf32>, vector<32x128xf32>, vector<16x128xf32> -> vector<16x128xf32>
    %cst_21 = arith.constant dense<0.000000e+00> : vector<16x128xf32>
    %29 = tpu.matmul %28, %1, %cst_21 {dimension_numbers = #tpu.dot_dimension_numbers<[1], [0], [0], [1], [0, 0, 1, 1], [], []>} : vector<16x128xf32>, vector<128x128xf32>, vector<16x128xf32> -> vector<16x128xf32>
    %30 = arith.mulf %23, %23 : vector<32x128xf32>
    %cst_22 = arith.constant dense<0.000000e+00> : vector<16x128xf32>
    %31 = tpu.matmul %0, %30, %cst_22 {dimension_numbers = #tpu.dot_dimension_numbers<[1], [0], [0], [1], [0, 0, 1, 1], [], []>} : vector<16x32xf32>, vector<32x128xf32>, vector<16x128xf32> -> vector<16x128xf32>
    %cst_23 = arith.constant dense<0.000000e+00> : vector<16x128xf32>
    %32 = tpu.matmul %31, %1, %cst_23 {dimension_numbers = #tpu.dot_dimension_numbers<[1], [0], [0], [1], [0, 0, 1, 1], [], []>} : vector<16x128xf32>, vector<128x128xf32>, vector<16x128xf32> -> vector<16x128xf32>
    %33 = arith.mulf %25, %25 : vector<32x128xf32>
    %cst_24 = arith.constant dense<0.000000e+00> : vector<16x128xf32>
    %34 = tpu.matmul %0, %33, %cst_24 {dimension_numbers = #tpu.dot_dimension_numbers<[1], [0], [0], [1], [0, 0, 1, 1], [], []>} : vector<16x32xf32>, vector<32x128xf32>, vector<16x128xf32> -> vector<16x128xf32>
    %cst_25 = arith.constant dense<0.000000e+00> : vector<16x128xf32>
    %35 = tpu.matmul %34, %1, %cst_25 {dimension_numbers = #tpu.dot_dimension_numbers<[1], [0], [0], [1], [0, 0, 1, 1], [], []>} : vector<16x128xf32>, vector<128x128xf32>, vector<16x128xf32> -> vector<16x128xf32>
    %36 = arith.mulf %23, %25 : vector<32x128xf32>
    %cst_26 = arith.constant dense<0.000000e+00> : vector<16x128xf32>
    %37 = tpu.matmul %0, %36, %cst_26 {dimension_numbers = #tpu.dot_dimension_numbers<[1], [0], [0], [1], [0, 0, 1, 1], [], []>} : vector<16x32xf32>, vector<32x128xf32>, vector<16x128xf32> -> vector<16x128xf32>
    %cst_27 = arith.constant dense<0.000000e+00> : vector<16x128xf32>
    %38 = tpu.matmul %37, %1, %cst_27 {dimension_numbers = #tpu.dot_dimension_numbers<[1], [0], [0], [1], [0, 0, 1, 1], [], []>} : vector<16x128xf32>, vector<128x128xf32>, vector<16x128xf32> -> vector<16x128xf32>
    %39 = arith.mulf %27, %27 : vector<16x128xf32>
    %40 = arith.mulf %29, %29 : vector<16x128xf32>
    %41 = arith.mulf %27, %29 : vector<16x128xf32>
    %42 = arith.subf %32, %39 : vector<16x128xf32>
    %43 = arith.subf %35, %40 : vector<16x128xf32>
    %44 = arith.subf %38, %41 : vector<16x128xf32>
    %cst_28 = arith.constant 2.000000e+00 : f32
    %45 = vector.broadcast %cst_28 : f32 to vector<16x128xf32>
    %46 = arith.mulf %45, %41 : vector<16x128xf32>
    %cst_29 = arith.constant 9.99999974E-5 : f32
    %47 = vector.broadcast %cst_29 : f32 to vector<16x128xf32>
    %48 = arith.addf %46, %47 : vector<16x128xf32>
    %cst_30 = arith.constant 2.000000e+00 : f32
    %49 = vector.broadcast %cst_30 : f32 to vector<16x128xf32>
    %50 = arith.mulf %49, %44 : vector<16x128xf32>
    %cst_31 = arith.constant 8.99999984E-4 : f32
    %51 = vector.broadcast %cst_31 : f32 to vector<16x128xf32>
    %52 = arith.addf %50, %51 : vector<16x128xf32>
    %53 = arith.mulf %48, %52 : vector<16x128xf32>
    %54 = arith.addf %39, %40 : vector<16x128xf32>
    %cst_32 = arith.constant 9.99999974E-5 : f32
    %55 = vector.broadcast %cst_32 : f32 to vector<16x128xf32>
    %56 = arith.addf %54, %55 : vector<16x128xf32>
    %57 = arith.addf %42, %43 : vector<16x128xf32>
    %cst_33 = arith.constant 8.99999984E-4 : f32
    %58 = vector.broadcast %cst_33 : f32 to vector<16x128xf32>
    %59 = arith.addf %57, %58 : vector<16x128xf32>
    %60 = arith.mulf %56, %59 : vector<16x128xf32>
    %61 = tpu.reciprocal %60 {approx = true} : vector<16x128xf32> -> vector<16x128xf32>
    %62 = arith.mulf %60, %61 : vector<16x128xf32>
    %cst_34 = arith.constant 2.000000e+00 : f32
    %63 = vector.broadcast %cst_34 : f32 to vector<16x128xf32>
    %64 = arith.subf %63, %62 : vector<16x128xf32>
    %65 = arith.mulf %61, %64 : vector<16x128xf32>
    %66 = arith.mulf %53, %65 : vector<16x128xf32>
    %67 = arith.mulf %66, %20 : vector<16x128xf32>
    %68 = vector.shape_cast %67 : vector<16x128xf32> to vector<1x16x128xf32>
    %cst_35 = arith.constant dense<0.000000e+00> : vector<1xf32>
    %69 = vector.multi_reduction <add>, %68, %cst_35 [1, 2] : vector<1x16x128xf32> to vector<1xf32>
    %70 = vector.shape_cast %69 : vector<1xf32> to vector<1x1x1xf32>
    %71 = vector.extract %70[0, 0, 0] : f32 from vector<1x1x1xf32>
    %72 = vector.broadcast %71 : f32 to vector<1x1xf32>
    %73 = arith.addf %21, %72 : vector<1x1xf32>
    %c1 = arith.constant 1 : index
    %c0_36 = arith.constant 0 : index
    %c0_37 = arith.constant 0 : index
    %c0_38 = arith.constant 0 : index
    %c0_39 = arith.constant 0 : index
    %74 = vector.load %arg3[%c1, %c0_36, %c0_37, %c0_38, %c0_39] : memref<8x1x1x32x128xf32, #tpu.memory_space<vmem>>, vector<1x1x1x32x128xf32>
    %75 = vector.shape_cast %74 : vector<1x1x1x32x128xf32> to vector<32x128xf32>
    %c1_40 = arith.constant 1 : index
    %c0_41 = arith.constant 0 : index
    %c0_42 = arith.constant 0 : index
    %c0_43 = arith.constant 0 : index
    %c0_44 = arith.constant 0 : index
    %76 = vector.load %arg4[%c1_40, %c0_41, %c0_42, %c0_43, %c0_44] : memref<8x1x1x32x128xf32, #tpu.memory_space<vmem>>, vector<1x1x1x32x128xf32>
    %77 = vector.shape_cast %76 : vector<1x1x1x32x128xf32> to vector<32x128xf32>
    %cst_45 = arith.constant dense<0.000000e+00> : vector<16x128xf32>
    %78 = tpu.matmul %0, %75, %cst_45 {dimension_numbers = #tpu.dot_dimension_numbers<[1], [0], [0], [1], [0, 0, 1, 1], [], []>} : vector<16x32xf32>, vector<32x128xf32>, vector<16x128xf32> -> vector<16x128xf32>
    %cst_46 = arith.constant dense<0.000000e+00> : vector<16x128xf32>
    %79 = tpu.matmul %78, %1, %cst_46 {dimension_numbers = #tpu.dot_dimension_numbers<[1], [0], [0], [1], [0, 0, 1, 1], [], []>} : vector<16x128xf32>, vector<128x128xf32>, vector<16x128xf32> -> vector<16x128xf32>
    %cst_47 = arith.constant dense<0.000000e+00> : vector<16x128xf32>
    %80 = tpu.matmul %0, %77, %cst_47 {dimension_numbers = #tpu.dot_dimension_numbers<[1], [0], [0], [1], [0, 0, 1, 1], [], []>} : vector<16x32xf32>, vector<32x128xf32>, vector<16x128xf32> -> vector<16x128xf32>
    %cst_48 = arith.constant dense<0.000000e+00> : vector<16x128xf32>
    %81 = tpu.matmul %80, %1, %cst_48 {dimension_numbers = #tpu.dot_dimension_numbers<[1], [0], [0], [1], [0, 0, 1, 1], [], []>} : vector<16x128xf32>, vector<128x128xf32>, vector<16x128xf32> -> vector<16x128xf32>
    %82 = arith.mulf %75, %75 : vector<32x128xf32>
    %cst_49 = arith.constant dense<0.000000e+00> : vector<16x128xf32>
    %83 = tpu.matmul %0, %82, %cst_49 {dimension_numbers = #tpu.dot_dimension_numbers<[1], [0], [0], [1], [0, 0, 1, 1], [], []>} : vector<16x32xf32>, vector<32x128xf32>, vector<16x128xf32> -> vector<16x128xf32>
    %cst_50 = arith.constant dense<0.000000e+00> : vector<16x128xf32>
    %84 = tpu.matmul %83, %1, %cst_50 {dimension_numbers = #tpu.dot_dimension_numbers<[1], [0], [0], [1], [0, 0, 1, 1], [], []>} : vector<16x128xf32>, vector<128x128xf32>, vector<16x128xf32> -> vector<16x128xf32>
    %85 = arith.mulf %77, %77 : vector<32x128xf32>
    %cst_51 = arith.constant dense<0.000000e+00> : vector<16x128xf32>
    %86 = tpu.matmul %0, %85, %cst_51 {dimension_numbers = #tpu.dot_dimension_numbers<[1], [0], [0], [1], [0, 0, 1, 1], [], []>} : vector<16x32xf32>, vector<32x128xf32>, vector<16x128xf32> -> vector<16x128xf32>
    %cst_52 = arith.constant dense<0.000000e+00> : vector<16x128xf32>
    %87 = tpu.matmul %86, %1, %cst_52 {dimension_numbers = #tpu.dot_dimension_numbers<[1], [0], [0], [1], [0, 0, 1, 1], [], []>} : vector<16x128xf32>, vector<128x128xf32>, vector<16x128xf32> -> vector<16x128xf32>
    %88 = arith.mulf %75, %77 : vector<32x128xf32>
    %cst_53 = arith.constant dense<0.000000e+00> : vector<16x128xf32>
    %89 = tpu.matmul %0, %88, %cst_53 {dimension_numbers = #tpu.dot_dimension_numbers<[1], [0], [0], [1], [0, 0, 1, 1], [], []>} : vector<16x32xf32>, vector<32x128xf32>, vector<16x128xf32> -> vector<16x128xf32>
    %cst_54 = arith.constant dense<0.000000e+00> : vector<16x128xf32>
    %90 = tpu.matmul %89, %1, %cst_54 {dimension_numbers = #tpu.dot_dimension_numbers<[1], [0], [0], [1], [0, 0, 1, 1], [], []>} : vector<16x128xf32>, vector<128x128xf32>, vector<16x128xf32> -> vector<16x128xf32>
    %91 = arith.mulf %79, %79 : vector<16x128xf32>
    %92 = arith.mulf %81, %81 : vector<16x128xf32>
    %93 = arith.mulf %79, %81 : vector<16x128xf32>
    %94 = arith.subf %84, %91 : vector<16x128xf32>
    %95 = arith.subf %87, %92 : vector<16x128xf32>
    %96 = arith.subf %90, %93 : vector<16x128xf32>
    %cst_55 = arith.constant 2.000000e+00 : f32
    %97 = vector.broadcast %cst_55 : f32 to vector<16x128xf32>
    %98 = arith.mulf %97, %93 : vector<16x128xf32>
    %cst_56 = arith.constant 9.99999974E-5 : f32
    %99 = vector.broadcast %cst_56 : f32 to vector<16x128xf32>
    %100 = arith.addf %98, %99 : vector<16x128xf32>
    %cst_57 = arith.constant 2.000000e+00 : f32
    %101 = vector.broadcast %cst_57 : f32 to vector<16x128xf32>
    %102 = arith.mulf %101, %96 : vector<16x128xf32>
    %cst_58 = arith.constant 8.99999984E-4 : f32
    %103 = vector.broadcast %cst_58 : f32 to vector<16x128xf32>
    %104 = arith.addf %102, %103 : vector<16x128xf32>
    %105 = arith.mulf %100, %104 : vector<16x128xf32>
    %106 = arith.addf %91, %92 : vector<16x128xf32>
    %cst_59 = arith.constant 9.99999974E-5 : f32
    %107 = vector.broadcast %cst_59 : f32 to vector<16x128xf32>
    %108 = arith.addf %106, %107 : vector<16x128xf32>
    %109 = arith.addf %94, %95 : vector<16x128xf32>
    %cst_60 = arith.constant 8.99999984E-4 : f32
    %110 = vector.broadcast %cst_60 : f32 to vector<16x128xf32>
    %111 = arith.addf %109, %110 : vector<16x128xf32>
    %112 = arith.mulf %108, %111 : vector<16x128xf32>
    %113 = tpu.reciprocal %112 {approx = true} : vector<16x128xf32> -> vector<16x128xf32>
    %114 = arith.mulf %112, %113 : vector<16x128xf32>
    %cst_61 = arith.constant 2.000000e+00 : f32
    %115 = vector.broadcast %cst_61 : f32 to vector<16x128xf32>
    %116 = arith.subf %115, %114 : vector<16x128xf32>
    %117 = arith.mulf %113, %116 : vector<16x128xf32>
    %118 = arith.mulf %105, %117 : vector<16x128xf32>
    %119 = arith.mulf %118, %20 : vector<16x128xf32>
    %120 = vector.shape_cast %119 : vector<16x128xf32> to vector<1x16x128xf32>
    %cst_62 = arith.constant dense<0.000000e+00> : vector<1xf32>
    %121 = vector.multi_reduction <add>, %120, %cst_62 [1, 2] : vector<1x16x128xf32> to vector<1xf32>
    %122 = vector.shape_cast %121 : vector<1xf32> to vector<1x1x1xf32>
    %123 = vector.extract %122[0, 0, 0] : f32 from vector<1x1x1xf32>
    %124 = vector.broadcast %123 : f32 to vector<1x1xf32>
    %125 = arith.addf %73, %124 : vector<1x1xf32>
    %c2 = arith.constant 2 : index
    %c0_63 = arith.constant 0 : index
    %c0_64 = arith.constant 0 : index
    %c0_65 = arith.constant 0 : index
    %c0_66 = arith.constant 0 : index
    %126 = vector.load %arg3[%c2, %c0_63, %c0_64, %c0_65, %c0_66] : memref<8x1x1x32x128xf32, #tpu.memory_space<vmem>>, vector<1x1x1x32x128xf32>
    %127 = vector.shape_cast %126 : vector<1x1x1x32x128xf32> to vector<32x128xf32>
    %c2_67 = arith.constant 2 : index
    %c0_68 = arith.constant 0 : index
    %c0_69 = arith.constant 0 : index
    %c0_70 = arith.constant 0 : index
    %c0_71 = arith.constant 0 : index
    %128 = vector.load %arg4[%c2_67, %c0_68, %c0_69, %c0_70, %c0_71] : memref<8x1x1x32x128xf32, #tpu.memory_space<vmem>>, vector<1x1x1x32x128xf32>
    %129 = vector.shape_cast %128 : vector<1x1x1x32x128xf32> to vector<32x128xf32>
    %cst_72 = arith.constant dense<0.000000e+00> : vector<16x128xf32>
    %130 = tpu.matmul %0, %127, %cst_72 {dimension_numbers = #tpu.dot_dimension_numbers<[1], [0], [0], [1], [0, 0, 1, 1], [], []>} : vector<16x32xf32>, vector<32x128xf32>, vector<16x128xf32> -> vector<16x128xf32>
    %cst_73 = arith.constant dense<0.000000e+00> : vector<16x128xf32>
    %131 = tpu.matmul %130, %1, %cst_73 {dimension_numbers = #tpu.dot_dimension_numbers<[1], [0], [0], [1], [0, 0, 1, 1], [], []>} : vector<16x128xf32>, vector<128x128xf32>, vector<16x128xf32> -> vector<16x128xf32>
    %cst_74 = arith.constant dense<0.000000e+00> : vector<16x128xf32>
    %132 = tpu.matmul %0, %129, %cst_74 {dimension_numbers = #tpu.dot_dimension_numbers<[1], [0], [0], [1], [0, 0, 1, 1], [], []>} : vector<16x32xf32>, vector<32x128xf32>, vector<16x128xf32> -> vector<16x128xf32>
    %cst_75 = arith.constant dense<0.000000e+00> : vector<16x128xf32>
    %133 = tpu.matmul %132, %1, %cst_75 {dimension_numbers = #tpu.dot_dimension_numbers<[1], [0], [0], [1], [0, 0, 1, 1], [], []>} : vector<16x128xf32>, vector<128x128xf32>, vector<16x128xf32> -> vector<16x128xf32>
    %134 = arith.mulf %127, %127 : vector<32x128xf32>
    %cst_76 = arith.constant dense<0.000000e+00> : vector<16x128xf32>
    %135 = tpu.matmul %0, %134, %cst_76 {dimension_numbers = #tpu.dot_dimension_numbers<[1], [0], [0], [1], [0, 0, 1, 1], [], []>} : vector<16x32xf32>, vector<32x128xf32>, vector<16x128xf32> -> vector<16x128xf32>
    %cst_77 = arith.constant dense<0.000000e+00> : vector<16x128xf32>
    %136 = tpu.matmul %135, %1, %cst_77 {dimension_numbers = #tpu.dot_dimension_numbers<[1], [0], [0], [1], [0, 0, 1, 1], [], []>} : vector<16x128xf32>, vector<128x128xf32>, vector<16x128xf32> -> vector<16x128xf32>
    %137 = arith.mulf %129, %129 : vector<32x128xf32>
    %cst_78 = arith.constant dense<0.000000e+00> : vector<16x128xf32>
    %138 = tpu.matmul %0, %137, %cst_78 {dimension_numbers = #tpu.dot_dimension_numbers<[1], [0], [0], [1], [0, 0, 1, 1], [], []>} : vector<16x32xf32>, vector<32x128xf32>, vector<16x128xf32> -> vector<16x128xf32>
    %cst_79 = arith.constant dense<0.000000e+00> : vector<16x128xf32>
    %139 = tpu.matmul %138, %1, %cst_79 {dimension_numbers = #tpu.dot_dimension_numbers<[1], [0], [0], [1], [0, 0, 1, 1], [], []>} : vector<16x128xf32>, vector<128x128xf32>, vector<16x128xf32> -> vector<16x128xf32>
    %140 = arith.mulf %127, %129 : vector<32x128xf32>
    %cst_80 = arith.constant dense<0.000000e+00> : vector<16x128xf32>
    %141 = tpu.matmul %0, %140, %cst_80 {dimension_numbers = #tpu.dot_dimension_numbers<[1], [0], [0], [1], [0, 0, 1, 1], [], []>} : vector<16x32xf32>, vector<32x128xf32>, vector<16x128xf32> -> vector<16x128xf32>
    %cst_81 = arith.constant dense<0.000000e+00> : vector<16x128xf32>
    %142 = tpu.matmul %141, %1, %cst_81 {dimension_numbers = #tpu.dot_dimension_numbers<[1], [0], [0], [1], [0, 0, 1, 1], [], []>} : vector<16x128xf32>, vector<128x128xf32>, vector<16x128xf32> -> vector<16x128xf32>
    %143 = arith.mulf %131, %131 : vector<16x128xf32>
    %144 = arith.mulf %133, %133 : vector<16x128xf32>
    %145 = arith.mulf %131, %133 : vector<16x128xf32>
    %146 = arith.subf %136, %143 : vector<16x128xf32>
    %147 = arith.subf %139, %144 : vector<16x128xf32>
    %148 = arith.subf %142, %145 : vector<16x128xf32>
    %cst_82 = arith.constant 2.000000e+00 : f32
    %149 = vector.broadcast %cst_82 : f32 to vector<16x128xf32>
    %150 = arith.mulf %149, %145 : vector<16x128xf32>
    %cst_83 = arith.constant 9.99999974E-5 : f32
    %151 = vector.broadcast %cst_83 : f32 to vector<16x128xf32>
    %152 = arith.addf %150, %151 : vector<16x128xf32>
    %cst_84 = arith.constant 2.000000e+00 : f32
    %153 = vector.broadcast %cst_84 : f32 to vector<16x128xf32>
    %154 = arith.mulf %153, %148 : vector<16x128xf32>
    %cst_85 = arith.constant 8.99999984E-4 : f32
    %155 = vector.broadcast %cst_85 : f32 to vector<16x128xf32>
    %156 = arith.addf %154, %155 : vector<16x128xf32>
    %157 = arith.mulf %152, %156 : vector<16x128xf32>
    %158 = arith.addf %143, %144 : vector<16x128xf32>
    %cst_86 = arith.constant 9.99999974E-5 : f32
    %159 = vector.broadcast %cst_86 : f32 to vector<16x128xf32>
    %160 = arith.addf %158, %159 : vector<16x128xf32>
    %161 = arith.addf %146, %147 : vector<16x128xf32>
    %cst_87 = arith.constant 8.99999984E-4 : f32
    %162 = vector.broadcast %cst_87 : f32 to vector<16x128xf32>
    %163 = arith.addf %161, %162 : vector<16x128xf32>
    %164 = arith.mulf %160, %163 : vector<16x128xf32>
    %165 = tpu.reciprocal %164 {approx = true} : vector<16x128xf32> -> vector<16x128xf32>
    %166 = arith.mulf %164, %165 : vector<16x128xf32>
    %cst_88 = arith.constant 2.000000e+00 : f32
    %167 = vector.broadcast %cst_88 : f32 to vector<16x128xf32>
    %168 = arith.subf %167, %166 : vector<16x128xf32>
    %169 = arith.mulf %165, %168 : vector<16x128xf32>
    %170 = arith.mulf %157, %169 : vector<16x128xf32>
    %171 = arith.mulf %170, %20 : vector<16x128xf32>
    %172 = vector.shape_cast %171 : vector<16x128xf32> to vector<1x16x128xf32>
    %cst_89 = arith.constant dense<0.000000e+00> : vector<1xf32>
    %173 = vector.multi_reduction <add>, %172, %cst_89 [1, 2] : vector<1x16x128xf32> to vector<1xf32>
    %174 = vector.shape_cast %173 : vector<1xf32> to vector<1x1x1xf32>
    %175 = vector.extract %174[0, 0, 0] : f32 from vector<1x1x1xf32>
    %176 = vector.broadcast %175 : f32 to vector<1x1xf32>
    %177 = arith.addf %125, %176 : vector<1x1xf32>
    %c3 = arith.constant 3 : index
    %c0_90 = arith.constant 0 : index
    %c0_91 = arith.constant 0 : index
    %c0_92 = arith.constant 0 : index
    %c0_93 = arith.constant 0 : index
    %178 = vector.load %arg3[%c3, %c0_90, %c0_91, %c0_92, %c0_93] : memref<8x1x1x32x128xf32, #tpu.memory_space<vmem>>, vector<1x1x1x32x128xf32>
    %179 = vector.shape_cast %178 : vector<1x1x1x32x128xf32> to vector<32x128xf32>
    %c3_94 = arith.constant 3 : index
    %c0_95 = arith.constant 0 : index
    %c0_96 = arith.constant 0 : index
    %c0_97 = arith.constant 0 : index
    %c0_98 = arith.constant 0 : index
    %180 = vector.load %arg4[%c3_94, %c0_95, %c0_96, %c0_97, %c0_98] : memref<8x1x1x32x128xf32, #tpu.memory_space<vmem>>, vector<1x1x1x32x128xf32>
    %181 = vector.shape_cast %180 : vector<1x1x1x32x128xf32> to vector<32x128xf32>
    %cst_99 = arith.constant dense<0.000000e+00> : vector<16x128xf32>
    %182 = tpu.matmul %0, %179, %cst_99 {dimension_numbers = #tpu.dot_dimension_numbers<[1], [0], [0], [1], [0, 0, 1, 1], [], []>} : vector<16x32xf32>, vector<32x128xf32>, vector<16x128xf32> -> vector<16x128xf32>
    %cst_100 = arith.constant dense<0.000000e+00> : vector<16x128xf32>
    %183 = tpu.matmul %182, %1, %cst_100 {dimension_numbers = #tpu.dot_dimension_numbers<[1], [0], [0], [1], [0, 0, 1, 1], [], []>} : vector<16x128xf32>, vector<128x128xf32>, vector<16x128xf32> -> vector<16x128xf32>
    %cst_101 = arith.constant dense<0.000000e+00> : vector<16x128xf32>
    %184 = tpu.matmul %0, %181, %cst_101 {dimension_numbers = #tpu.dot_dimension_numbers<[1], [0], [0], [1], [0, 0, 1, 1], [], []>} : vector<16x32xf32>, vector<32x128xf32>, vector<16x128xf32> -> vector<16x128xf32>
    %cst_102 = arith.constant dense<0.000000e+00> : vector<16x128xf32>
    %185 = tpu.matmul %184, %1, %cst_102 {dimension_numbers = #tpu.dot_dimension_numbers<[1], [0], [0], [1], [0, 0, 1, 1], [], []>} : vector<16x128xf32>, vector<128x128xf32>, vector<16x128xf32> -> vector<16x128xf32>
    %186 = arith.mulf %179, %179 : vector<32x128xf32>
    %cst_103 = arith.constant dense<0.000000e+00> : vector<16x128xf32>
    %187 = tpu.matmul %0, %186, %cst_103 {dimension_numbers = #tpu.dot_dimension_numbers<[1], [0], [0], [1], [0, 0, 1, 1], [], []>} : vector<16x32xf32>, vector<32x128xf32>, vector<16x128xf32> -> vector<16x128xf32>
    %cst_104 = arith.constant dense<0.000000e+00> : vector<16x128xf32>
    %188 = tpu.matmul %187, %1, %cst_104 {dimension_numbers = #tpu.dot_dimension_numbers<[1], [0], [0], [1], [0, 0, 1, 1], [], []>} : vector<16x128xf32>, vector<128x128xf32>, vector<16x128xf32> -> vector<16x128xf32>
    %189 = arith.mulf %181, %181 : vector<32x128xf32>
    %cst_105 = arith.constant dense<0.000000e+00> : vector<16x128xf32>
    %190 = tpu.matmul %0, %189, %cst_105 {dimension_numbers = #tpu.dot_dimension_numbers<[1], [0], [0], [1], [0, 0, 1, 1], [], []>} : vector<16x32xf32>, vector<32x128xf32>, vector<16x128xf32> -> vector<16x128xf32>
    %cst_106 = arith.constant dense<0.000000e+00> : vector<16x128xf32>
    %191 = tpu.matmul %190, %1, %cst_106 {dimension_numbers = #tpu.dot_dimension_numbers<[1], [0], [0], [1], [0, 0, 1, 1], [], []>} : vector<16x128xf32>, vector<128x128xf32>, vector<16x128xf32> -> vector<16x128xf32>
    %192 = arith.mulf %179, %181 : vector<32x128xf32>
    %cst_107 = arith.constant dense<0.000000e+00> : vector<16x128xf32>
    %193 = tpu.matmul %0, %192, %cst_107 {dimension_numbers = #tpu.dot_dimension_numbers<[1], [0], [0], [1], [0, 0, 1, 1], [], []>} : vector<16x32xf32>, vector<32x128xf32>, vector<16x128xf32> -> vector<16x128xf32>
    %cst_108 = arith.constant dense<0.000000e+00> : vector<16x128xf32>
    %194 = tpu.matmul %193, %1, %cst_108 {dimension_numbers = #tpu.dot_dimension_numbers<[1], [0], [0], [1], [0, 0, 1, 1], [], []>} : vector<16x128xf32>, vector<128x128xf32>, vector<16x128xf32> -> vector<16x128xf32>
    %195 = arith.mulf %183, %183 : vector<16x128xf32>
    %196 = arith.mulf %185, %185 : vector<16x128xf32>
    %197 = arith.mulf %183, %185 : vector<16x128xf32>
    %198 = arith.subf %188, %195 : vector<16x128xf32>
    %199 = arith.subf %191, %196 : vector<16x128xf32>
    %200 = arith.subf %194, %197 : vector<16x128xf32>
    %cst_109 = arith.constant 2.000000e+00 : f32
    %201 = vector.broadcast %cst_109 : f32 to vector<16x128xf32>
    %202 = arith.mulf %201, %197 : vector<16x128xf32>
    %cst_110 = arith.constant 9.99999974E-5 : f32
    %203 = vector.broadcast %cst_110 : f32 to vector<16x128xf32>
    %204 = arith.addf %202, %203 : vector<16x128xf32>
    %cst_111 = arith.constant 2.000000e+00 : f32
    %205 = vector.broadcast %cst_111 : f32 to vector<16x128xf32>
    %206 = arith.mulf %205, %200 : vector<16x128xf32>
    %cst_112 = arith.constant 8.99999984E-4 : f32
    %207 = vector.broadcast %cst_112 : f32 to vector<16x128xf32>
    %208 = arith.addf %206, %207 : vector<16x128xf32>
    %209 = arith.mulf %204, %208 : vector<16x128xf32>
    %210 = arith.addf %195, %196 : vector<16x128xf32>
    %cst_113 = arith.constant 9.99999974E-5 : f32
    %211 = vector.broadcast %cst_113 : f32 to vector<16x128xf32>
    %212 = arith.addf %210, %211 : vector<16x128xf32>
    %213 = arith.addf %198, %199 : vector<16x128xf32>
    %cst_114 = arith.constant 8.99999984E-4 : f32
    %214 = vector.broadcast %cst_114 : f32 to vector<16x128xf32>
    %215 = arith.addf %213, %214 : vector<16x128xf32>
    %216 = arith.mulf %212, %215 : vector<16x128xf32>
    %217 = tpu.reciprocal %216 {approx = true} : vector<16x128xf32> -> vector<16x128xf32>
    %218 = arith.mulf %216, %217 : vector<16x128xf32>
    %cst_115 = arith.constant 2.000000e+00 : f32
    %219 = vector.broadcast %cst_115 : f32 to vector<16x128xf32>
    %220 = arith.subf %219, %218 : vector<16x128xf32>
    %221 = arith.mulf %217, %220 : vector<16x128xf32>
    %222 = arith.mulf %209, %221 : vector<16x128xf32>
    %223 = arith.mulf %222, %20 : vector<16x128xf32>
    %224 = vector.shape_cast %223 : vector<16x128xf32> to vector<1x16x128xf32>
    %cst_116 = arith.constant dense<0.000000e+00> : vector<1xf32>
    %225 = vector.multi_reduction <add>, %224, %cst_116 [1, 2] : vector<1x16x128xf32> to vector<1xf32>
    %226 = vector.shape_cast %225 : vector<1xf32> to vector<1x1x1xf32>
    %227 = vector.extract %226[0, 0, 0] : f32 from vector<1x1x1xf32>
    %228 = vector.broadcast %227 : f32 to vector<1x1xf32>
    %229 = arith.addf %177, %228 : vector<1x1xf32>
    %c4 = arith.constant 4 : index
    %c0_117 = arith.constant 0 : index
    %c0_118 = arith.constant 0 : index
    %c0_119 = arith.constant 0 : index
    %c0_120 = arith.constant 0 : index
    %230 = vector.load %arg3[%c4, %c0_117, %c0_118, %c0_119, %c0_120] : memref<8x1x1x32x128xf32, #tpu.memory_space<vmem>>, vector<1x1x1x32x128xf32>
    %231 = vector.shape_cast %230 : vector<1x1x1x32x128xf32> to vector<32x128xf32>
    %c4_121 = arith.constant 4 : index
    %c0_122 = arith.constant 0 : index
    %c0_123 = arith.constant 0 : index
    %c0_124 = arith.constant 0 : index
    %c0_125 = arith.constant 0 : index
    %232 = vector.load %arg4[%c4_121, %c0_122, %c0_123, %c0_124, %c0_125] : memref<8x1x1x32x128xf32, #tpu.memory_space<vmem>>, vector<1x1x1x32x128xf32>
    %233 = vector.shape_cast %232 : vector<1x1x1x32x128xf32> to vector<32x128xf32>
    %cst_126 = arith.constant dense<0.000000e+00> : vector<16x128xf32>
    %234 = tpu.matmul %0, %231, %cst_126 {dimension_numbers = #tpu.dot_dimension_numbers<[1], [0], [0], [1], [0, 0, 1, 1], [], []>} : vector<16x32xf32>, vector<32x128xf32>, vector<16x128xf32> -> vector<16x128xf32>
    %cst_127 = arith.constant dense<0.000000e+00> : vector<16x128xf32>
    %235 = tpu.matmul %234, %1, %cst_127 {dimension_numbers = #tpu.dot_dimension_numbers<[1], [0], [0], [1], [0, 0, 1, 1], [], []>} : vector<16x128xf32>, vector<128x128xf32>, vector<16x128xf32> -> vector<16x128xf32>
    %cst_128 = arith.constant dense<0.000000e+00> : vector<16x128xf32>
    %236 = tpu.matmul %0, %233, %cst_128 {dimension_numbers = #tpu.dot_dimension_numbers<[1], [0], [0], [1], [0, 0, 1, 1], [], []>} : vector<16x32xf32>, vector<32x128xf32>, vector<16x128xf32> -> vector<16x128xf32>
    %cst_129 = arith.constant dense<0.000000e+00> : vector<16x128xf32>
    %237 = tpu.matmul %236, %1, %cst_129 {dimension_numbers = #tpu.dot_dimension_numbers<[1], [0], [0], [1], [0, 0, 1, 1], [], []>} : vector<16x128xf32>, vector<128x128xf32>, vector<16x128xf32> -> vector<16x128xf32>
    %238 = arith.mulf %231, %231 : vector<32x128xf32>
    %cst_130 = arith.constant dense<0.000000e+00> : vector<16x128xf32>
    %239 = tpu.matmul %0, %238, %cst_130 {dimension_numbers = #tpu.dot_dimension_numbers<[1], [0], [0], [1], [0, 0, 1, 1], [], []>} : vector<16x32xf32>, vector<32x128xf32>, vector<16x128xf32> -> vector<16x128xf32>
    %cst_131 = arith.constant dense<0.000000e+00> : vector<16x128xf32>
    %240 = tpu.matmul %239, %1, %cst_131 {dimension_numbers = #tpu.dot_dimension_numbers<[1], [0], [0], [1], [0, 0, 1, 1], [], []>} : vector<16x128xf32>, vector<128x128xf32>, vector<16x128xf32> -> vector<16x128xf32>
    %241 = arith.mulf %233, %233 : vector<32x128xf32>
    %cst_132 = arith.constant dense<0.000000e+00> : vector<16x128xf32>
    %242 = tpu.matmul %0, %241, %cst_132 {dimension_numbers = #tpu.dot_dimension_numbers<[1], [0], [0], [1], [0, 0, 1, 1], [], []>} : vector<16x32xf32>, vector<32x128xf32>, vector<16x128xf32> -> vector<16x128xf32>
    %cst_133 = arith.constant dense<0.000000e+00> : vector<16x128xf32>
    %243 = tpu.matmul %242, %1, %cst_133 {dimension_numbers = #tpu.dot_dimension_numbers<[1], [0], [0], [1], [0, 0, 1, 1], [], []>} : vector<16x128xf32>, vector<128x128xf32>, vector<16x128xf32> -> vector<16x128xf32>
    %244 = arith.mulf %231, %233 : vector<32x128xf32>
    %cst_134 = arith.constant dense<0.000000e+00> : vector<16x128xf32>
    %245 = tpu.matmul %0, %244, %cst_134 {dimension_numbers = #tpu.dot_dimension_numbers<[1], [0], [0], [1], [0, 0, 1, 1], [], []>} : vector<16x32xf32>, vector<32x128xf32>, vector<16x128xf32> -> vector<16x128xf32>
    %cst_135 = arith.constant dense<0.000000e+00> : vector<16x128xf32>
    %246 = tpu.matmul %245, %1, %cst_135 {dimension_numbers = #tpu.dot_dimension_numbers<[1], [0], [0], [1], [0, 0, 1, 1], [], []>} : vector<16x128xf32>, vector<128x128xf32>, vector<16x128xf32> -> vector<16x128xf32>
    %247 = arith.mulf %235, %235 : vector<16x128xf32>
    %248 = arith.mulf %237, %237 : vector<16x128xf32>
    %249 = arith.mulf %235, %237 : vector<16x128xf32>
    %250 = arith.subf %240, %247 : vector<16x128xf32>
    %251 = arith.subf %243, %248 : vector<16x128xf32>
    %252 = arith.subf %246, %249 : vector<16x128xf32>
    %cst_136 = arith.constant 2.000000e+00 : f32
    %253 = vector.broadcast %cst_136 : f32 to vector<16x128xf32>
    %254 = arith.mulf %253, %249 : vector<16x128xf32>
    %cst_137 = arith.constant 9.99999974E-5 : f32
    %255 = vector.broadcast %cst_137 : f32 to vector<16x128xf32>
    %256 = arith.addf %254, %255 : vector<16x128xf32>
    %cst_138 = arith.constant 2.000000e+00 : f32
    %257 = vector.broadcast %cst_138 : f32 to vector<16x128xf32>
    %258 = arith.mulf %257, %252 : vector<16x128xf32>
    %cst_139 = arith.constant 8.99999984E-4 : f32
    %259 = vector.broadcast %cst_139 : f32 to vector<16x128xf32>
    %260 = arith.addf %258, %259 : vector<16x128xf32>
    %261 = arith.mulf %256, %260 : vector<16x128xf32>
    %262 = arith.addf %247, %248 : vector<16x128xf32>
    %cst_140 = arith.constant 9.99999974E-5 : f32
    %263 = vector.broadcast %cst_140 : f32 to vector<16x128xf32>
    %264 = arith.addf %262, %263 : vector<16x128xf32>
    %265 = arith.addf %250, %251 : vector<16x128xf32>
    %cst_141 = arith.constant 8.99999984E-4 : f32
    %266 = vector.broadcast %cst_141 : f32 to vector<16x128xf32>
    %267 = arith.addf %265, %266 : vector<16x128xf32>
    %268 = arith.mulf %264, %267 : vector<16x128xf32>
    %269 = tpu.reciprocal %268 {approx = true} : vector<16x128xf32> -> vector<16x128xf32>
    %270 = arith.mulf %268, %269 : vector<16x128xf32>
    %cst_142 = arith.constant 2.000000e+00 : f32
    %271 = vector.broadcast %cst_142 : f32 to vector<16x128xf32>
    %272 = arith.subf %271, %270 : vector<16x128xf32>
    %273 = arith.mulf %269, %272 : vector<16x128xf32>
    %274 = arith.mulf %261, %273 : vector<16x128xf32>
    %275 = arith.mulf %274, %20 : vector<16x128xf32>
    %276 = vector.shape_cast %275 : vector<16x128xf32> to vector<1x16x128xf32>
    %cst_143 = arith.constant dense<0.000000e+00> : vector<1xf32>
    %277 = vector.multi_reduction <add>, %276, %cst_143 [1, 2] : vector<1x16x128xf32> to vector<1xf32>
    %278 = vector.shape_cast %277 : vector<1xf32> to vector<1x1x1xf32>
    %279 = vector.extract %278[0, 0, 0] : f32 from vector<1x1x1xf32>
    %280 = vector.broadcast %279 : f32 to vector<1x1xf32>
    %281 = arith.addf %229, %280 : vector<1x1xf32>
    %c5 = arith.constant 5 : index
    %c0_144 = arith.constant 0 : index
    %c0_145 = arith.constant 0 : index
    %c0_146 = arith.constant 0 : index
    %c0_147 = arith.constant 0 : index
    %282 = vector.load %arg3[%c5, %c0_144, %c0_145, %c0_146, %c0_147] : memref<8x1x1x32x128xf32, #tpu.memory_space<vmem>>, vector<1x1x1x32x128xf32>
    %283 = vector.shape_cast %282 : vector<1x1x1x32x128xf32> to vector<32x128xf32>
    %c5_148 = arith.constant 5 : index
    %c0_149 = arith.constant 0 : index
    %c0_150 = arith.constant 0 : index
    %c0_151 = arith.constant 0 : index
    %c0_152 = arith.constant 0 : index
    %284 = vector.load %arg4[%c5_148, %c0_149, %c0_150, %c0_151, %c0_152] : memref<8x1x1x32x128xf32, #tpu.memory_space<vmem>>, vector<1x1x1x32x128xf32>
    %285 = vector.shape_cast %284 : vector<1x1x1x32x128xf32> to vector<32x128xf32>
    %cst_153 = arith.constant dense<0.000000e+00> : vector<16x128xf32>
    %286 = tpu.matmul %0, %283, %cst_153 {dimension_numbers = #tpu.dot_dimension_numbers<[1], [0], [0], [1], [0, 0, 1, 1], [], []>} : vector<16x32xf32>, vector<32x128xf32>, vector<16x128xf32> -> vector<16x128xf32>
    %cst_154 = arith.constant dense<0.000000e+00> : vector<16x128xf32>
    %287 = tpu.matmul %286, %1, %cst_154 {dimension_numbers = #tpu.dot_dimension_numbers<[1], [0], [0], [1], [0, 0, 1, 1], [], []>} : vector<16x128xf32>, vector<128x128xf32>, vector<16x128xf32> -> vector<16x128xf32>
    %cst_155 = arith.constant dense<0.000000e+00> : vector<16x128xf32>
    %288 = tpu.matmul %0, %285, %cst_155 {dimension_numbers = #tpu.dot_dimension_numbers<[1], [0], [0], [1], [0, 0, 1, 1], [], []>} : vector<16x32xf32>, vector<32x128xf32>, vector<16x128xf32> -> vector<16x128xf32>
    %cst_156 = arith.constant dense<0.000000e+00> : vector<16x128xf32>
    %289 = tpu.matmul %288, %1, %cst_156 {dimension_numbers = #tpu.dot_dimension_numbers<[1], [0], [0], [1], [0, 0, 1, 1], [], []>} : vector<16x128xf32>, vector<128x128xf32>, vector<16x128xf32> -> vector<16x128xf32>
    %290 = arith.mulf %283, %283 : vector<32x128xf32>
    %cst_157 = arith.constant dense<0.000000e+00> : vector<16x128xf32>
    %291 = tpu.matmul %0, %290, %cst_157 {dimension_numbers = #tpu.dot_dimension_numbers<[1], [0], [0], [1], [0, 0, 1, 1], [], []>} : vector<16x32xf32>, vector<32x128xf32>, vector<16x128xf32> -> vector<16x128xf32>
    %cst_158 = arith.constant dense<0.000000e+00> : vector<16x128xf32>
    %292 = tpu.matmul %291, %1, %cst_158 {dimension_numbers = #tpu.dot_dimension_numbers<[1], [0], [0], [1], [0, 0, 1, 1], [], []>} : vector<16x128xf32>, vector<128x128xf32>, vector<16x128xf32> -> vector<16x128xf32>
    %293 = arith.mulf %285, %285 : vector<32x128xf32>
    %cst_159 = arith.constant dense<0.000000e+00> : vector<16x128xf32>
    %294 = tpu.matmul %0, %293, %cst_159 {dimension_numbers = #tpu.dot_dimension_numbers<[1], [0], [0], [1], [0, 0, 1, 1], [], []>} : vector<16x32xf32>, vector<32x128xf32>, vector<16x128xf32> -> vector<16x128xf32>
    %cst_160 = arith.constant dense<0.000000e+00> : vector<16x128xf32>
    %295 = tpu.matmul %294, %1, %cst_160 {dimension_numbers = #tpu.dot_dimension_numbers<[1], [0], [0], [1], [0, 0, 1, 1], [], []>} : vector<16x128xf32>, vector<128x128xf32>, vector<16x128xf32> -> vector<16x128xf32>
    %296 = arith.mulf %283, %285 : vector<32x128xf32>
    %cst_161 = arith.constant dense<0.000000e+00> : vector<16x128xf32>
    %297 = tpu.matmul %0, %296, %cst_161 {dimension_numbers = #tpu.dot_dimension_numbers<[1], [0], [0], [1], [0, 0, 1, 1], [], []>} : vector<16x32xf32>, vector<32x128xf32>, vector<16x128xf32> -> vector<16x128xf32>
    %cst_162 = arith.constant dense<0.000000e+00> : vector<16x128xf32>
    %298 = tpu.matmul %297, %1, %cst_162 {dimension_numbers = #tpu.dot_dimension_numbers<[1], [0], [0], [1], [0, 0, 1, 1], [], []>} : vector<16x128xf32>, vector<128x128xf32>, vector<16x128xf32> -> vector<16x128xf32>
    %299 = arith.mulf %287, %287 : vector<16x128xf32>
    %300 = arith.mulf %289, %289 : vector<16x128xf32>
    %301 = arith.mulf %287, %289 : vector<16x128xf32>
    %302 = arith.subf %292, %299 : vector<16x128xf32>
    %303 = arith.subf %295, %300 : vector<16x128xf32>
    %304 = arith.subf %298, %301 : vector<16x128xf32>
    %cst_163 = arith.constant 2.000000e+00 : f32
    %305 = vector.broadcast %cst_163 : f32 to vector<16x128xf32>
    %306 = arith.mulf %305, %301 : vector<16x128xf32>
    %cst_164 = arith.constant 9.99999974E-5 : f32
    %307 = vector.broadcast %cst_164 : f32 to vector<16x128xf32>
    %308 = arith.addf %306, %307 : vector<16x128xf32>
    %cst_165 = arith.constant 2.000000e+00 : f32
    %309 = vector.broadcast %cst_165 : f32 to vector<16x128xf32>
    %310 = arith.mulf %309, %304 : vector<16x128xf32>
    %cst_166 = arith.constant 8.99999984E-4 : f32
    %311 = vector.broadcast %cst_166 : f32 to vector<16x128xf32>
    %312 = arith.addf %310, %311 : vector<16x128xf32>
    %313 = arith.mulf %308, %312 : vector<16x128xf32>
    %314 = arith.addf %299, %300 : vector<16x128xf32>
    %cst_167 = arith.constant 9.99999974E-5 : f32
    %315 = vector.broadcast %cst_167 : f32 to vector<16x128xf32>
    %316 = arith.addf %314, %315 : vector<16x128xf32>
    %317 = arith.addf %302, %303 : vector<16x128xf32>
    %cst_168 = arith.constant 8.99999984E-4 : f32
    %318 = vector.broadcast %cst_168 : f32 to vector<16x128xf32>
    %319 = arith.addf %317, %318 : vector<16x128xf32>
    %320 = arith.mulf %316, %319 : vector<16x128xf32>
    %321 = tpu.reciprocal %320 {approx = true} : vector<16x128xf32> -> vector<16x128xf32>
    %322 = arith.mulf %320, %321 : vector<16x128xf32>
    %cst_169 = arith.constant 2.000000e+00 : f32
    %323 = vector.broadcast %cst_169 : f32 to vector<16x128xf32>
    %324 = arith.subf %323, %322 : vector<16x128xf32>
    %325 = arith.mulf %321, %324 : vector<16x128xf32>
    %326 = arith.mulf %313, %325 : vector<16x128xf32>
    %327 = arith.mulf %326, %20 : vector<16x128xf32>
    %328 = vector.shape_cast %327 : vector<16x128xf32> to vector<1x16x128xf32>
    %cst_170 = arith.constant dense<0.000000e+00> : vector<1xf32>
    %329 = vector.multi_reduction <add>, %328, %cst_170 [1, 2] : vector<1x16x128xf32> to vector<1xf32>
    %330 = vector.shape_cast %329 : vector<1xf32> to vector<1x1x1xf32>
    %331 = vector.extract %330[0, 0, 0] : f32 from vector<1x1x1xf32>
    %332 = vector.broadcast %331 : f32 to vector<1x1xf32>
    %333 = arith.addf %281, %332 : vector<1x1xf32>
    %c6 = arith.constant 6 : index
    %c0_171 = arith.constant 0 : index
    %c0_172 = arith.constant 0 : index
    %c0_173 = arith.constant 0 : index
    %c0_174 = arith.constant 0 : index
    %334 = vector.load %arg3[%c6, %c0_171, %c0_172, %c0_173, %c0_174] : memref<8x1x1x32x128xf32, #tpu.memory_space<vmem>>, vector<1x1x1x32x128xf32>
    %335 = vector.shape_cast %334 : vector<1x1x1x32x128xf32> to vector<32x128xf32>
    %c6_175 = arith.constant 6 : index
    %c0_176 = arith.constant 0 : index
    %c0_177 = arith.constant 0 : index
    %c0_178 = arith.constant 0 : index
    %c0_179 = arith.constant 0 : index
    %336 = vector.load %arg4[%c6_175, %c0_176, %c0_177, %c0_178, %c0_179] : memref<8x1x1x32x128xf32, #tpu.memory_space<vmem>>, vector<1x1x1x32x128xf32>
    %337 = vector.shape_cast %336 : vector<1x1x1x32x128xf32> to vector<32x128xf32>
    %cst_180 = arith.constant dense<0.000000e+00> : vector<16x128xf32>
    %338 = tpu.matmul %0, %335, %cst_180 {dimension_numbers = #tpu.dot_dimension_numbers<[1], [0], [0], [1], [0, 0, 1, 1], [], []>} : vector<16x32xf32>, vector<32x128xf32>, vector<16x128xf32> -> vector<16x128xf32>
    %cst_181 = arith.constant dense<0.000000e+00> : vector<16x128xf32>
    %339 = tpu.matmul %338, %1, %cst_181 {dimension_numbers = #tpu.dot_dimension_numbers<[1], [0], [0], [1], [0, 0, 1, 1], [], []>} : vector<16x128xf32>, vector<128x128xf32>, vector<16x128xf32> -> vector<16x128xf32>
    %cst_182 = arith.constant dense<0.000000e+00> : vector<16x128xf32>
    %340 = tpu.matmul %0, %337, %cst_182 {dimension_numbers = #tpu.dot_dimension_numbers<[1], [0], [0], [1], [0, 0, 1, 1], [], []>} : vector<16x32xf32>, vector<32x128xf32>, vector<16x128xf32> -> vector<16x128xf32>
    %cst_183 = arith.constant dense<0.000000e+00> : vector<16x128xf32>
    %341 = tpu.matmul %340, %1, %cst_183 {dimension_numbers = #tpu.dot_dimension_numbers<[1], [0], [0], [1], [0, 0, 1, 1], [], []>} : vector<16x128xf32>, vector<128x128xf32>, vector<16x128xf32> -> vector<16x128xf32>
    %342 = arith.mulf %335, %335 : vector<32x128xf32>
    %cst_184 = arith.constant dense<0.000000e+00> : vector<16x128xf32>
    %343 = tpu.matmul %0, %342, %cst_184 {dimension_numbers = #tpu.dot_dimension_numbers<[1], [0], [0], [1], [0, 0, 1, 1], [], []>} : vector<16x32xf32>, vector<32x128xf32>, vector<16x128xf32> -> vector<16x128xf32>
    %cst_185 = arith.constant dense<0.000000e+00> : vector<16x128xf32>
    %344 = tpu.matmul %343, %1, %cst_185 {dimension_numbers = #tpu.dot_dimension_numbers<[1], [0], [0], [1], [0, 0, 1, 1], [], []>} : vector<16x128xf32>, vector<128x128xf32>, vector<16x128xf32> -> vector<16x128xf32>
    %345 = arith.mulf %337, %337 : vector<32x128xf32>
    %cst_186 = arith.constant dense<0.000000e+00> : vector<16x128xf32>
    %346 = tpu.matmul %0, %345, %cst_186 {dimension_numbers = #tpu.dot_dimension_numbers<[1], [0], [0], [1], [0, 0, 1, 1], [], []>} : vector<16x32xf32>, vector<32x128xf32>, vector<16x128xf32> -> vector<16x128xf32>
    %cst_187 = arith.constant dense<0.000000e+00> : vector<16x128xf32>
    %347 = tpu.matmul %346, %1, %cst_187 {dimension_numbers = #tpu.dot_dimension_numbers<[1], [0], [0], [1], [0, 0, 1, 1], [], []>} : vector<16x128xf32>, vector<128x128xf32>, vector<16x128xf32> -> vector<16x128xf32>
    %348 = arith.mulf %335, %337 : vector<32x128xf32>
    %cst_188 = arith.constant dense<0.000000e+00> : vector<16x128xf32>
    %349 = tpu.matmul %0, %348, %cst_188 {dimension_numbers = #tpu.dot_dimension_numbers<[1], [0], [0], [1], [0, 0, 1, 1], [], []>} : vector<16x32xf32>, vector<32x128xf32>, vector<16x128xf32> -> vector<16x128xf32>
    %cst_189 = arith.constant dense<0.000000e+00> : vector<16x128xf32>
    %350 = tpu.matmul %349, %1, %cst_189 {dimension_numbers = #tpu.dot_dimension_numbers<[1], [0], [0], [1], [0, 0, 1, 1], [], []>} : vector<16x128xf32>, vector<128x128xf32>, vector<16x128xf32> -> vector<16x128xf32>
    %351 = arith.mulf %339, %339 : vector<16x128xf32>
    %352 = arith.mulf %341, %341 : vector<16x128xf32>
    %353 = arith.mulf %339, %341 : vector<16x128xf32>
    %354 = arith.subf %344, %351 : vector<16x128xf32>
    %355 = arith.subf %347, %352 : vector<16x128xf32>
    %356 = arith.subf %350, %353 : vector<16x128xf32>
    %cst_190 = arith.constant 2.000000e+00 : f32
    %357 = vector.broadcast %cst_190 : f32 to vector<16x128xf32>
    %358 = arith.mulf %357, %353 : vector<16x128xf32>
    %cst_191 = arith.constant 9.99999974E-5 : f32
    %359 = vector.broadcast %cst_191 : f32 to vector<16x128xf32>
    %360 = arith.addf %358, %359 : vector<16x128xf32>
    %cst_192 = arith.constant 2.000000e+00 : f32
    %361 = vector.broadcast %cst_192 : f32 to vector<16x128xf32>
    %362 = arith.mulf %361, %356 : vector<16x128xf32>
    %cst_193 = arith.constant 8.99999984E-4 : f32
    %363 = vector.broadcast %cst_193 : f32 to vector<16x128xf32>
    %364 = arith.addf %362, %363 : vector<16x128xf32>
    %365 = arith.mulf %360, %364 : vector<16x128xf32>
    %366 = arith.addf %351, %352 : vector<16x128xf32>
    %cst_194 = arith.constant 9.99999974E-5 : f32
    %367 = vector.broadcast %cst_194 : f32 to vector<16x128xf32>
    %368 = arith.addf %366, %367 : vector<16x128xf32>
    %369 = arith.addf %354, %355 : vector<16x128xf32>
    %cst_195 = arith.constant 8.99999984E-4 : f32
    %370 = vector.broadcast %cst_195 : f32 to vector<16x128xf32>
    %371 = arith.addf %369, %370 : vector<16x128xf32>
    %372 = arith.mulf %368, %371 : vector<16x128xf32>
    %373 = tpu.reciprocal %372 {approx = true} : vector<16x128xf32> -> vector<16x128xf32>
    %374 = arith.mulf %372, %373 : vector<16x128xf32>
    %cst_196 = arith.constant 2.000000e+00 : f32
    %375 = vector.broadcast %cst_196 : f32 to vector<16x128xf32>
    %376 = arith.subf %375, %374 : vector<16x128xf32>
    %377 = arith.mulf %373, %376 : vector<16x128xf32>
    %378 = arith.mulf %365, %377 : vector<16x128xf32>
    %379 = arith.mulf %378, %20 : vector<16x128xf32>
    %380 = vector.shape_cast %379 : vector<16x128xf32> to vector<1x16x128xf32>
    %cst_197 = arith.constant dense<0.000000e+00> : vector<1xf32>
    %381 = vector.multi_reduction <add>, %380, %cst_197 [1, 2] : vector<1x16x128xf32> to vector<1xf32>
    %382 = vector.shape_cast %381 : vector<1xf32> to vector<1x1x1xf32>
    %383 = vector.extract %382[0, 0, 0] : f32 from vector<1x1x1xf32>
    %384 = vector.broadcast %383 : f32 to vector<1x1xf32>
    %385 = arith.addf %333, %384 : vector<1x1xf32>
    %c7 = arith.constant 7 : index
    %c0_198 = arith.constant 0 : index
    %c0_199 = arith.constant 0 : index
    %c0_200 = arith.constant 0 : index
    %c0_201 = arith.constant 0 : index
    %386 = vector.load %arg3[%c7, %c0_198, %c0_199, %c0_200, %c0_201] : memref<8x1x1x32x128xf32, #tpu.memory_space<vmem>>, vector<1x1x1x32x128xf32>
    %387 = vector.shape_cast %386 : vector<1x1x1x32x128xf32> to vector<32x128xf32>
    %c7_202 = arith.constant 7 : index
    %c0_203 = arith.constant 0 : index
    %c0_204 = arith.constant 0 : index
    %c0_205 = arith.constant 0 : index
    %c0_206 = arith.constant 0 : index
    %388 = vector.load %arg4[%c7_202, %c0_203, %c0_204, %c0_205, %c0_206] : memref<8x1x1x32x128xf32, #tpu.memory_space<vmem>>, vector<1x1x1x32x128xf32>
    %389 = vector.shape_cast %388 : vector<1x1x1x32x128xf32> to vector<32x128xf32>
    %cst_207 = arith.constant dense<0.000000e+00> : vector<16x128xf32>
    %390 = tpu.matmul %0, %387, %cst_207 {dimension_numbers = #tpu.dot_dimension_numbers<[1], [0], [0], [1], [0, 0, 1, 1], [], []>} : vector<16x32xf32>, vector<32x128xf32>, vector<16x128xf32> -> vector<16x128xf32>
    %cst_208 = arith.constant dense<0.000000e+00> : vector<16x128xf32>
    %391 = tpu.matmul %390, %1, %cst_208 {dimension_numbers = #tpu.dot_dimension_numbers<[1], [0], [0], [1], [0, 0, 1, 1], [], []>} : vector<16x128xf32>, vector<128x128xf32>, vector<16x128xf32> -> vector<16x128xf32>
    %cst_209 = arith.constant dense<0.000000e+00> : vector<16x128xf32>
    %392 = tpu.matmul %0, %389, %cst_209 {dimension_numbers = #tpu.dot_dimension_numbers<[1], [0], [0], [1], [0, 0, 1, 1], [], []>} : vector<16x32xf32>, vector<32x128xf32>, vector<16x128xf32> -> vector<16x128xf32>
    %cst_210 = arith.constant dense<0.000000e+00> : vector<16x128xf32>
    %393 = tpu.matmul %392, %1, %cst_210 {dimension_numbers = #tpu.dot_dimension_numbers<[1], [0], [0], [1], [0, 0, 1, 1], [], []>} : vector<16x128xf32>, vector<128x128xf32>, vector<16x128xf32> -> vector<16x128xf32>
    %394 = arith.mulf %387, %387 : vector<32x128xf32>
    %cst_211 = arith.constant dense<0.000000e+00> : vector<16x128xf32>
    %395 = tpu.matmul %0, %394, %cst_211 {dimension_numbers = #tpu.dot_dimension_numbers<[1], [0], [0], [1], [0, 0, 1, 1], [], []>} : vector<16x32xf32>, vector<32x128xf32>, vector<16x128xf32> -> vector<16x128xf32>
    %cst_212 = arith.constant dense<0.000000e+00> : vector<16x128xf32>
    %396 = tpu.matmul %395, %1, %cst_212 {dimension_numbers = #tpu.dot_dimension_numbers<[1], [0], [0], [1], [0, 0, 1, 1], [], []>} : vector<16x128xf32>, vector<128x128xf32>, vector<16x128xf32> -> vector<16x128xf32>
    %397 = arith.mulf %389, %389 : vector<32x128xf32>
    %cst_213 = arith.constant dense<0.000000e+00> : vector<16x128xf32>
    %398 = tpu.matmul %0, %397, %cst_213 {dimension_numbers = #tpu.dot_dimension_numbers<[1], [0], [0], [1], [0, 0, 1, 1], [], []>} : vector<16x32xf32>, vector<32x128xf32>, vector<16x128xf32> -> vector<16x128xf32>
    %cst_214 = arith.constant dense<0.000000e+00> : vector<16x128xf32>
    %399 = tpu.matmul %398, %1, %cst_214 {dimension_numbers = #tpu.dot_dimension_numbers<[1], [0], [0], [1], [0, 0, 1, 1], [], []>} : vector<16x128xf32>, vector<128x128xf32>, vector<16x128xf32> -> vector<16x128xf32>
    %400 = arith.mulf %387, %389 : vector<32x128xf32>
    %cst_215 = arith.constant dense<0.000000e+00> : vector<16x128xf32>
    %401 = tpu.matmul %0, %400, %cst_215 {dimension_numbers = #tpu.dot_dimension_numbers<[1], [0], [0], [1], [0, 0, 1, 1], [], []>} : vector<16x32xf32>, vector<32x128xf32>, vector<16x128xf32> -> vector<16x128xf32>
    %cst_216 = arith.constant dense<0.000000e+00> : vector<16x128xf32>
    %402 = tpu.matmul %401, %1, %cst_216 {dimension_numbers = #tpu.dot_dimension_numbers<[1], [0], [0], [1], [0, 0, 1, 1], [], []>} : vector<16x128xf32>, vector<128x128xf32>, vector<16x128xf32> -> vector<16x128xf32>
    %403 = arith.mulf %391, %391 : vector<16x128xf32>
    %404 = arith.mulf %393, %393 : vector<16x128xf32>
    %405 = arith.mulf %391, %393 : vector<16x128xf32>
    %406 = arith.subf %396, %403 : vector<16x128xf32>
    %407 = arith.subf %399, %404 : vector<16x128xf32>
    %408 = arith.subf %402, %405 : vector<16x128xf32>
    %cst_217 = arith.constant 2.000000e+00 : f32
    %409 = vector.broadcast %cst_217 : f32 to vector<16x128xf32>
    %410 = arith.mulf %409, %405 : vector<16x128xf32>
    %cst_218 = arith.constant 9.99999974E-5 : f32
    %411 = vector.broadcast %cst_218 : f32 to vector<16x128xf32>
    %412 = arith.addf %410, %411 : vector<16x128xf32>
    %cst_219 = arith.constant 2.000000e+00 : f32
    %413 = vector.broadcast %cst_219 : f32 to vector<16x128xf32>
    %414 = arith.mulf %413, %408 : vector<16x128xf32>
    %cst_220 = arith.constant 8.99999984E-4 : f32
    %415 = vector.broadcast %cst_220 : f32 to vector<16x128xf32>
    %416 = arith.addf %414, %415 : vector<16x128xf32>
    %417 = arith.mulf %412, %416 : vector<16x128xf32>
    %418 = arith.addf %403, %404 : vector<16x128xf32>
    %cst_221 = arith.constant 9.99999974E-5 : f32
    %419 = vector.broadcast %cst_221 : f32 to vector<16x128xf32>
    %420 = arith.addf %418, %419 : vector<16x128xf32>
    %421 = arith.addf %406, %407 : vector<16x128xf32>
    %cst_222 = arith.constant 8.99999984E-4 : f32
    %422 = vector.broadcast %cst_222 : f32 to vector<16x128xf32>
    %423 = arith.addf %421, %422 : vector<16x128xf32>
    %424 = arith.mulf %420, %423 : vector<16x128xf32>
    %425 = tpu.reciprocal %424 {approx = true} : vector<16x128xf32> -> vector<16x128xf32>
    %426 = arith.mulf %424, %425 : vector<16x128xf32>
    %cst_223 = arith.constant 2.000000e+00 : f32
    %427 = vector.broadcast %cst_223 : f32 to vector<16x128xf32>
    %428 = arith.subf %427, %426 : vector<16x128xf32>
    %429 = arith.mulf %425, %428 : vector<16x128xf32>
    %430 = arith.mulf %417, %429 : vector<16x128xf32>
    %431 = arith.mulf %430, %20 : vector<16x128xf32>
    %432 = vector.shape_cast %431 : vector<16x128xf32> to vector<1x16x128xf32>
    %cst_224 = arith.constant dense<0.000000e+00> : vector<1xf32>
    %433 = vector.multi_reduction <add>, %432, %cst_224 [1, 2] : vector<1x16x128xf32> to vector<1xf32>
    %434 = vector.shape_cast %433 : vector<1xf32> to vector<1x1x1xf32>
    %435 = vector.extract %434[0, 0, 0] : f32 from vector<1x1x1xf32>
    %436 = vector.broadcast %435 : f32 to vector<1x1xf32>
    %437 = arith.addf %385, %436 : vector<1x1xf32>
    %438 = vector.shape_cast %437 : vector<1x1xf32> to vector<1x1xf32>
    %439 = vector.broadcast %438 : vector<1x1xf32> to vector<8x128xf32>
    %c0_225 = arith.constant 0 : index
    %c0_226 = arith.constant 0 : index
    %c0_227 = arith.constant 0 : index
    %c0_228 = arith.constant 0 : index
    %c0_229 = arith.constant 0 : index
    %440 = vector.load %arg7[%c0_225, %c0_226, %c0_227, %c0_228, %c0_229] : memref<1x1x1x8x128xf32, #tpu.memory_space<vmem>>, vector<1x1x1x8x128xf32>
    %441 = vector.shape_cast %440 : vector<1x1x1x8x128xf32> to vector<8x128xf32>
    %442 = vector.shape_cast %439 : vector<8x128xf32> to vector<1x1x1x8x128xf32>
    tpu.vector_store %arg7[%c0_225, %c0_226, %c0_227, %c0_228, %c0_229], %442 {strides = array<i32>} : memref<1x1x1x8x128xf32, #tpu.memory_space<vmem>>, vector<1x1x1x8x128xf32>,
    return
  }
  func.func @transform_0(%arg0: i32, %arg1: i32, %arg2: i32) -> (i32, i32, i32, i32, i32) {
    %c0_i32 = arith.constant 0 : i32
    %c0_i32_0 = arith.constant 0 : i32
    %c0_i32_1 = arith.constant 0 : i32
    return %arg0, %arg1, %arg2, %c0_i32, %c0_i32_0 : i32, i32, i32, i32, i32
  }
  func.func @transform_1(%arg0: i32, %arg1: i32, %arg2: i32) -> (i32, i32, i32, i32, i32) {
    %c0_i32 = arith.constant 0 : i32
    %c0_i32_0 = arith.constant 0 : i32
    %c0_i32_1 = arith.constant 0 : i32
    return %arg0, %arg1, %arg2, %c0_i32, %c0_i32_0 : i32, i32, i32, i32, i32
  }
  func.func @transform_2(%arg0: i32, %arg1: i32, %arg2: i32) -> (i32, i32) {
    %c0_i32 = arith.constant 0 : i32
    %c0_i32_0 = arith.constant 0 : i32
    %c0_i32_1 = arith.constant 0 : i32
    return %c0_i32, %c0_i32_0 : i32, i32
  }
  func.func @transform_3(%arg0: i32, %arg1: i32, %arg2: i32) -> (i32, i32) {
    %c0_i32 = arith.constant 0 : i32
    %c0_i32_0 = arith.constant 0 : i32
    %c0_i32_1 = arith.constant 0 : i32
    return %c0_i32, %c0_i32_0 : i32, i32
  }
  func.func @transform_4(%arg0: i32, %arg1: i32, %arg2: i32) -> (i32, i32, i32, i32, i32) {
    %c0_i32 = arith.constant 0 : i32
    %c0_i32_0 = arith.constant 0 : i32
    %c0_i32_1 = arith.constant 0 : i32
    return %arg0, %arg1, %arg2, %c0_i32, %c0_i32_0 : i32, i32, i32, i32, i32
  }
}

</mosaic_0001>

<bundles_post_ra>
// kernel: tpu_custom_call.1
= control target key start
LH: loop header
LB: loop body
LE: loop exit
PB: predicated region body
PF: predicated region fallthrough
CT: control target
= control target key end

     0   :  { %9 = vsyncpa [#allocation3], 0  ;;  %s13096_s0 = inlined_call_operand.hbm [shape: f32[8,1,1,32,128], index: 0, kind: input, shape index: {}]   ;;  %s13097_s1 = inlined_call_operand.hbm [shape: f32[8,1,1,32,128], index: 1, kind: input, shape index: {}]   ;;  %s13098_s2 = inlined_call_operand.hbm [shape: f32[16,32], index: 2, kind: input, shape index: {}]   ;;  %s13099_s3 = inlined_call_operand.hbm [shape: f32[128,128], index: 3, kind: input, shape index: {}]   ;;  %s13100_s4 = inlined_call_operand.hbm [shape: f32[1,1,1,8,128], index: 4, kind: output, shape index: {}]  }
   0x1   :  { %10 = vsyncpa [#allocation6], 0 }
   0x2   :  { %11 = vsyncpa [#allocation9], 0 }
   0x3   :  { %12 = vsyncpa [#allocation4], 0  ;;  %s11425_s15 = smov [#allocation5]   ;;  %s11426_s17 = smov [#allocation2]  }
   0x4   :  { %s30_s16 = sshll.u32 %s11425_s15, 4  ;;  %s18_s18 = sshll.u32 %s11426_s17, 4  ;;  %s31_s16 = int_to_ptr.vmem [resolvable:$true] %s30_s16  ;;  %s11458_s18 = int_to_ptr.vmem [resolvable:$true] %s18_s18 }
   0x5   :  { %s11307_s21 = scalar_lea.hbm %s13097_s1, 4096 }
   0x6   :  { %p11308_p0 = scmp.ne.s32.totalorder %s13097_s1, %s11307_s21  ;;  %p11311_p1 = scmp.lt.u32.totalorder %s11307_s21, %s13097_s1 }
   0x8   :  { %p11313_p2 = pnand %p11311_p1, %p11308_p0 }
   0xa   :  { %11316 = shalt.err (!%p11313_p2)
}
   0xb   :  { %s11317_s26 = scalar_lea.vmem %s31_s16, 4096  ;;  %p11322_p4 = scmp.lt.s32.totalorder %s31_s16, %s31_s16 }
   0xc   :  { %p11318_p3 = scmp.ne.s32.totalorder %s31_s16, %s11317_s26  ;;  %p11323_p5 = scmp.lt.s32.totalorder %s11317_s26, %s11317_s26 }
   0xe   :  { %p11324_p6 = por %p11323_p5, %p11322_p4 }
  0x10   :  { %p11325_p7 = pnand %p11324_p6, %p11318_p3 }
  0x12   :  { %11328 = shalt.err (!%p11325_p7)
}
  0x13   :  { %s11427_s27 = smov 128   ;;  %s11428_s28 = smov 8  }
  0x14   :  { %36 = dma.hbm_to_vmem [thread:$0]  %s13097_s1, 4096, %s31_s16, [#allocation6], %s11427_s27, %s11427_s27, %s11428_s28  }
  0x15   :  { %s11329_s7 = scalar_lea.hbm %s13096_s0, 4096 }
  0x16   :  { %p11330_p8 = scmp.ne.s32.totalorder %s13096_s0, %s11329_s7  ;;  %p11333_p9 = scmp.lt.u32.totalorder %s11329_s7, %s13096_s0 }
  0x18   :  { %p11335_p10 = pnand %p11333_p9, %p11330_p8 }
  0x1a   :  { %11338 = shalt.err (!%p11335_p10)
}
  0x1b   :  { %s11339_s12 = scalar_lea.vmem %s11458_s18, 4096  ;;  %p11344_p12 = scmp.lt.s32.totalorder %s11458_s18, %s11458_s18 }
  0x1c   :  { %p11340_p11 = scmp.ne.s32.totalorder %s11458_s18, %s11339_s12  ;;  %p11345_p13 = scmp.lt.s32.totalorder %s11339_s12, %s11339_s12 }
  0x1e   :  { %p11346_p0 = por %p11345_p13, %p11344_p12 }
  0x20   :  { %p11347_p1 = pnand %p11346_p0, %p11340_p11 }
  0x22   :  { %11350 = shalt.err (!%p11347_p1)
}
  0x23   :  { %24 = dma.hbm_to_vmem [thread:$0]  %s13096_s0, 4096, %s11458_s18, [#allocation3], %s11427_s27, %s11427_s27, %s11428_s28  }
  0x24   :  { %s11429_s14 = smov [#allocation7]   ;;  %s11430_s16 = smov [#allocation8]  }
  0x25   :  { %s42_s15 = sshll.u32 %s11429_s14, 4  ;;  %s54_s17 = sshll.u32 %s11430_s16, 4  ;;  %s43_s15 = int_to_ptr.vmem [resolvable:$true] %s42_s15  ;;  %s11495_s17 = int_to_ptr.vmem [resolvable:$true] %s54_s17 }
  0x26   :  { %s11351_s21 = scalar_lea.hbm %s13098_s2, 256 }
  0x27   :  { %p11352_p2 = scmp.ne.s32.totalorder %s13098_s2, %s11351_s21  ;;  %p11355_p3 = scmp.lt.u32.totalorder %s11351_s21, %s13098_s2 }
  0x29   :  { %p11357_p4 = pnand %p11355_p3, %p11352_p2 }
  0x2b   :  { %11360 = shalt.err (!%p11357_p4)
}
  0x2c   :  { %s11361_s0 = scalar_lea.vmem %s43_s15, 256  ;;  %p11366_p6 = scmp.lt.s32.totalorder %s43_s15, %s43_s15 }
  0x2d   :  { %p11362_p5 = scmp.ne.s32.totalorder %s43_s15, %s11361_s0  ;;  %p11367_p7 = scmp.lt.s32.totalorder %s11361_s0, %s11361_s0 }
  0x2f   :  { %p11368_p8 = por %p11367_p7, %p11366_p6 }
  0x31   :  { %p11369_p9 = pnand %p11368_p8, %p11362_p5 }
  0x33   :  { %11372 = shalt.err (!%p11369_p9)
}
  0x34   :  { %48 = dma.hbm_to_vmem [thread:$0]  %s13098_s2, 256, %s43_s15, [#allocation6], %s11427_s27, %s11427_s27, %s11428_s28  }
  0x35   :  { %s11373_s5 = scalar_lea.hbm %s13099_s3, 2048 }
  0x36   :  { %p11374_p10 = scmp.ne.s32.totalorder %s13099_s3, %s11373_s5  ;;  %p11377_p11 = scmp.lt.u32.totalorder %s11373_s5, %s13099_s3 }
  0x38   :  { %p11379_p12 = pnand %p11377_p11, %p11374_p10 }
  0x3a   :  { %11382 = shalt.err (!%p11379_p12)
}
  0x3b   :  { %s11383_s10 = scalar_lea.vmem %s11495_s17, 2048  ;;  %p11388_p0 = scmp.lt.s32.totalorder %s11495_s17, %s11495_s17 }
  0x3c   :  { %p11384_p13 = scmp.ne.s32.totalorder %s11495_s17, %s11383_s10  ;;  %p11389_p1 = scmp.lt.s32.totalorder %s11383_s10, %s11383_s10 }
  0x3e   :  { %p11390_p2 = por %p11389_p1, %p11388_p0 }
  0x40   :  { %p11391_p3 = pnand %p11390_p2, %p11384_p13 }
  0x42   :  { %11394 = shalt.err (!%p11391_p3)
}
  0x43   :  { %60 = dma.hbm_to_vmem [thread:$0]  %s13099_s3, 2048, %s11495_s17, [#allocation9], %s11427_s27, %s11427_s27, %s11428_s28  }
  0x44   :  { %11417 = dma.done.wait [#allocation3], 4096  }
  0x45   :  { %11418 = vsyncadd [#allocation3], 4294963200 }
  0x46   :  { %11419 = dma.done.wait [#allocation6], 4352  }
  0x47   :  { %11420 = vsyncadd [#allocation6], 4294962944 }
  0x48   :  { %11421 = dma.done.wait [#allocation9], 2048  }
  0x49   :  { %11422 = vsyncadd [#allocation9], 4294965248  ;;  %v11532_v0 = vld [vmem:[#allocation2] sm:$0xff]  ;;  %v11534_v1 = vld [vmem:[#allocation2 + $0x8] sm:$0xff]  ;;  %vm125_vm0 = vcmask 261120   ;;  %s11432_s15 = smov [#allocation10]  }
  0x4a   :  { %v11536_v2 = vld [vmem:[#allocation5] sm:$0xff]  ;;  %v9645_v3 = vpack.c.bf16 %v11534_v1, %v11532_v0  ;;  %v11540_v4 = vld [vmem:[#allocation5 + $0x8] sm:$0xff]  ;;  %v11542_v5 = vld [vmem:[#allocation2 + $0x10] sm:$0xff]  ;;  %v432_v38 = vmul.f32 %v11532_v0, %v11532_v0  ;;  %v433_v39 = vmul.f32 %v11534_v1, %v11534_v1  ;;  %s6753_s16 = sshll.u32 %s11432_s15, 4  ;;  %s6754_s16 = int_to_ptr.vmem [resolvable:$true] %s6753_s16 }
  0x4b   :  { %v11544_v6 = vld [vmem:[#allocation2 + $0x18] sm:$0xff]  ;;  %v9685_v7 = vpack.c.bf16 %v11540_v4, %v11536_v2  ;;  %v11550_v9 = vld [vmem:[#allocation5 + $0x10] sm:$0xff]  ;;  %v11554_v11 = vld [vmem:[#allocation7] sm:$0xff]  ;;  %v586_v40 = vmul.f32 %v11536_v2, %v11536_v2  ;;  %v587_v41 = vmul.f32 %v11540_v4, %v11540_v4  ;;  %v434_v44 = vmul.f32 %v11542_v5, %v11542_v5  ;;  %s11395_s19 = scalar_lea.vmem %s6754_s16, 128  ;;  %p11400_p5 = scmp.lt.s32.totalorder %s6754_s16, %s6754_s16 }
  0x4c   :  { %v9649_v8 = vpack.c.bf16 %v11544_v6, %v11542_v5  ;;  %v11552_v10 = vld [vmem:[#allocation5 + $0x18] sm:$0xff]  ;;  %9646 = vmatprep.subr.bf16.mxu1 %v9645_v3  ;;  %7813 = vmatprep.mubr.msk.f32.mxu1 %vm125_vm0, %v11554_v11  ;;  %v75_v13 = vld [vmem:[#allocation8] sm:$0xff]  ;;  %v77_v16 = vld [vmem:[#allocation8 + $0x10] sm:$0xff]  ;;  %v9725_v42 = vpack.c.bf16 %v433_v39, %v432_v38  ;;  %v435_v45 = vmul.f32 %v11544_v6, %v11544_v6  ;;  %p11396_p4 = scmp.ne.s32.totalorder %s6754_s16, %s11395_s19  ;;  %p11401_p6 = scmp.lt.s32.totalorder %s11395_s19, %s11395_s19 }
  0x4d   :  { %v9689_v12 = vpack.c.bf16 %v11552_v10, %v11550_v9  ;;  %v76_v14 = vld [vmem:[#allocation8 + $0x8] sm:$0xff]  ;;  %9686 = vmatprep.subr.bf16.mxu0 %v9685_v7  ;;  %9648 = vmatpush3.bf16.msra.mxu1 %v9645_v3  ;;  %v78_v17 = vld [vmem:[#allocation8 + $0x18] sm:$0xff]  ;;  %v79_v20 = vld [vmem:[#allocation8 + $0x20] sm:$0xff]  ;;  %v9765_v43 = vpack.c.bf16 %v587_v41, %v586_v40  ;;  %v588_v46 = vmul.f32 %v11550_v9, %v11550_v9 }
  0x4e   :  { %9688 = vmatpush3.bf16.msra.mxu0 %v9685_v7  ;;  %9650 = vmatprep.subr.bf16.mxu1 %v9649_v8  ;;  %v11560_v15 = vpack.c.bf16 %v76_v14, %v75_v13  ;;  %v11564_v18 = vld [vmem:[#allocation7 + $0x8] sm:$0xff]  ;;  %v11567_v19 = vpack.c.bf16 %v78_v17, %v77_v16  ;;  %v80_v21 = vld [vmem:[#allocation8 + $0x28] sm:$0xff]  ;;  %v81_v23 = vld [vmem:[#allocation8 + $0x30] sm:$0xff]  ;;  %v589_v47 = vmul.f32 %v11552_v10, %v11552_v10  ;;  %p11402_p7 = por %p11401_p6, %p11400_p5 }
  0x4f   :  { %9690 = vmatprep.subr.bf16.mxu0 %v9689_v12  ;;  %7859 = vmatprep.mubr.msk.f32.mxu0 %vm125_vm0, %v11554_v11  ;;  %v11577_v22 = vpack.c.bf16 %v80_v21, %v79_v20  ;;  %v82_v24 = vld [vmem:[#allocation8 + $0x38] sm:$0xff]  ;;  %v83_v26 = vld [vmem:[#allocation8 + $0x40] sm:$0xff]  ;;  %v84_v27 = vld [vmem:[#allocation8 + $0x48] sm:$0xff]  ;;  %v9729_v51 = vpack.c.bf16 %v435_v45, %v434_v44  ;;  %v740_v54 = vmul.f32 %v11536_v2, %v11532_v0 }
  0x50   :  { %v11583_v25 = vpack.c.bf16 %v82_v24, %v81_v23  ;;  %v11589_v28 = vpack.c.bf16 %v84_v27, %v83_v26  ;;  %v85_v29 = vld [vmem:[#allocation8 + $0x50] sm:$0xff]  ;;  %v86_v30 = vld [vmem:[#allocation8 + $0x58] sm:$0xff]  ;;  %v87_v32 = vld [vmem:[#allocation8 + $0x60] sm:$0xff]  ;;  %v9769_v53 = vpack.c.bf16 %v589_v47, %v588_v46  ;;  %v741_v55 = vmul.f32 %v11540_v4, %v11534_v1  ;;  %p11403_p8 = pnand %p11402_p7, %p11396_p4 }
  0x51   :  { %9652 = vmatpush3.bf16.msra.mxu1 %v9649_v8  ;;  %v11595_v31 = vpack.c.bf16 %v86_v30, %v85_v29  ;;  %v88_v33 = vld [vmem:[#allocation8 + $0x68] sm:$0xff]  ;;  %v89_v35 = vld [vmem:[#allocation8 + $0x70] sm:$0xff]  ;;  %v90_v36 = vld [vmem:[#allocation8 + $0x78] sm:$0xff]  ;;  %v742_v13 = vmul.f32 %v11550_v9, %v11542_v5  ;;  %v743_v14 = vmul.f32 %v11552_v10, %v11544_v6 }
  0x52   :  { %9692 = vmatpush3.bf16.msra.mxu0 %v9689_v12  ;;  %9654 = vmatprep.subr.bf16.mxu1 %v11560_v15  ;;  %v11601_v34 = vpack.c.bf16 %v88_v33, %v87_v32  ;;  %v11607_v37 = vpack.c.bf16 %v90_v36, %v89_v35  ;;  %v11676_v56 = vld [vmem:[#allocation2 + $0x20] sm:$0xff]  ;;  %v11678_v57 = vld [vmem:[#allocation2 + $0x28] sm:$0xff]  ;;  %v9805_v58 = vpack.c.bf16 %v741_v55, %v740_v54  ;;  %v11706_v16 = vld [vmem:[#allocation2 + $0x30] sm:$0xff] }
  0x53   :  { %9694 = vmatprep.subr.bf16.mxu0 %v11560_v15  ;;  %v9845_v59 = vpack.c.bf16 %v11678_v57, %v11676_v56  ;;  %v11708_v17 = vld [vmem:[#allocation2 + $0x38] sm:$0xff]  ;;  %v9809_v24 = vpack.c.bf16 %v743_v14, %v742_v13  ;;  %v1260_v5 = vmul.f32 %v11676_v56, %v11676_v56  ;;  %v1261_v6 = vmul.f32 %v11678_v57, %v11678_v57  ;;  %v11756_v9 = vld [vmem:[#allocation5 + $0x20] sm:$0xff]  ;;  %v11758_v10 = vld [vmem:[#allocation5 + $0x28] sm:$0xff] }
  0x54   :  { %7814 = vmatmul.mubr.msk.f32.vlgmr.msra.gmra.mrb[0].mxu1 %vm125_vm0, %v11564_v18  ;;  %v9849_v27 = vpack.c.bf16 %v11708_v17, %v11706_v16  ;;  %v9885_v29 = vpack.c.bf16 %v11758_v10, %v11756_v9  ;;  %v11767_v46 = vld [vmem:[#allocation5 + $0x30] sm:$0xff]  ;;  %v11769_v47 = vld [vmem:[#allocation5 + $0x38] sm:$0xff]  ;;  %v102_v13 = vlaneseq }
  0x55   :  { %7860 = vmatmul.mubr.msk.f32.vlgmr.msra.gmra.mrb[0].mxu0 %vm125_vm0, %v11564_v18  ;;  %9656 = vmatpush3.bf16.msra.mxu1 %v11560_v15  ;;  %v9925_v30 = vpack.c.bf16 %v1261_v6, %v1260_v5 }
  0x56   :  { %9696 = vmatpush3.bf16.msra.mxu0 %v11560_v15  ;;  %9658 = vmatprep.subr.bf16.mxu1 %v11567_v19 }
  0x57   :  { %9698 = vmatprep.subr.bf16.mxu0 %v11567_v19 }
  0x59   :  { %9660 = vmatpush3.bf16.msra.mxu1 %v11567_v19 }
  0x5a   :  { %9700 = vmatpush3.bf16.msra.mxu0 %v11567_v19  ;;  %9662 = vmatprep.subr.bf16.mxu1 %v11577_v22 }
  0x5b   :  { %9702 = vmatprep.subr.bf16.mxu0 %v11577_v22 }
  0x5d   :  { %9664 = vmatpush3.bf16.msra.mxu1 %v11577_v22 }
  0x5e   :  { %9704 = vmatpush3.bf16.msra.mxu0 %v11577_v22  ;;  %9666 = vmatprep.subr.bf16.mxu1 %v11583_v25 }
  0x5f   :  { %9706 = vmatprep.subr.bf16.mxu0 %v11583_v25 }
  0x61   :  { %9668 = vmatpush3.bf16.msra.mxu1 %v11583_v25 }
  0x62   :  { %9708 = vmatpush3.bf16.msra.mxu0 %v11583_v25  ;;  %9670 = vmatprep.subr.bf16.mxu1 %v11589_v28 }
  0x63   :  { %9710 = vmatprep.subr.bf16.mxu0 %v11589_v28 }
  0x65   :  { %9672 = vmatpush3.bf16.msra.mxu1 %v11589_v28 }
  0x66   :  { %9712 = vmatpush3.bf16.msra.mxu0 %v11589_v28  ;;  %9674 = vmatprep.subr.bf16.mxu1 %v11595_v31 }
  0x67   :  { %9714 = vmatprep.subr.bf16.mxu0 %v11595_v31 }
  0x69   :  { %9676 = vmatpush3.bf16.msra.mxu1 %v11595_v31 }
  0x6a   :  { %9716 = vmatpush3.bf16.msra.mxu0 %v11595_v31  ;;  %9678 = vmatprep.subr.bf16.mxu1 %v11601_v34 }
  0x6b   :  { %9718 = vmatprep.subr.bf16.mxu0 %v11601_v34 }
  0x6d   :  { %9680 = vmatpush3.bf16.msra.mxu1 %v11601_v34 }
  0x6e   :  { %9720 = vmatpush3.bf16.msra.mxu0 %v11601_v34  ;;  %9682 = vmatprep.subr.bf16.mxu1 %v11607_v37 }
  0x6f   :  { %9722 = vmatprep.subr.bf16.mxu0 %v11607_v37 }
  0x71   :  { %9684 = vmatpush3.bf16.msra.mxu1 %v11607_v37 }
  0x72   :  { %9724 = vmatpush3.bf16.msra.mxu0 %v11607_v37  ;;  %9726 = vmatprep.subr.bf16.mxu1 %v9725_v42 }
  0x73   :  { %9766 = vmatprep.subr.bf16.mxu0 %v9765_v43 }
 0x127   :  { %v7815_v48 = vpop.f32.mrb[0].mxu1 }
 0x128   :  { %v7861_v49 = vpop.f32.mrb[0].mxu0  ;;  %v198_v50 = vpop.f32.mrb[1].mxu1 }
 0x129   :  { %v348_v52 = vpop.f32.mrb[1].mxu0  ;;  %7848 = vmatprep.mubr.f32.mxu1 %v198_v50 }
 0x12a   :  { %7894 = vmatprep.mubr.f32.mxu0 %v348_v52  ;;  %7849 = vmatmul.mubr.f32.vlgmr.msra.gmra.mrb[2].mxu1 %v7815_v48  ;;  %v1262_v48 = vmul.f32 %v11706_v16, %v11706_v16 }
 0x12b   :  { %7895 = vmatmul.mubr.f32.vlgmr.msra.gmra.mrb[2].mxu0 %v7861_v49  ;;  %9728 = vmatpush3.bf16.msra.mxu1 %v9725_v42  ;;  %v1263_v49 = vmul.f32 %v11708_v17, %v11708_v17 }
 0x12c   :  { %9768 = vmatpush3.bf16.msra.mxu0 %v9765_v43  ;;  %9730 = vmatprep.subr.bf16.mxu1 %v9729_v51 }
 0x12d   :  { %9770 = vmatprep.subr.bf16.mxu0 %v9769_v53  ;;  %7905 = vmatprep.mubr.msk.f32.mxu1 %vm125_vm0, %v11554_v11 }
 0x12e   :  { %7951 = vmatprep.mubr.msk.f32.mxu0 %vm125_vm0, %v11554_v11 }
 0x12f   :  { %9732 = vmatpush3.bf16.msra.mxu1 %v9729_v51 }
 0x130   :  { %9772 = vmatpush3.bf16.msra.mxu0 %v9769_v53  ;;  %9734 = vmatprep.subr.bf16.mxu1 %v11560_v15 }
 0x131   :  { %9774 = vmatprep.subr.bf16.mxu0 %v11560_v15 }
 0x132   :  { %7906 = vmatmul.mubr.msk.f32.vlgmr.msra.gmra.mrb[4].mxu1 %vm125_vm0, %v11564_v18 }
 0x133   :  { %7952 = vmatmul.mubr.msk.f32.vlgmr.msra.gmra.mrb[4].mxu0 %vm125_vm0, %v11564_v18  ;;  %9736 = vmatpush3.bf16.msra.mxu1 %v11560_v15 }
 0x134   :  { %9776 = vmatpush3.bf16.msra.mxu0 %v11560_v15  ;;  %9738 = vmatprep.subr.bf16.mxu1 %v11567_v19 }
 0x135   :  { %9778 = vmatprep.subr.bf16.mxu0 %v11567_v19 }
 0x137   :  { %9740 = vmatpush3.bf16.msra.mxu1 %v11567_v19 }
 0x138   :  { %9780 = vmatpush3.bf16.msra.mxu0 %v11567_v19  ;;  %9742 = vmatprep.subr.bf16.mxu1 %v11577_v22 }
 0x139   :  { %9782 = vmatprep.subr.bf16.mxu0 %v11577_v22 }
 0x13b   :  { %9744 = vmatpush3.bf16.msra.mxu1 %v11577_v22 }
 0x13c   :  { %9784 = vmatpush3.bf16.msra.mxu0 %v11577_v22  ;;  %9746 = vmatprep.subr.bf16.mxu1 %v11583_v25 }
 0x13d   :  { %9786 = vmatprep.subr.bf16.mxu0 %v11583_v25 }
 0x13f   :  { %9748 = vmatpush3.bf16.msra.mxu1 %v11583_v25 }
 0x140   :  { %9788 = vmatpush3.bf16.msra.mxu0 %v11583_v25  ;;  %9750 = vmatprep.subr.bf16.mxu1 %v11589_v28 }
 0x141   :  { %9790 = vmatprep.subr.bf16.mxu0 %v11589_v28 }
 0x143   :  { %9752 = vmatpush3.bf16.msra.mxu1 %v11589_v28 }
 0x144   :  { %9792 = vmatpush3.bf16.msra.mxu0 %v11589_v28  ;;  %9754 = vmatprep.subr.bf16.mxu1 %v11595_v31 }
 0x145   :  { %9794 = vmatprep.subr.bf16.mxu0 %v11595_v31 }
 0x147   :  { %9756 = vmatpush3.bf16.msra.mxu1 %v11595_v31 }
 0x148   :  { %9796 = vmatpush3.bf16.msra.mxu0 %v11595_v31  ;;  %9758 = vmatprep.subr.bf16.mxu1 %v11601_v34 }
 0x149   :  { %9798 = vmatprep.subr.bf16.mxu0 %v11601_v34 }
 0x14b   :  { %9760 = vmatpush3.bf16.msra.mxu1 %v11601_v34 }
 0x14c   :  { %9800 = vmatpush3.bf16.msra.mxu0 %v11601_v34  ;;  %9762 = vmatprep.subr.bf16.mxu1 %v11607_v37 }
 0x14d   :  { %9802 = vmatprep.subr.bf16.mxu0 %v11607_v37 }
 0x14f   :  { %9764 = vmatpush3.bf16.msra.mxu1 %v11607_v37 }
 0x150   :  { %9804 = vmatpush3.bf16.msra.mxu0 %v11607_v37  ;;  %9806 = vmatprep.subr.bf16.mxu1 %v9805_v58 }
 0x151   :  { %9846 = vmatprep.subr.bf16.mxu0 %v9845_v59 }
 0x1fd   :  { %v7850_v60 = vpop.f32.mrb[2].mxu1 }
 0x1fe   :  { %v11682_v61 = vmul.f32 %v7850_v60, %v7850_v60  ;;  %v7896_v62 = vpop.f32.mrb[2].mxu0  ;;  %v273_v63 = vpop.f32.mrb[3].mxu1 }
 0x1ff   :  { %v11684_v3 = vmul.f32 %v7896_v62, %v7896_v62  ;;  %v11686_v0 = vmul.f32 %v7896_v62, %v7850_v60  ;;  %v11688_v1 = vmul.f32 %v273_v63, %v273_v63  ;;  %v423_v2 = vpop.f32.mrb[3].mxu0  ;;  %v1414_v62 = vmul.f32 %v11756_v9, %v11756_v9 }
 0x200   :  { %v11690_v4 = vmul.f32 %v423_v2, %v423_v2  ;;  %v11692_v7 = vmul.f32 %v423_v2, %v273_v63  ;;  %v1415_v63 = vmul.f32 %v11758_v10, %v11758_v10 }
 0x201   :  { %v11696_v8 = vadd.f32 %v11684_v3, %v11682_v61 }
 0x202   :  { %v11700_v12 = vadd.f32 %v11690_v4, %v11688_v1  ;;  %v9965_v2 = vpack.c.bf16 %v1415_v63, %v1414_v62 }
 0x203   :  { %v919_v44 = vadd.f32 0.0001, %v11696_v8 }
 0x204   :  { %v918_v50 = vadd.f32 0.0001, %v11700_v12 }
 0x205   :  { %v7907_v20 = vpop.f32.mrb[4].mxu1 }
 0x206   :  { %v7953_v21 = vpop.f32.mrb[4].mxu0  ;;  %v502_v23 = vpop.f32.mrb[5].mxu1 }
 0x207   :  { %v656_v26 = vpop.f32.mrb[5].mxu0  ;;  %7940 = vmatprep.mubr.f32.mxu1 %v502_v23 }
 0x208   :  { %7986 = vmatprep.mubr.f32.mxu0 %v656_v26  ;;  %7941 = vmatmul.mubr.f32.vlgmr.msra.gmra.mrb[6].mxu1 %v7907_v20  ;;  %v907_v20 = vmul.f32 2.0, %v11686_v0  ;;  %v103_v26 = vand.u32 127, %v102_v13 }
 0x209   :  { %7987 = vmatmul.mubr.f32.vlgmr.msra.gmra.mrb[6].mxu0 %v7953_v21  ;;  %9808 = vmatpush3.bf16.msra.mxu1 %v9805_v58 }
 0x20a   :  { %9848 = vmatpush3.bf16.msra.mxu0 %v9845_v59  ;;  %9810 = vmatprep.subr.bf16.mxu1 %v9809_v24  ;;  %v9889_v59 = vpack.c.bf16 %v11769_v47, %v11767_v46  ;;  %vm112_vm1 = vcmp.lt.s32.totalorder %v103_v26, 16 }
 0x20b   :  { %9850 = vmatprep.subr.bf16.mxu0 %v9849_v27  ;;  %7997 = vmatprep.mubr.msk.f32.mxu1 %vm125_vm0, %v11554_v11 }
 0x20c   :  { %8043 = vmatprep.mubr.msk.f32.mxu0 %vm125_vm0, %v11554_v11 }
 0x20d   :  { %9812 = vmatpush3.bf16.msra.mxu1 %v9809_v24 }
 0x20e   :  { %9852 = vmatpush3.bf16.msra.mxu0 %v9849_v27  ;;  %9814 = vmatprep.subr.bf16.mxu1 %v11560_v15  ;;  %v906_v27 = vmul.f32 2.0, %v11692_v7 }
 0x20f   :  { %9854 = vmatprep.subr.bf16.mxu0 %v11560_v15 }
 0x210   :  { %7998 = vmatmul.mubr.msk.f32.vlgmr.msra.gmra.mrb[8].mxu1 %vm125_vm0, %v11564_v18 }
 0x211   :  { %8044 = vmatmul.mubr.msk.f32.vlgmr.msra.gmra.mrb[8].mxu0 %vm125_vm0, %v11564_v18  ;;  %9816 = vmatpush3.bf16.msra.mxu1 %v11560_v15 }
 0x212   :  { %9856 = vmatpush3.bf16.msra.mxu0 %v11560_v15  ;;  %9818 = vmatprep.subr.bf16.mxu1 %v11567_v19 }
 0x213   :  { %9858 = vmatprep.subr.bf16.mxu0 %v11567_v19 }
 0x215   :  { %9820 = vmatpush3.bf16.msra.mxu1 %v11567_v19 }
 0x216   :  { %9860 = vmatpush3.bf16.msra.mxu0 %v11567_v19  ;;  %9822 = vmatprep.subr.bf16.mxu1 %v11577_v22 }
 0x217   :  { %9862 = vmatprep.subr.bf16.mxu0 %v11577_v22 }
 0x219   :  { %9824 = vmatpush3.bf16.msra.mxu1 %v11577_v22 }
 0x21a   :  { %9864 = vmatpush3.bf16.msra.mxu0 %v11577_v22  ;;  %9826 = vmatprep.subr.bf16.mxu1 %v11583_v25 }
 0x21b   :  { %9866 = vmatprep.subr.bf16.mxu0 %v11583_v25 }
 0x21d   :  { %9828 = vmatpush3.bf16.msra.mxu1 %v11583_v25 }
 0x21e   :  { %9868 = vmatpush3.bf16.msra.mxu0 %v11583_v25  ;;  %9830 = vmatprep.subr.bf16.mxu1 %v11589_v28 }
 0x21f   :  { %9870 = vmatprep.subr.bf16.mxu0 %v11589_v28 }
 0x221   :  { %9832 = vmatpush3.bf16.msra.mxu1 %v11589_v28 }
 0x222   :  { %9872 = vmatpush3.bf16.msra.mxu0 %v11589_v28  ;;  %9834 = vmatprep.subr.bf16.mxu1 %v11595_v31 }
 0x223   :  { %9874 = vmatprep.subr.bf16.mxu0 %v11595_v31 }
 0x225   :  { %9836 = vmatpush3.bf16.msra.mxu1 %v11595_v31 }
 0x226   :  { %9876 = vmatpush3.bf16.msra.mxu0 %v11595_v31  ;;  %9838 = vmatprep.subr.bf16.mxu1 %v11601_v34 }
 0x227   :  { %9878 = vmatprep.subr.bf16.mxu0 %v11601_v34 }
 0x229   :  { %9840 = vmatpush3.bf16.msra.mxu1 %v11601_v34 }
 0x22a   :  { %9880 = vmatpush3.bf16.msra.mxu0 %v11601_v34  ;;  %9842 = vmatprep.subr.bf16.mxu1 %v11607_v37 }
 0x22b   :  { %9882 = vmatprep.subr.bf16.mxu0 %v11607_v37 }
 0x22d   :  { %9844 = vmatpush3.bf16.msra.mxu1 %v11607_v37 }
 0x22e   :  { %9884 = vmatpush3.bf16.msra.mxu0 %v11607_v37  ;;  %9886 = vmatprep.subr.bf16.mxu1 %v9885_v29 }
 0x22f   :  { %9926 = vmatprep.subr.bf16.mxu0 %v9925_v30 }
 0x2db   :  { %v7942_v32 = vpop.f32.mrb[6].mxu1 }
 0x2dc   :  { %v901_v33 = vsub.f32 %v7942_v32, %v11682_v61  ;;  %v7988_v35 = vpop.f32.mrb[6].mxu0  ;;  %v577_v36 = vpop.f32.mrb[7].mxu1  ;;  %v9929_v61 = vpack.c.bf16 %v1263_v49, %v1262_v48 }
 0x2dd   :  { %v903_v38 = vsub.f32 %v7988_v35, %v11684_v3  ;;  %v900_v39 = vsub.f32 %v577_v36, %v11688_v1  ;;  %v731_v40 = vpop.f32.mrb[7].mxu0  ;;  %v1568_v3 = vmul.f32 %v11756_v9, %v11676_v56  ;;  %v1569_v1 = vmul.f32 %v11758_v10, %v11678_v57 }
 0x2de   :  { %v902_v41 = vsub.f32 %v731_v40, %v11690_v4  ;;  %v908_v36 = vadd.f32 0.0001, %v906_v27 }
 0x2df   :  { %v921_v42 = vadd.f32 %v903_v38, %v901_v33  ;;  %v10005_v4 = vpack.c.bf16 %v1569_v1, %v1568_v3  ;;  %v1416_v33 = vmul.f32 %v11767_v46, %v11767_v46 }
 0x2e0   :  { %v920_v43 = vadd.f32 %v902_v41, %v900_v39  ;;  %v1571_v39 = vmul.f32 %v11769_v47, %v11708_v17 }
 0x2e1   :  { %v923_v45 = vadd.f32 0.0009, %v921_v42 }
 0x2e2   :  { %v922_v51 = vadd.f32 0.0009, %v920_v43 }
 0x2e3   :  { %v11776_v52 = vmul.f32 %v923_v45, %v919_v44  ;;  %v7999_v53 = vpop.f32.mrb[8].mxu1  ;;  %v11431_v44 = vmov 0.0  }
 0x2e4   :  { %v11778_v54 = vmul.f32 %v922_v51, %v918_v50  ;;  %v8045_v55 = vpop.f32.mrb[8].mxu0  ;;  %v810_v58 = vpop.f32.mrb[9].mxu1  ;;  %v11850_v45 = vsel %vm112_vm1, 1.0, %v11431_v44 }
 0x2e5   :  { %v1026_v60 = vpop.f32.mrb[9].mxu0  ;;  %8032 = vmatprep.mubr.f32.mxu1 %v810_v58  ;;  %11269 = vrcp.f32 %v11776_v52  ;;  %v11896_v58 = vld [vmem:[#allocation2 + $0x48] sm:$0xff] }
 0x2e6   :  { %8078 = vmatprep.mubr.f32.mxu0 %v1026_v60  ;;  %8033 = vmatmul.mubr.f32.vlgmr.msra.gmra.mrb[10].mxu1 %v7999_v53  ;;  %11271 = vrcp.f32 %v11778_v54 }
 0x2e7   :  { %8079 = vmatmul.mubr.f32.vlgmr.msra.gmra.mrb[10].mxu0 %v8045_v55  ;;  %9888 = vmatpush3.bf16.msra.mxu1 %v9885_v29  ;;  %v909_v29 = vadd.f32 0.0001, %v907_v20 }
 0x2e8   :  { %9928 = vmatpush3.bf16.msra.mxu0 %v9925_v30  ;;  %9890 = vmatprep.subr.bf16.mxu1 %v9889_v59 }
 0x2e9   :  { %9930 = vmatprep.subr.bf16.mxu0 %v9929_v61  ;;  %8089 = vmatprep.mubr.msk.f32.mxu1 %vm125_vm0, %v11554_v11 }
 0x2ea   :  { %8135 = vmatprep.mubr.msk.f32.mxu0 %vm125_vm0, %v11554_v11 }
 0x2eb   :  { %9892 = vmatpush3.bf16.msra.mxu1 %v9889_v59  ;;  %v11898_v59 = vld [vmem:[#allocation5 + $0x40] sm:$0xff] }
 0x2ec   :  { %9932 = vmatpush3.bf16.msra.mxu0 %v9929_v61  ;;  %9894 = vmatprep.subr.bf16.mxu1 %v11560_v15  ;;  %v11902_v61 = vld [vmem:[#allocation5 + $0x48] sm:$0xff] }
 0x2ed   :  { %9934 = vmatprep.subr.bf16.mxu0 %v11560_v15  ;;  %v10085_v62 = vpack.c.bf16 %v11902_v61, %v11898_v59 }
 0x2ee   :  { %8090 = vmatmul.mubr.msk.f32.vlgmr.msra.gmra.mrb[12].mxu1 %vm125_vm0, %v11564_v18 }
 0x2ef   :  { %8136 = vmatmul.mubr.msk.f32.vlgmr.msra.gmra.mrb[12].mxu0 %vm125_vm0, %v11564_v18  ;;  %9896 = vmatpush3.bf16.msra.mxu1 %v11560_v15  ;;  %v11270_v8 = vpop.eup %11269 }
 0x2f0   :  { %9936 = vmatpush3.bf16.msra.mxu0 %v11560_v15  ;;  %9898 = vmatprep.subr.bf16.mxu1 %v11567_v19  ;;  %v11272_v12 = vpop.eup %11271  ;;  %v929_v14 = vmul.f32 %v11270_v8, %v11776_v52 }
 0x2f1   :  { %9938 = vmatprep.subr.bf16.mxu0 %v11567_v19  ;;  %v928_v56 = vmul.f32 %v11272_v12, %v11778_v54 }
 0x2f2   :  { %v931_v9 = vsub.f32 2.0, %v929_v14 }
 0x2f3   :  { %9900 = vmatpush3.bf16.msra.mxu1 %v11567_v19  ;;  %v930_v30 = vsub.f32 2.0, %v928_v56 }
 0x2f4   :  { %9940 = vmatpush3.bf16.msra.mxu0 %v11567_v19  ;;  %9902 = vmatprep.subr.bf16.mxu1 %v11577_v22  ;;  %v933_v41 = vmul.f32 %v11270_v8, %v931_v9 }
 0x2f5   :  { %9942 = vmatprep.subr.bf16.mxu0 %v11577_v22  ;;  %v932_v48 = vmul.f32 %v11272_v12, %v930_v30  ;;  %v11940_v30 = vld [vmem:[#allocation2 + $0x50] sm:$0xff] }
 0x2f7   :  { %9904 = vmatpush3.bf16.msra.mxu1 %v11577_v22 }
 0x2f8   :  { %9944 = vmatpush3.bf16.msra.mxu0 %v11577_v22  ;;  %9906 = vmatprep.subr.bf16.mxu1 %v11583_v25 }
 0x2f9   :  { %9946 = vmatprep.subr.bf16.mxu0 %v11583_v25 }
 0x2fb   :  { %9908 = vmatpush3.bf16.msra.mxu1 %v11583_v25 }
 0x2fc   :  { %9948 = vmatpush3.bf16.msra.mxu0 %v11583_v25  ;;  %9910 = vmatprep.subr.bf16.mxu1 %v11589_v28 }
 0x2fd   :  { %9950 = vmatprep.subr.bf16.mxu0 %v11589_v28 }
 0x2ff   :  { %9912 = vmatpush3.bf16.msra.mxu1 %v11589_v28 }
 0x300   :  { %9952 = vmatpush3.bf16.msra.mxu0 %v11589_v28  ;;  %9914 = vmatprep.subr.bf16.mxu1 %v11595_v31 }
 0x301   :  { %9954 = vmatprep.subr.bf16.mxu0 %v11595_v31 }
 0x303   :  { %9916 = vmatpush3.bf16.msra.mxu1 %v11595_v31 }
 0x304   :  { %9956 = vmatpush3.bf16.msra.mxu0 %v11595_v31  ;;  %9918 = vmatprep.subr.bf16.mxu1 %v11601_v34 }
 0x305   :  { %9958 = vmatprep.subr.bf16.mxu0 %v11601_v34 }
 0x307   :  { %9920 = vmatpush3.bf16.msra.mxu1 %v11601_v34 }
 0x308   :  { %9960 = vmatpush3.bf16.msra.mxu0 %v11601_v34  ;;  %9922 = vmatprep.subr.bf16.mxu1 %v11607_v37 }
 0x309   :  { %9962 = vmatprep.subr.bf16.mxu0 %v11607_v37 }
 0x30b   :  { %9924 = vmatpush3.bf16.msra.mxu1 %v11607_v37 }
 0x30c   :  { %9964 = vmatpush3.bf16.msra.mxu0 %v11607_v37  ;;  %9966 = vmatprep.subr.bf16.mxu1 %v9965_v2 }
 0x30d   :  { %10006 = vmatprep.subr.bf16.mxu0 %v10005_v4 }
 0x3b9   :  { %v8034_v21 = vpop.f32.mrb[10].mxu1 }
 0x3ba   :  { %v905_v57 = vsub.f32 %v8034_v21, %v11686_v0  ;;  %v885_v23 = vpop.f32.mrb[11].mxu1  ;;  %v11836_v24 = vpop.f32.mrb[10].mxu0  ;;  %v1417_v0 = vmul.f32 %v11769_v47, %v11769_v47  ;;  %v11894_v47 = vld [vmem:[#allocation2 + $0x40] sm:$0xff] }
 0x3bb   :  { %v904_v5 = vsub.f32 %v885_v23, %v11692_v7  ;;  %v11840_v6 = vpop.f32.mrb[11].mxu0  ;;  %v1570_v7 = vmul.f32 %v11767_v46, %v11706_v16  ;;  %v10045_v60 = vpack.c.bf16 %v11896_v58, %v11894_v47  ;;  %v11908_v13 = vmul.f32 %v11836_v24, %v11836_v24 }
 0x3bc   :  { %v911_v10 = vmul.f32 2.0, %v905_v57  ;;  %v9969_v51 = vpack.c.bf16 %v1417_v0, %v1416_v33  ;;  %v11912_v20 = vmul.f32 %v11840_v6, %v11840_v6  ;;  %v11944_v33 = vld [vmem:[#allocation5 + $0x50] sm:$0xff] }
 0x3bd   :  { %v910_v32 = vmul.f32 2.0, %v904_v5  ;;  %v10009_v54 = vpack.c.bf16 %v1571_v39, %v1570_v7 }
 0x3be   :  { %v913_v35 = vadd.f32 0.0009, %v911_v10 }
 0x3bf   :  { %v912_v38 = vadd.f32 0.0009, %v910_v32  ;;  %v11942_v32 = vld [vmem:[#allocation2 + $0x58] sm:$0xff] }
 0x3c0   :  { %v915_v40 = vmul.f32 %v913_v35, %v909_v29 }
 0x3c1   :  { %v914_v42 = vmul.f32 %v912_v38, %v908_v36  ;;  %v8091_v43 = vpop.f32.mrb[12].mxu1  ;;  %v10049_v38 = vpack.c.bf16 %v11942_v32, %v11940_v30 }
 0x3c2   :  { %v8137_v49 = vpop.f32.mrb[12].mxu0  ;;  %v1176_v50 = vpop.f32.mrb[13].mxu1  ;;  %v935_v52 = vmul.f32 %v933_v41, %v915_v40  ;;  %v2242_v40 = vmul.f32 %v11898_v59, %v11898_v59  ;;  %v2243_v41 = vmul.f32 %v11902_v61, %v11902_v61 }
 0x3c3   :  { %v1330_v53 = vpop.f32.mrb[13].mxu0  ;;  %8124 = vmatprep.mubr.f32.mxu1 %v1176_v50  ;;  %v934_v55 = vmul.f32 %v932_v48, %v914_v42 }
 0x3c4   :  { %8170 = vmatprep.mubr.f32.mxu0 %v1330_v53  ;;  %8125 = vmatmul.mubr.f32.vlgmr.msra.gmra.mrb[14].mxu1 %v8091_v43  ;;  %v937_v16 = vmul.f32 %v11850_v45, %v935_v52  ;;  %v10165_v43 = vpack.c.bf16 %v2243_v41, %v2242_v40 }
 0x3c5   :  { %8171 = vmatmul.mubr.f32.vlgmr.msra.gmra.mrb[14].mxu0 %v8137_v49  ;;  %9968 = vmatpush3.bf16.msra.mxu1 %v9965_v2  ;;  %v936_v17 = vmul.f32 %v11850_v45, %v934_v55 }
 0x3c6   :  { %10008 = vmatpush3.bf16.msra.mxu0 %v10005_v4  ;;  %9970 = vmatprep.subr.bf16.mxu1 %v9969_v51 }
 0x3c7   :  { %10010 = vmatprep.subr.bf16.mxu0 %v10009_v54  ;;  %8181 = vmatprep.mubr.msk.f32.mxu1 %vm125_vm0, %v11554_v11  ;;  %v938_v46 = vadd.f32 %v937_v16, %v936_v17 }
 0x3c8   :  { %8227 = vmatprep.mubr.msk.f32.mxu0 %vm125_vm0, %v11554_v11 }
 0x3c9   :  { %9972 = vmatpush3.bf16.msra.mxu1 %v9969_v51  ;;  %939 = vadd.xlane.f32.xlu0 %v938_v46 }
 0x3ca   :  { %10012 = vmatpush3.bf16.msra.mxu0 %v10009_v54  ;;  %9974 = vmatprep.subr.bf16.mxu1 %v11560_v15 }
 0x3cb   :  { %10014 = vmatprep.subr.bf16.mxu0 %v11560_v15 }
 0x3cc   :  { %8182 = vmatmul.mubr.msk.f32.vlgmr.msra.gmra.mrb[16].mxu1 %vm125_vm0, %v11564_v18 }
 0x3cd   :  { %8228 = vmatmul.mubr.msk.f32.vlgmr.msra.gmra.mrb[16].mxu0 %vm125_vm0, %v11564_v18  ;;  %9976 = vmatpush3.bf16.msra.mxu1 %v11560_v15 }
 0x3ce   :  { %10016 = vmatpush3.bf16.msra.mxu0 %v11560_v15  ;;  %9978 = vmatprep.subr.bf16.mxu1 %v11567_v19 }
 0x3cf   :  { %10018 = vmatprep.subr.bf16.mxu0 %v11567_v19 }
 0x3d1   :  { %9980 = vmatpush3.bf16.msra.mxu1 %v11567_v19 }
 0x3d2   :  { %10020 = vmatpush3.bf16.msra.mxu0 %v11567_v19  ;;  %9982 = vmatprep.subr.bf16.mxu1 %v11577_v22 }
 0x3d3   :  { %10022 = vmatprep.subr.bf16.mxu0 %v11577_v22 }
 0x3d5   :  { %9984 = vmatpush3.bf16.msra.mxu1 %v11577_v22 }
 0x3d6   :  { %10024 = vmatpush3.bf16.msra.mxu0 %v11577_v22  ;;  %9986 = vmatprep.subr.bf16.mxu1 %v11583_v25 }
 0x3d7   :  { %10026 = vmatprep.subr.bf16.mxu0 %v11583_v25 }
 0x3d9   :  { %9988 = vmatpush3.bf16.msra.mxu1 %v11583_v25 }
 0x3da   :  { %10028 = vmatpush3.bf16.msra.mxu0 %v11583_v25  ;;  %9990 = vmatprep.subr.bf16.mxu1 %v11589_v28 }
 0x3db   :  { %10030 = vmatprep.subr.bf16.mxu0 %v11589_v28 }
 0x3dd   :  { %9992 = vmatpush3.bf16.msra.mxu1 %v11589_v28 }
 0x3de   :  { %10032 = vmatpush3.bf16.msra.mxu0 %v11589_v28  ;;  %9994 = vmatprep.subr.bf16.mxu1 %v11595_v31 }
 0x3df   :  { %10034 = vmatprep.subr.bf16.mxu0 %v11595_v31 }
 0x3e1   :  { %9996 = vmatpush3.bf16.msra.mxu1 %v11595_v31 }
 0x3e2   :  { %10036 = vmatpush3.bf16.msra.mxu0 %v11595_v31  ;;  %9998 = vmatprep.subr.bf16.mxu1 %v11601_v34 }
 0x3e3   :  { %10038 = vmatprep.subr.bf16.mxu0 %v11601_v34 }
 0x3e5   :  { %10000 = vmatpush3.bf16.msra.mxu1 %v11601_v34 }
 0x3e6   :  { %10040 = vmatpush3.bf16.msra.mxu0 %v11601_v34  ;;  %10002 = vmatprep.subr.bf16.mxu1 %v11607_v37 }
 0x3e7   :  { %10042 = vmatprep.subr.bf16.mxu0 %v11607_v37 }
 0x3e9   :  { %10004 = vmatpush3.bf16.msra.mxu1 %v11607_v37 }
 0x3ea   :  { %10044 = vmatpush3.bf16.msra.mxu0 %v11607_v37  ;;  %10046 = vmatprep.subr.bf16.mxu1 %v10045_v60 }
 0x3eb   :  { %10086 = vmatprep.subr.bf16.mxu0 %v10085_v62 }
 0x456   :  { %v940_v63 = vpop.xlane.xlu0 %939 }
 0x457   :  { %v941_v3 = vrot.slane %v940_v63, 4 }
 0x459   :  { %v942_v1 = vadd.f32 %v941_v3, %v940_v63 }
 0x45b   :  { %v943_v2 = vrot.slane %v942_v1, 2 }
 0x45d   :  { %v944_v4 = vadd.f32 %v943_v2, %v942_v1 }
 0x45f   :  { %v945_v8 = vrot.slane %v944_v4, 1 }
 0x461   :  { %v946_v12 = vadd.f32 %v945_v8, %v944_v4  ;;  %v2090_v4 = vmul.f32 %v11940_v30, %v11940_v30  ;;  %v2091_v8 = vmul.f32 %v11942_v32, %v11942_v32 }
 0x463   :  { %11245 = vpush %v946_v12 }
 0x494   :  { %s11246_s3 = spop %11245 }
 0x497   :  { %v8126_v14 = vpop.f32.mrb[14].mxu1 }
 0x498   :  { %v11914_v56 = vmul.f32 %v8126_v14, %v8126_v14  ;;  %v11917_v21 = vmul.f32 %v8126_v14, %v11836_v24  ;;  %v11919_v57 = vpop.f32.mrb[14].mxu0  ;;  %v1251_v23 = vpop.f32.mrb[15].mxu1  ;;  %v2244_v14 = vmul.f32 %v11944_v33, %v11944_v33 }
 0x499   :  { %v1729_v26 = vsub.f32 %v11919_v57, %v11908_v13  ;;  %v11923_v27 = vmul.f32 %v1251_v23, %v1251_v23  ;;  %v11926_v5 = vmul.f32 %v1251_v23, %v11840_v6  ;;  %v11928_v9 = vpop.f32.mrb[15].mxu0  ;;  %v11946_v6 = vld [vmem:[#allocation5 + $0x58] sm:$0xff] }
 0x49a   :  { %v11932_v10 = vadd.f32 %v11914_v56, %v11908_v13  ;;  %v1728_v24 = vsub.f32 %v11928_v9, %v11912_v20  ;;  %v10089_v39 = vpack.c.bf16 %v11946_v6, %v11944_v33  ;;  %v1735_v44 = vmul.f32 2.0, %v11917_v21 }
 0x49b   :  { %v11938_v29 = vadd.f32 %v11923_v27, %v11912_v20  ;;  %v1734_v16 = vmul.f32 2.0, %v11926_v5 }
 0x49c   :  { %v1737_v55 = vadd.f32 0.0001, %v1735_v44 }
 0x49f   :  { %v8183_v35 = vpop.f32.mrb[16].mxu1 }
 0x4a0   :  { %v8229_v0 = vpop.f32.mrb[16].mxu0  ;;  %v1484_v36 = vpop.f32.mrb[17].mxu1 }
 0x4a1   :  { %v1638_v7 = vpop.f32.mrb[17].mxu0  ;;  %8216 = vmatprep.mubr.f32.mxu1 %v1484_v36 }
 0x4a2   :  { %8262 = vmatprep.mubr.f32.mxu0 %v1638_v7  ;;  %8217 = vmatmul.mubr.f32.vlgmr.msra.gmra.mrb[18].mxu1 %v8183_v35 }
 0x4a3   :  { %8263 = vmatmul.mubr.f32.vlgmr.msra.gmra.mrb[18].mxu0 %v8229_v0  ;;  %10048 = vmatpush3.bf16.msra.mxu1 %v10045_v60  ;;  %v1747_v60 = vadd.f32 0.0001, %v11932_v10  ;;  %v12022_v0 = vld [vmem:[#allocation7] sm:$0xff] }
 0x4a4   :  { %10088 = vmatpush3.bf16.msra.mxu0 %v10085_v62  ;;  %10050 = vmatprep.subr.bf16.mxu1 %v10049_v38  ;;  %v1746_v62 = vadd.f32 0.0001, %v11938_v29 }
 0x4a5   :  { %10090 = vmatprep.subr.bf16.mxu0 %v10089_v39  ;;  %8273 = vmatprep.mubr.msk.f32.mxu1 %vm125_vm0, %v11554_v11 }
 0x4a6   :  { %8319 = vmatprep.mubr.msk.f32.mxu0 %vm125_vm0, %v11554_v11  ;;  %v2088_v11 = vmul.f32 %v11894_v47, %v11894_v47 }
 0x4a7   :  { %10052 = vmatpush3.bf16.msra.mxu1 %v10049_v38  ;;  %v12030_v38 = vld [vmem:[#allocation7 + $0x8] sm:$0xff] }
 0x4a8   :  { %10092 = vmatpush3.bf16.msra.mxu0 %v10089_v39  ;;  %10054 = vmatprep.subr.bf16.mxu1 %v11560_v15 }
 0x4a9   :  { %10094 = vmatprep.subr.bf16.mxu0 %v11560_v15 }
 0x4aa   :  { %8274 = vmatmul.mubr.msk.f32.vlgmr.msra.gmra.mrb[20].mxu1 %vm125_vm0, %v11564_v18 }
 0x4ab   :  { %8320 = vmatmul.mubr.msk.f32.vlgmr.msra.gmra.mrb[20].mxu0 %vm125_vm0, %v11564_v18  ;;  %10056 = vmatpush3.bf16.msra.mxu1 %v11560_v15  ;;  %v2089_v18 = vmul.f32 %v11896_v58, %v11896_v58 }
 0x4ac   :  { %10096 = vmatpush3.bf16.msra.mxu0 %v11560_v15  ;;  %10058 = vmatprep.subr.bf16.mxu1 %v11567_v19 }
 0x4ad   :  { %10098 = vmatprep.subr.bf16.mxu0 %v11567_v19  ;;  %v10125_v42 = vpack.c.bf16 %v2089_v18, %v2088_v11 }
 0x4af   :  { %10060 = vmatpush3.bf16.msra.mxu1 %v11567_v19 }
 0x4b0   :  { %10100 = vmatpush3.bf16.msra.mxu0 %v11567_v19  ;;  %10062 = vmatprep.subr.bf16.mxu1 %v11577_v22 }
 0x4b1   :  { %10102 = vmatprep.subr.bf16.mxu0 %v11577_v22 }
 0x4b3   :  { %10064 = vmatpush3.bf16.msra.mxu1 %v11577_v22 }
 0x4b4   :  { %10104 = vmatpush3.bf16.msra.mxu0 %v11577_v22  ;;  %10066 = vmatprep.subr.bf16.mxu1 %v11583_v25 }
 0x4b5   :  { %10106 = vmatprep.subr.bf16.mxu0 %v11583_v25 }
 0x4b7   :  { %10068 = vmatpush3.bf16.msra.mxu1 %v11583_v25 }
 0x4b8   :  { %10108 = vmatpush3.bf16.msra.mxu0 %v11583_v25  ;;  %10070 = vmatprep.subr.bf16.mxu1 %v11589_v28 }
 0x4b9   :  { %10110 = vmatprep.subr.bf16.mxu0 %v11589_v28 }
 0x4bb   :  { %10072 = vmatpush3.bf16.msra.mxu1 %v11589_v28 }
 0x4bc   :  { %10112 = vmatpush3.bf16.msra.mxu0 %v11589_v28  ;;  %10074 = vmatprep.subr.bf16.mxu1 %v11595_v31 }
 0x4bd   :  { %10114 = vmatprep.subr.bf16.mxu0 %v11595_v31 }
 0x4bf   :  { %10076 = vmatpush3.bf16.msra.mxu1 %v11595_v31 }
 0x4c0   :  { %10116 = vmatpush3.bf16.msra.mxu0 %v11595_v31  ;;  %10078 = vmatprep.subr.bf16.mxu1 %v11601_v34 }
 0x4c1   :  { %10118 = vmatprep.subr.bf16.mxu0 %v11601_v34 }
 0x4c3   :  { %10080 = vmatpush3.bf16.msra.mxu1 %v11601_v34 }
 0x4c4   :  { %10120 = vmatpush3.bf16.msra.mxu0 %v11601_v34  ;;  %10082 = vmatprep.subr.bf16.mxu1 %v11607_v37 }
 0x4c5   :  { %10122 = vmatprep.subr.bf16.mxu0 %v11607_v37 }
 0x4c7   :  { %10084 = vmatpush3.bf16.msra.mxu1 %v11607_v37 }
 0x4c8   :  { %10124 = vmatpush3.bf16.msra.mxu0 %v11607_v37  ;;  %10126 = vmatprep.subr.bf16.mxu1 %v10125_v42 }
 0x4c9   :  { %10166 = vmatprep.subr.bf16.mxu0 %v10165_v43 }
 0x575   :  { %v8218_v48 = vpop.f32.mrb[18].mxu1 }
 0x576   :  { %v1731_v49 = vsub.f32 %v8218_v48, %v11914_v56  ;;  %v8264_v50 = vpop.f32.mrb[18].mxu0  ;;  %v1559_v51 = vpop.f32.mrb[19].mxu1  ;;  %v2245_v56 = vmul.f32 %v11946_v6, %v11946_v6 }
 0x577   :  { %v1733_v52 = vsub.f32 %v8264_v50, %v11917_v21  ;;  %v1730_v53 = vsub.f32 %v1559_v51, %v11923_v27  ;;  %v1713_v54 = vpop.f32.mrb[19].mxu0  ;;  %v1736_v21 = vadd.f32 0.0001, %v1734_v16  ;;  %v2396_v51 = vmul.f32 %v11898_v59, %v11894_v47 }
 0x578   :  { %v1749_v17 = vadd.f32 %v1731_v49, %v1729_v26  ;;  %v1732_v46 = vsub.f32 %v1713_v54, %v11926_v5  ;;  %v10169_v35 = vpack.c.bf16 %v2245_v56, %v2244_v14  ;;  %v12074_v54 = vld [vmem:[#allocation2 + $0x68] sm:$0xff] }
 0x579   :  { %v1739_v63 = vmul.f32 2.0, %v1733_v52  ;;  %v1748_v3 = vadd.f32 %v1730_v53, %v1728_v24  ;;  %v10129_v24 = vpack.c.bf16 %v2091_v8, %v2090_v4  ;;  %v2397_v52 = vmul.f32 %v11902_v61, %v11896_v58  ;;  %v12072_v53 = vld [vmem:[#allocation2 + $0x60] sm:$0xff] }
 0x57a   :  { %v1751_v1 = vadd.f32 0.0009, %v1749_v17  ;;  %v1738_v2 = vmul.f32 2.0, %v1732_v46  ;;  %v10245_v16 = vpack.c.bf16 %v12074_v54, %v12072_v53 }
 0x57b   :  { %v1741_v12 = vadd.f32 0.0009, %v1739_v63  ;;  %v1750_v13 = vadd.f32 0.0009, %v1748_v3 }
 0x57c   :  { %v1753_v57 = vmul.f32 %v1751_v1, %v1747_v60  ;;  %v1740_v20 = vadd.f32 0.0009, %v1738_v2 }
 0x57d   :  { %v1743_v23 = vmul.f32 %v1741_v12, %v1737_v55  ;;  %v1752_v26 = vmul.f32 %v1750_v13, %v1746_v62  ;;  %v8275_v27 = vpop.f32.mrb[20].mxu1  ;;  %v10205_v55 = vpack.c.bf16 %v2397_v52, %v2396_v51  ;;  %v12163_v51 = vld [vmem:[#allocation5 + $0x70] sm:$0xff]  ;;  %v12165_v52 = vld [vmem:[#allocation5 + $0x78] sm:$0xff] }
 0x57e   :  { %11273 = vrcp.f32 %v1753_v57  ;;  %v1742_v5 = vmul.f32 %v1740_v20, %v1736_v21  ;;  %v8321_v9 = vpop.f32.mrb[20].mxu0  ;;  %v1854_v10 = vpop.f32.mrb[21].mxu1  ;;  %v2399_v20 = vmul.f32 %v11946_v6, %v11942_v32  ;;  %v2917_v32 = vmul.f32 %v12074_v54, %v12074_v54  ;;  %v12154_v6 = vld [vmem:[#allocation5 + $0x68] sm:$0xff] }
 0x57f   :  { %11275 = vrcp.f32 %v1752_v26  ;;  %v2004_v29 = vpop.f32.mrb[21].mxu0  ;;  %8308 = vmatprep.mubr.f32.mxu1 %v1854_v10 }
 0x580   :  { %8354 = vmatprep.mubr.f32.mxu0 %v2004_v29  ;;  %8309 = vmatmul.mubr.f32.vlgmr.msra.gmra.mrb[22].mxu1 %v8275_v27 }
 0x581   :  { %8355 = vmatmul.mubr.f32.vlgmr.msra.gmra.mrb[22].mxu0 %v8321_v9  ;;  %10128 = vmatpush3.bf16.msra.mxu1 %v10125_v42 }
 0x582   :  { %10168 = vmatpush3.bf16.msra.mxu0 %v10165_v43  ;;  %10130 = vmatprep.subr.bf16.mxu1 %v10129_v24 }
 0x583   :  { %10170 = vmatprep.subr.bf16.mxu0 %v10169_v35  ;;  %8365 = vmatprep.mubr.msk.f32.mxu1 %vm125_vm0, %v12022_v0 }
 0x584   :  { %8411 = vmatprep.mubr.msk.f32.mxu0 %vm125_vm0, %v12022_v0 }
 0x585   :  { %10132 = vmatpush3.bf16.msra.mxu1 %v10129_v24 }
 0x586   :  { %10172 = vmatpush3.bf16.msra.mxu0 %v10169_v35  ;;  %10134 = vmatprep.subr.bf16.mxu1 %v11560_v15 }
 0x587   :  { %10174 = vmatprep.subr.bf16.mxu0 %v11560_v15 }
 0x588   :  { %v11274_v36 = vpop.eup %11273  ;;  %8366 = vmatmul.mubr.msk.f32.vlgmr.msra.gmra.mrb[24].mxu1 %vm125_vm0, %v12030_v38 }
 0x589   :  { %v11276_v7 = vpop.eup %11275  ;;  %v1757_v39 = vmul.f32 %v11274_v36, %v1753_v57  ;;  %8412 = vmatmul.mubr.msk.f32.vlgmr.msra.gmra.mrb[24].mxu0 %vm125_vm0, %v12030_v38  ;;  %10136 = vmatpush3.bf16.msra.mxu1 %v11560_v15  ;;  %v2398_v57 = vmul.f32 %v11944_v33, %v11940_v30  ;;  %v2916_v30 = vmul.f32 %v12072_v53, %v12072_v53  ;;  %v12152_v33 = vld [vmem:[#allocation5 + $0x60] sm:$0xff] }
 0x58a   :  { %v1756_v11 = vmul.f32 %v11276_v7, %v1752_v26  ;;  %10176 = vmatpush3.bf16.msra.mxu0 %v11560_v15  ;;  %10138 = vmatprep.subr.bf16.mxu1 %v11567_v19  ;;  %v12104_v26 = vld [vmem:[#allocation2 + $0x78] sm:$0xff]  ;;  %v10285_v35 = vpack.c.bf16 %v12154_v6, %v12152_v33 }
 0x58b   :  { %v1759_v18 = vsub.f32 2.0, %v1757_v39  ;;  %10178 = vmatprep.subr.bf16.mxu0 %v11567_v19  ;;  %v10209_v10 = vpack.c.bf16 %v2399_v20, %v2398_v57 }
 0x58c   :  { %v1758_v40 = vsub.f32 2.0, %v1756_v11 }
 0x58d   :  { %v1761_v41 = vmul.f32 %v11274_v36, %v1759_v18  ;;  %10140 = vmatpush3.bf16.msra.mxu1 %v11567_v19  ;;  %v10325_v36 = vpack.c.bf16 %v2917_v32, %v2916_v30 }
 0x58e   :  { %v1760_v42 = vmul.f32 %v11276_v7, %v1758_v40  ;;  %10180 = vmatpush3.bf16.msra.mxu0 %v11567_v19  ;;  %10142 = vmatprep.subr.bf16.mxu1 %v11577_v22 }
 0x58f   :  { %v1763_v43 = vmul.f32 %v1761_v41, %v1743_v23  ;;  %10182 = vmatprep.subr.bf16.mxu0 %v11577_v22  ;;  %v12102_v23 = vld [vmem:[#allocation2 + $0x70] sm:$0xff] }
 0x590   :  { %v1762_v44 = vmul.f32 %v1760_v42, %v1742_v5  ;;  %v10249_v29 = vpack.c.bf16 %v12104_v26, %v12102_v23 }
 0x591   :  { %v1765_v48 = vmul.f32 %v11850_v45, %v1763_v43  ;;  %10144 = vmatpush3.bf16.msra.mxu1 %v11577_v22 }
 0x592   :  { %v1764_v49 = vmul.f32 %v11850_v45, %v1762_v44  ;;  %10184 = vmatpush3.bf16.msra.mxu0 %v11577_v22  ;;  %10146 = vmatprep.subr.bf16.mxu1 %v11583_v25 }
 0x593   :  { %10186 = vmatprep.subr.bf16.mxu0 %v11583_v25 }
 0x594   :  { %v1766_v50 = vadd.f32 %v1765_v48, %v1764_v49 }
 0x595   :  { %10148 = vmatpush3.bf16.msra.mxu1 %v11583_v25 }
 0x596   :  { %1767 = vadd.xlane.f32.xlu0 %v1766_v50  ;;  %10188 = vmatpush3.bf16.msra.mxu0 %v11583_v25 }
 0x597   :  { %10150 = vmatprep.subr.bf16.mxu1 %v11589_v28  ;;  %10190 = vmatprep.subr.bf16.mxu0 %v11589_v28 }
 0x599   :  { %10152 = vmatpush3.bf16.msra.mxu1 %v11589_v28 }
 0x59a   :  { %10192 = vmatpush3.bf16.msra.mxu0 %v11589_v28  ;;  %10154 = vmatprep.subr.bf16.mxu1 %v11595_v31 }
 0x59b   :  { %10194 = vmatprep.subr.bf16.mxu0 %v11595_v31 }
 0x59d   :  { %10156 = vmatpush3.bf16.msra.mxu1 %v11595_v31 }
 0x59e   :  { %10196 = vmatpush3.bf16.msra.mxu0 %v11595_v31  ;;  %10158 = vmatprep.subr.bf16.mxu1 %v11601_v34 }
 0x59f   :  { %10198 = vmatprep.subr.bf16.mxu0 %v11601_v34 }
 0x5a1   :  { %10160 = vmatpush3.bf16.msra.mxu1 %v11601_v34 }
 0x5a2   :  { %10200 = vmatpush3.bf16.msra.mxu0 %v11601_v34  ;;  %10162 = vmatprep.subr.bf16.mxu1 %v11607_v37 }
 0x5a3   :  { %10202 = vmatprep.subr.bf16.mxu0 %v11607_v37 }
 0x5a5   :  { %10164 = vmatpush3.bf16.msra.mxu1 %v11607_v37 }
 0x5a6   :  { %10204 = vmatpush3.bf16.msra.mxu0 %v11607_v37  ;;  %10206 = vmatprep.subr.bf16.mxu1 %v10205_v55 }
 0x5a7   :  { %10246 = vmatprep.subr.bf16.mxu0 %v10245_v16 }
 0x623   :  { %v1768_v17 = vpop.xlane.xlu0 %1767 }
 0x624   :  { %v1769_v46 = vrot.slane %v1768_v17, 4 }
 0x626   :  { %v1770_v60 = vadd.f32 %v1769_v46, %v1768_v17 }
 0x628   :  { %v1771_v62 = vrot.slane %v1770_v60, 2 }
 0x62a   :  { %v1772_v63 = vadd.f32 %v1771_v62, %v1770_v60 }
 0x62c   :  { %v1773_v3 = vrot.slane %v1772_v63, 1 }
 0x62e   :  { %v1774_v47 = vadd.f32 %v1773_v3, %v1772_v63 }
 0x630   :  { %11247 = vpush %v1774_v47 }
 0x653   :  { %v8310_v59 = vpop.f32.mrb[22].mxu1 }
 0x654   :  { %v12078_v58 = vmul.f32 %v8310_v59, %v8310_v59  ;;  %v8356_v61 = vpop.f32.mrb[22].mxu0  ;;  %v1929_v1 = vpop.f32.mrb[23].mxu1 }
 0x655   :  { %v12080_v2 = vmul.f32 %v8356_v61, %v8356_v61  ;;  %v12082_v4 = vmul.f32 %v8356_v61, %v8310_v59  ;;  %v12084_v8 = vmul.f32 %v1929_v1, %v1929_v1  ;;  %v2079_v12 = vpop.f32.mrb[23].mxu0  ;;  %v10289_v59 = vpack.c.bf16 %v12165_v52, %v12163_v51 }
 0x656   :  { %v12086_v13 = vmul.f32 %v2079_v12, %v2079_v12  ;;  %v12088_v14 = vmul.f32 %v2079_v12, %v1929_v1  ;;  %v3070_v1 = vmul.f32 %v12152_v33, %v12152_v33  ;;  %v3225_v12 = vmul.f32 %v12154_v6, %v12074_v54 }
 0x657   :  { %v12092_v56 = vadd.f32 %v12080_v2, %v12078_v58 }
 0x658   :  { %v12096_v21 = vadd.f32 %v12086_v13, %v12084_v8 }
 0x659   :  { %v2575_v49 = vadd.f32 0.0001, %v12092_v56 }
 0x65a   :  { %v2574_v17 = vadd.f32 0.0001, %v12096_v21 }
 0x65b   :  { %v8367_v27 = vpop.f32.mrb[24].mxu1 }
 0x65c   :  { %v8413_v5 = vpop.f32.mrb[24].mxu0  ;;  %v2158_v9 = vpop.f32.mrb[25].mxu1 }
 0x65d   :  { %v2312_v24 = vpop.f32.mrb[25].mxu0  ;;  %8400 = vmatprep.mubr.f32.mxu1 %v2158_v9 }
 0x65e   :  { %8446 = vmatprep.mubr.f32.mxu0 %v2312_v24  ;;  %8401 = vmatmul.mubr.f32.vlgmr.msra.gmra.mrb[26].mxu1 %v8367_v27  ;;  %v2562_v24 = vmul.f32 2.0, %v12088_v14 }
 0x65f   :  { %8447 = vmatmul.mubr.f32.vlgmr.msra.gmra.mrb[26].mxu0 %v8413_v5  ;;  %10208 = vmatpush3.bf16.msra.mxu1 %v10205_v55  ;;  %v2918_v55 = vmul.f32 %v12102_v23, %v12102_v23 }
 0x660   :  { %10248 = vmatpush3.bf16.msra.mxu0 %v10245_v16  ;;  %10210 = vmatprep.subr.bf16.mxu1 %v10209_v10  ;;  %v2919_v16 = vmul.f32 %v12104_v26, %v12104_v26 }
 0x661   :  { %10250 = vmatprep.subr.bf16.mxu0 %v10249_v29  ;;  %8457 = vmatprep.mubr.msk.f32.mxu1 %vm125_vm0, %v12022_v0  ;;  %s11248_s27 = spop %11247 }
 0x662   :  { %8503 = vmatprep.mubr.msk.f32.mxu0 %vm125_vm0, %v12022_v0  ;;  %v10329_v61 = vpack.c.bf16 %v2919_v16, %v2918_v55 }
 0x663   :  { %10212 = vmatpush3.bf16.msra.mxu1 %v10209_v10 }
 0x664   :  { %10252 = vmatpush3.bf16.msra.mxu0 %v10249_v29  ;;  %10214 = vmatprep.subr.bf16.mxu1 %v11560_v15 }
 0x665   :  { %10254 = vmatprep.subr.bf16.mxu0 %v11560_v15 }
 0x666   :  { %8458 = vmatmul.mubr.msk.f32.vlgmr.msra.gmra.mrb[28].mxu1 %vm125_vm0, %v12030_v38 }
 0x667   :  { %8504 = vmatmul.mubr.msk.f32.vlgmr.msra.gmra.mrb[28].mxu0 %vm125_vm0, %v12030_v38  ;;  %10216 = vmatpush3.bf16.msra.mxu1 %v11560_v15 }
 0x668   :  { %10256 = vmatpush3.bf16.msra.mxu0 %v11560_v15  ;;  %10218 = vmatprep.subr.bf16.mxu1 %v11567_v19 }
 0x669   :  { %10258 = vmatprep.subr.bf16.mxu0 %v11567_v19 }
 0x66b   :  { %10220 = vmatpush3.bf16.msra.mxu1 %v11567_v19 }
 0x66c   :  { %10260 = vmatpush3.bf16.msra.mxu0 %v11567_v19  ;;  %10222 = vmatprep.subr.bf16.mxu1 %v11577_v22 }
 0x66d   :  { %10262 = vmatprep.subr.bf16.mxu0 %v11577_v22 }
 0x66f   :  { %10224 = vmatpush3.bf16.msra.mxu1 %v11577_v22 }
 0x670   :  { %10264 = vmatpush3.bf16.msra.mxu0 %v11577_v22  ;;  %10226 = vmatprep.subr.bf16.mxu1 %v11583_v25 }
 0x671   :  { %10266 = vmatprep.subr.bf16.mxu0 %v11583_v25 }
 0x673   :  { %10228 = vmatpush3.bf16.msra.mxu1 %v11583_v25 }
 0x674   :  { %10268 = vmatpush3.bf16.msra.mxu0 %v11583_v25  ;;  %10230 = vmatprep.subr.bf16.mxu1 %v11589_v28 }
 0x675   :  { %10270 = vmatprep.subr.bf16.mxu0 %v11589_v28 }
 0x677   :  { %10232 = vmatpush3.bf16.msra.mxu1 %v11589_v28 }
 0x678   :  { %10272 = vmatpush3.bf16.msra.mxu0 %v11589_v28  ;;  %10234 = vmatprep.subr.bf16.mxu1 %v11595_v31 }
 0x679   :  { %10274 = vmatprep.subr.bf16.mxu0 %v11595_v31 }
 0x67b   :  { %10236 = vmatpush3.bf16.msra.mxu1 %v11595_v31 }
 0x67c   :  { %10276 = vmatpush3.bf16.msra.mxu0 %v11595_v31  ;;  %10238 = vmatprep.subr.bf16.mxu1 %v11601_v34 }
 0x67d   :  { %10278 = vmatprep.subr.bf16.mxu0 %v11601_v34 }
 0x67f   :  { %10240 = vmatpush3.bf16.msra.mxu1 %v11601_v34 }
 0x680   :  { %10280 = vmatpush3.bf16.msra.mxu0 %v11601_v34  ;;  %10242 = vmatprep.subr.bf16.mxu1 %v11607_v37 }
 0x681   :  { %10282 = vmatprep.subr.bf16.mxu0 %v11607_v37 }
 0x683   :  { %10244 = vmatpush3.bf16.msra.mxu1 %v11607_v37 }
 0x684   :  { %10284 = vmatpush3.bf16.msra.mxu0 %v11607_v37  ;;  %10286 = vmatprep.subr.bf16.mxu1 %v10285_v35 }
 0x685   :  { %10326 = vmatprep.subr.bf16.mxu0 %v10325_v36 }
 0x731   :  { %v8402_v7 = vpop.f32.mrb[26].mxu1 }
 0x732   :  { %v2557_v39 = vsub.f32 %v8402_v7, %v12078_v58  ;;  %v8448_v11 = vpop.f32.mrb[26].mxu0  ;;  %v2233_v18 = vpop.f32.mrb[27].mxu1 }
 0x733   :  { %v2559_v40 = vsub.f32 %v8448_v11, %v12080_v2  ;;  %v2556_v41 = vsub.f32 %v2233_v18, %v12084_v8  ;;  %v2387_v42 = vpop.f32.mrb[27].mxu0  ;;  %v3071_v2 = vmul.f32 %v12154_v6, %v12154_v6  ;;  %v3224_v8 = vmul.f32 %v12152_v33, %v12072_v53 }
 0x734   :  { %v2558_v43 = vsub.f32 %v2387_v42, %v12086_v13  ;;  %v2563_v53 = vmul.f32 2.0, %v12082_v4  ;;  %v2564_v11 = vadd.f32 0.0001, %v2562_v24 }
 0x735   :  { %v2577_v44 = vadd.f32 %v2559_v40, %v2557_v39  ;;  %v10365_v13 = vpack.c.bf16 %v3071_v2, %v3070_v1  ;;  %v10405_v56 = vpack.c.bf16 %v3225_v12, %v3224_v8  ;;  %v3072_v39 = vmul.f32 %v12163_v51, %v12163_v51 }
 0x736   :  { %v2576_v48 = vadd.f32 %v2558_v43, %v2556_v41  ;;  %v3226_v40 = vmul.f32 %v12163_v51, %v12102_v23 }
 0x737   :  { %v2579_v50 = vadd.f32 0.0009, %v2577_v44 }
 0x738   :  { %v2578_v46 = vadd.f32 0.0009, %v2576_v48 }
 0x739   :  { %v12172_v60 = vmul.f32 %v2579_v50, %v2575_v49  ;;  %v8459_v62 = vpop.f32.mrb[28].mxu1 }
 0x73a   :  { %v12174_v63 = vmul.f32 %v2578_v46, %v2574_v17  ;;  %v8505_v3 = vpop.f32.mrb[28].mxu0  ;;  %v2466_v47 = vpop.f32.mrb[29].mxu1 }
 0x73b   :  { %v2682_v58 = vpop.f32.mrb[29].mxu0  ;;  %8492 = vmatprep.mubr.f32.mxu1 %v2466_v47  ;;  %11277 = vrcp.f32 %v12172_v60  ;;  %v12296_v47 = vld [vmem:[#allocation5 + $0x88] sm:$0xff] }
 0x73c   :  { %8538 = vmatprep.mubr.f32.mxu0 %v2682_v58  ;;  %8493 = vmatmul.mubr.f32.vlgmr.msra.gmra.mrb[30].mxu1 %v8459_v62  ;;  %11279 = vrcp.f32 %v12174_v63  ;;  %v12290_v62 = vld [vmem:[#allocation2 + $0x88] sm:$0xff] }
 0x73d   :  { %8539 = vmatmul.mubr.f32.vlgmr.msra.gmra.mrb[30].mxu0 %v8505_v3  ;;  %10288 = vmatpush3.bf16.msra.mxu1 %v10285_v35 }
 0x73e   :  { %10328 = vmatpush3.bf16.msra.mxu0 %v10325_v36  ;;  %10290 = vmatprep.subr.bf16.mxu1 %v10289_v59  ;;  %v2565_v36 = vadd.f32 0.0001, %v2563_v53 }
 0x73f   :  { %10330 = vmatprep.subr.bf16.mxu0 %v10329_v61  ;;  %8549 = vmatprep.mubr.msk.f32.mxu1 %vm125_vm0, %v12022_v0 }
 0x740   :  { %8595 = vmatprep.mubr.msk.f32.mxu0 %vm125_vm0, %v12022_v0 }
 0x741   :  { %10292 = vmatpush3.bf16.msra.mxu1 %v10289_v59 }
 0x742   :  { %10332 = vmatpush3.bf16.msra.mxu0 %v10329_v61  ;;  %10294 = vmatprep.subr.bf16.mxu1 %v11560_v15 }
 0x743   :  { %10334 = vmatprep.subr.bf16.mxu0 %v11560_v15 }
 0x744   :  { %8550 = vmatmul.mubr.msk.f32.vlgmr.msra.gmra.mrb[32].mxu1 %vm125_vm0, %v12030_v38 }
 0x745   :  { %8596 = vmatmul.mubr.msk.f32.vlgmr.msra.gmra.mrb[32].mxu0 %vm125_vm0, %v12030_v38  ;;  %10296 = vmatpush3.bf16.msra.mxu1 %v11560_v15  ;;  %v11278_v21 = vpop.eup %11277 }
 0x746   :  { %10336 = vmatpush3.bf16.msra.mxu0 %v11560_v15  ;;  %10298 = vmatprep.subr.bf16.mxu1 %v11567_v19  ;;  %v11280_v57 = vpop.eup %11279  ;;  %v2585_v20 = vmul.f32 %v11278_v21, %v12172_v60 }
 0x747   :  { %10338 = vmatprep.subr.bf16.mxu0 %v11567_v19  ;;  %v2584_v27 = vmul.f32 %v11280_v57, %v12174_v63  ;;  %v12292_v63 = vld [vmem:[#allocation5 + $0x80] sm:$0xff] }
 0x748   :  { %v2587_v32 = vsub.f32 2.0, %v2585_v20  ;;  %v10485_v59 = vpack.c.bf16 %v12296_v47, %v12292_v63 }
 0x749   :  { %10300 = vmatpush3.bf16.msra.mxu1 %v11567_v19  ;;  %v2586_v6 = vsub.f32 2.0, %v2584_v27 }
 0x74a   :  { %10340 = vmatpush3.bf16.msra.mxu0 %v11567_v19  ;;  %10302 = vmatprep.subr.bf16.mxu1 %v11577_v22  ;;  %v2589_v42 = vmul.f32 %v11278_v21, %v2587_v32 }
 0x74b   :  { %10342 = vmatprep.subr.bf16.mxu0 %v11577_v22  ;;  %v2588_v48 = vmul.f32 %v11280_v57, %v2586_v6  ;;  %v12334_v6 = vld [vmem:[#allocation2 + $0x90] sm:$0xff] }
 0x74d   :  { %10304 = vmatpush3.bf16.msra.mxu1 %v11577_v22 }
 0x74e   :  { %10344 = vmatpush3.bf16.msra.mxu0 %v11577_v22  ;;  %10306 = vmatprep.subr.bf16.mxu1 %v11583_v25 }
 0x74f   :  { %10346 = vmatprep.subr.bf16.mxu0 %v11583_v25 }
 0x751   :  { %10308 = vmatpush3.bf16.msra.mxu1 %v11583_v25 }
 0x752   :  { %10348 = vmatpush3.bf16.msra.mxu0 %v11583_v25  ;;  %10310 = vmatprep.subr.bf16.mxu1 %v11589_v28 }
 0x753   :  { %10350 = vmatprep.subr.bf16.mxu0 %v11589_v28 }
 0x755   :  { %10312 = vmatpush3.bf16.msra.mxu1 %v11589_v28 }
 0x756   :  { %10352 = vmatpush3.bf16.msra.mxu0 %v11589_v28  ;;  %10314 = vmatprep.subr.bf16.mxu1 %v11595_v31 }
 0x757   :  { %10354 = vmatprep.subr.bf16.mxu0 %v11595_v31 }
 0x759   :  { %10316 = vmatpush3.bf16.msra.mxu1 %v11595_v31 }
 0x75a   :  { %10356 = vmatpush3.bf16.msra.mxu0 %v11595_v31  ;;  %10318 = vmatprep.subr.bf16.mxu1 %v11601_v34 }
 0x75b   :  { %10358 = vmatprep.subr.bf16.mxu0 %v11601_v34 }
 0x75d   :  { %10320 = vmatpush3.bf16.msra.mxu1 %v11601_v34 }
 0x75e   :  { %10360 = vmatpush3.bf16.msra.mxu0 %v11601_v34  ;;  %10322 = vmatprep.subr.bf16.mxu1 %v11607_v37 }
 0x75f   :  { %10362 = vmatprep.subr.bf16.mxu0 %v11607_v37 }
 0x761   :  { %10324 = vmatpush3.bf16.msra.mxu1 %v11607_v37 }
 0x762   :  { %10364 = vmatpush3.bf16.msra.mxu0 %v11607_v37  ;;  %10366 = vmatprep.subr.bf16.mxu1 %v10365_v13 }
 0x763   :  { %10406 = vmatprep.subr.bf16.mxu0 %v10405_v56 }
 0x80f   :  { %v8494_v5 = vpop.f32.mrb[30].mxu1 }
 0x810   :  { %v2561_v9 = vsub.f32 %v8494_v5, %v12082_v4  ;;  %v2541_v54 = vpop.f32.mrb[31].mxu1  ;;  %v12232_v10 = vpop.f32.mrb[30].mxu0  ;;  %v3073_v4 = vmul.f32 %v12165_v52, %v12165_v52 }
 0x811   :  { %v2560_v29 = vsub.f32 %v2541_v54, %v12088_v14  ;;  %v12236_v30 = vpop.f32.mrb[31].mxu0  ;;  %v3227_v14 = vmul.f32 %v12165_v52, %v12104_v26  ;;  %v12288_v52 = vld [vmem:[#allocation2 + $0x80] sm:$0xff] }
 0x812   :  { %v2567_v33 = vmul.f32 2.0, %v2561_v9  ;;  %v10369_v55 = vpack.c.bf16 %v3073_v4, %v3072_v39  ;;  %v10445_v3 = vpack.c.bf16 %v12290_v62, %v12288_v52  ;;  %v12306_v57 = vmul.f32 %v12236_v30, %v12236_v30 }
 0x813   :  { %v2566_v35 = vmul.f32 2.0, %v2560_v29  ;;  %v10409_v46 = vpack.c.bf16 %v3227_v14, %v3226_v40  ;;  %v3744_v14 = vmul.f32 %v12288_v52, %v12288_v52 }
 0x814   :  { %v2569_v7 = vadd.f32 0.0009, %v2567_v33 }
 0x815   :  { %v2568_v18 = vadd.f32 0.0009, %v2566_v35  ;;  %v12336_v35 = vld [vmem:[#allocation2 + $0x98] sm:$0xff] }
 0x816   :  { %v2571_v41 = vmul.f32 %v2569_v7, %v2565_v36  ;;  %v12338_v36 = vld [vmem:[#allocation5 + $0x90] sm:$0xff] }
 0x817   :  { %v2570_v43 = vmul.f32 %v2568_v18, %v2564_v11  ;;  %v8551_v44 = vpop.f32.mrb[32].mxu1  ;;  %v10449_v11 = vpack.c.bf16 %v12336_v35, %v12334_v6 }
 0x818   :  { %v8597_v49 = vpop.f32.mrb[32].mxu0  ;;  %v2832_v50 = vpop.f32.mrb[33].mxu1  ;;  %v2591_v16 = vmul.f32 %v2589_v42, %v2571_v41  ;;  %v3745_v41 = vmul.f32 %v12290_v62, %v12290_v62  ;;  %v3898_v42 = vmul.f32 %v12292_v63, %v12292_v63 }
 0x819   :  { %v2986_v17 = vpop.f32.mrb[33].mxu0  ;;  %8584 = vmatprep.mubr.f32.mxu1 %v2832_v50  ;;  %v2590_v60 = vmul.f32 %v2588_v48, %v2570_v43  ;;  %v3899_v43 = vmul.f32 %v12296_v47, %v12296_v47 }
 0x81a   :  { %8630 = vmatprep.mubr.f32.mxu0 %v2986_v17  ;;  %8585 = vmatmul.mubr.f32.vlgmr.msra.gmra.mrb[34].mxu1 %v8551_v44  ;;  %v2593_v23 = vmul.f32 %v11850_v45, %v2591_v16  ;;  %v10525_v44 = vpack.c.bf16 %v3745_v41, %v3744_v14 }
 0x81b   :  { %8631 = vmatmul.mubr.f32.vlgmr.msra.gmra.mrb[34].mxu0 %v8597_v49  ;;  %10368 = vmatpush3.bf16.msra.mxu1 %v10365_v13  ;;  %v2592_v26 = vmul.f32 %v11850_v45, %v2590_v60  ;;  %v10565_v48 = vpack.c.bf16 %v3899_v43, %v3898_v42 }
 0x81c   :  { %10408 = vmatpush3.bf16.msra.mxu0 %v10405_v56  ;;  %10370 = vmatprep.subr.bf16.mxu1 %v10369_v55  ;;  %v12302_v56 = vmul.f32 %v12232_v10, %v12232_v10 }
 0x81d   :  { %10410 = vmatprep.subr.bf16.mxu0 %v10409_v46  ;;  %8641 = vmatprep.mubr.msk.f32.mxu1 %vm125_vm0, %v12022_v0  ;;  %v2594_v51 = vadd.f32 %v2593_v23, %v2592_v26 }
 0x81e   :  { %8687 = vmatprep.mubr.msk.f32.mxu0 %vm125_vm0, %v12022_v0 }
 0x81f   :  { %10372 = vmatpush3.bf16.msra.mxu1 %v10369_v55  ;;  %2595 = vadd.xlane.f32.xlu1 %v2594_v51 }
 0x820   :  { %10412 = vmatpush3.bf16.msra.mxu0 %v10409_v46  ;;  %10374 = vmatprep.subr.bf16.mxu1 %v11560_v15 }
 0x821   :  { %10414 = vmatprep.subr.bf16.mxu0 %v11560_v15 }
 0x822   :  { %8642 = vmatmul.mubr.msk.f32.vlgmr.msra.gmra.mrb[36].mxu1 %vm125_vm0, %v12030_v38 }
 0x823   :  { %8688 = vmatmul.mubr.msk.f32.vlgmr.msra.gmra.mrb[36].mxu0 %vm125_vm0, %v12030_v38  ;;  %10376 = vmatpush3.bf16.msra.mxu1 %v11560_v15 }
 0x824   :  { %10416 = vmatpush3.bf16.msra.mxu0 %v11560_v15  ;;  %10378 = vmatprep.subr.bf16.mxu1 %v11567_v19 }
 0x825   :  { %10418 = vmatprep.subr.bf16.mxu0 %v11567_v19 }
 0x827   :  { %10380 = vmatpush3.bf16.msra.mxu1 %v11567_v19 }
 0x828   :  { %10420 = vmatpush3.bf16.msra.mxu0 %v11567_v19  ;;  %10382 = vmatprep.subr.bf16.mxu1 %v11577_v22 }
 0x829   :  { %10422 = vmatprep.subr.bf16.mxu0 %v11577_v22 }
 0x82b   :  { %10384 = vmatpush3.bf16.msra.mxu1 %v11577_v22 }
 0x82c   :  { %10424 = vmatpush3.bf16.msra.mxu0 %v11577_v22  ;;  %10386 = vmatprep.subr.bf16.mxu1 %v11583_v25 }
 0x82d   :  { %10426 = vmatprep.subr.bf16.mxu0 %v11583_v25 }
 0x82f   :  { %10388 = vmatpush3.bf16.msra.mxu1 %v11583_v25 }
 0x830   :  { %10428 = vmatpush3.bf16.msra.mxu0 %v11583_v25  ;;  %10390 = vmatprep.subr.bf16.mxu1 %v11589_v28 }
 0x831   :  { %10430 = vmatprep.subr.bf16.mxu0 %v11589_v28 }
 0x833   :  { %10392 = vmatpush3.bf16.msra.mxu1 %v11589_v28 }
 0x834   :  { %10432 = vmatpush3.bf16.msra.mxu0 %v11589_v28  ;;  %10394 = vmatprep.subr.bf16.mxu1 %v11595_v31 }
 0x835   :  { %10434 = vmatprep.subr.bf16.mxu0 %v11595_v31 }
 0x837   :  { %10396 = vmatpush3.bf16.msra.mxu1 %v11595_v31 }
 0x838   :  { %10436 = vmatpush3.bf16.msra.mxu0 %v11595_v31  ;;  %10398 = vmatprep.subr.bf16.mxu1 %v11601_v34 }
 0x839   :  { %10438 = vmatprep.subr.bf16.mxu0 %v11601_v34 }
 0x83b   :  { %10400 = vmatpush3.bf16.msra.mxu1 %v11601_v34 }
 0x83c   :  { %10440 = vmatpush3.bf16.msra.mxu0 %v11601_v34  ;;  %10402 = vmatprep.subr.bf16.mxu1 %v11607_v37 }
 0x83d   :  { %10442 = vmatprep.subr.bf16.mxu0 %v11607_v37 }
 0x83f   :  { %10404 = vmatpush3.bf16.msra.mxu1 %v11607_v37 }
 0x840   :  { %10444 = vmatpush3.bf16.msra.mxu0 %v11607_v37  ;;  %10446 = vmatprep.subr.bf16.mxu1 %v10445_v3 }
 0x841   :  { %10486 = vmatprep.subr.bf16.mxu0 %v10485_v59 }
 0x8ac   :  { %v2596_v58 = vpop.xlane.xlu1 %2595 }
 0x8ad   :  { %v2597_v61 = vrot.slane %v2596_v58, 4 }
 0x8af   :  { %v2598_v1 = vadd.f32 %v2597_v61, %v2596_v58 }
 0x8b1   :  { %v2599_v2 = vrot.slane %v2598_v1, 2 }
 0x8b3   :  { %v2600_v8 = vadd.f32 %v2599_v2, %v2598_v1 }
 0x8b5   :  { %v2601_v12 = vrot.slane %v2600_v8, 1 }
 0x8b7   :  { %v2602_v13 = vadd.f32 %v2601_v12, %v2600_v8 }
 0x8b9   :  { %11249 = vpush %v2602_v13  ;;  %v3746_v13 = vmul.f32 %v12334_v6, %v12334_v6 }
 0x8ea   :  { %s11250_s28 = spop %11249 }
 0x8ed   :  { %v8586_v21 = vpop.f32.mrb[34].mxu1 }
 0x8ee   :  { %v12308_v20 = vmul.f32 %v8586_v21, %v8586_v21  ;;  %v12311_v27 = vmul.f32 %v8586_v21, %v12232_v10  ;;  %v12313_v5 = vpop.f32.mrb[34].mxu0  ;;  %v2907_v53 = vpop.f32.mrb[35].mxu1 }
 0x8ef   :  { %v3385_v9 = vsub.f32 %v12313_v5, %v12302_v56  ;;  %v12317_v54 = vmul.f32 %v2907_v53, %v2907_v53  ;;  %v12320_v24 = vmul.f32 %v2907_v53, %v12236_v30  ;;  %v12322_v29 = vpop.f32.mrb[35].mxu0  ;;  %v12340_v30 = vld [vmem:[#allocation5 + $0x98] sm:$0xff] }
 0x8f0   :  { %v12326_v32 = vadd.f32 %v12308_v20, %v12302_v56  ;;  %v3384_v10 = vsub.f32 %v12322_v29, %v12306_v57  ;;  %v10489_v40 = vpack.c.bf16 %v12340_v30, %v12338_v36  ;;  %v3391_v49 = vmul.f32 2.0, %v12311_v27 }
 0x8f1   :  { %v12332_v33 = vadd.f32 %v12317_v54, %v12306_v57  ;;  %v3390_v51 = vmul.f32 2.0, %v12320_v24  ;;  %v3747_v56 = vmul.f32 %v12336_v35, %v12336_v35  ;;  %v3901_v5 = vmul.f32 %v12340_v30, %v12340_v30 }
 0x8f2   :  { %v3393_v26 = vadd.f32 0.0001, %v3391_v49  ;;  %v3403_v58 = vadd.f32 0.0001, %v12326_v32 }
 0x8f3   :  { %v3402_v61 = vadd.f32 0.0001, %v12332_v33  ;;  %v3392_v53 = vadd.f32 0.0001, %v3390_v51 }
 0x8f5   :  { %v8643_v7 = vpop.f32.mrb[36].mxu1 }
 0x8f6   :  { %v8689_v39 = vpop.f32.mrb[36].mxu0  ;;  %v3140_v4 = vpop.f32.mrb[37].mxu1 }
 0x8f7   :  { %v3294_v18 = vpop.f32.mrb[37].mxu0  ;;  %8676 = vmatprep.mubr.f32.mxu1 %v3140_v4 }
 0x8f8   :  { %8722 = vmatprep.mubr.f32.mxu0 %v3294_v18  ;;  %8677 = vmatmul.mubr.f32.vlgmr.msra.gmra.mrb[38].mxu1 %v8643_v7  ;;  %v10529_v7 = vpack.c.bf16 %v3747_v56, %v3746_v13 }
 0x8f9   :  { %8723 = vmatmul.mubr.f32.vlgmr.msra.gmra.mrb[38].mxu0 %v8689_v39  ;;  %10448 = vmatpush3.bf16.msra.mxu1 %v10445_v3 }
 0x8fa   :  { %10488 = vmatpush3.bf16.msra.mxu0 %v10485_v59  ;;  %10450 = vmatprep.subr.bf16.mxu1 %v10449_v11 }
 0x8fb   :  { %10490 = vmatprep.subr.bf16.mxu0 %v10489_v40  ;;  %8733 = vmatprep.mubr.msk.f32.mxu1 %vm125_vm0, %v12022_v0 }
 0x8fc   :  { %8779 = vmatprep.mubr.msk.f32.mxu0 %vm125_vm0, %v12022_v0 }
 0x8fd   :  { %10452 = vmatpush3.bf16.msra.mxu1 %v10449_v11 }
 0x8fe   :  { %10492 = vmatpush3.bf16.msra.mxu0 %v10489_v40  ;;  %10454 = vmatprep.subr.bf16.mxu1 %v11560_v15 }
 0x8ff   :  { %10494 = vmatprep.subr.bf16.mxu0 %v11560_v15 }
 0x900   :  { %8734 = vmatmul.mubr.msk.f32.vlgmr.msra.gmra.mrb[40].mxu1 %vm125_vm0, %v12030_v38 }
 0x901   :  { %8780 = vmatmul.mubr.msk.f32.vlgmr.msra.gmra.mrb[40].mxu0 %vm125_vm0, %v12030_v38  ;;  %10456 = vmatpush3.bf16.msra.mxu1 %v11560_v15 }
 0x902   :  { %10496 = vmatpush3.bf16.msra.mxu0 %v11560_v15  ;;  %10458 = vmatprep.subr.bf16.mxu1 %v11567_v19 }
 0x903   :  { %10498 = vmatprep.subr.bf16.mxu0 %v11567_v19 }
 0x905   :  { %10460 = vmatpush3.bf16.msra.mxu1 %v11567_v19 }
 0x906   :  { %10500 = vmatpush3.bf16.msra.mxu0 %v11567_v19  ;;  %10462 = vmatprep.subr.bf16.mxu1 %v11577_v22 }
 0x907   :  { %10502 = vmatprep.subr.bf16.mxu0 %v11577_v22 }
 0x909   :  { %10464 = vmatpush3.bf16.msra.mxu1 %v11577_v22 }
 0x90a   :  { %10504 = vmatpush3.bf16.msra.mxu0 %v11577_v22  ;;  %10466 = vmatprep.subr.bf16.mxu1 %v11583_v25 }
 0x90b   :  { %10506 = vmatprep.subr.bf16.mxu0 %v11583_v25 }
 0x90d   :  { %10468 = vmatpush3.bf16.msra.mxu1 %v11583_v25 }
 0x90e   :  { %10508 = vmatpush3.bf16.msra.mxu0 %v11583_v25  ;;  %10470 = vmatprep.subr.bf16.mxu1 %v11589_v28 }
 0x90f   :  { %10510 = vmatprep.subr.bf16.mxu0 %v11589_v28 }
 0x911   :  { %10472 = vmatpush3.bf16.msra.mxu1 %v11589_v28 }
 0x912   :  { %10512 = vmatpush3.bf16.msra.mxu0 %v11589_v28  ;;  %10474 = vmatprep.subr.bf16.mxu1 %v11595_v31 }
 0x913   :  { %10514 = vmatprep.subr.bf16.mxu0 %v11595_v31 }
 0x915   :  { %10476 = vmatpush3.bf16.msra.mxu1 %v11595_v31 }
 0x916   :  { %10516 = vmatpush3.bf16.msra.mxu0 %v11595_v31  ;;  %10478 = vmatprep.subr.bf16.mxu1 %v11601_v34 }
 0x917   :  { %10518 = vmatprep.subr.bf16.mxu0 %v11601_v34 }
 0x919   :  { %10480 = vmatpush3.bf16.msra.mxu1 %v11601_v34 }
 0x91a   :  { %10520 = vmatpush3.bf16.msra.mxu0 %v11601_v34  ;;  %10482 = vmatprep.subr.bf16.mxu1 %v11607_v37 }
 0x91b   :  { %10522 = vmatprep.subr.bf16.mxu0 %v11607_v37 }
 0x91d   :  { %10484 = vmatpush3.bf16.msra.mxu1 %v11607_v37 }
 0x91e   :  { %10524 = vmatpush3.bf16.msra.mxu0 %v11607_v37  ;;  %10526 = vmatprep.subr.bf16.mxu1 %v10525_v44 }
 0x91f   :  { %10566 = vmatprep.subr.bf16.mxu0 %v10565_v48 }
 0x9cb   :  { %v8678_v50 = vpop.f32.mrb[38].mxu1 }
 0x9cc   :  { %v3387_v55 = vsub.f32 %v8678_v50, %v12308_v20  ;;  %v8724_v16 = vpop.f32.mrb[38].mxu0  ;;  %v3215_v17 = vpop.f32.mrb[39].mxu1 }
 0x9cd   :  { %v3389_v46 = vsub.f32 %v8724_v16, %v12311_v27  ;;  %v3386_v60 = vsub.f32 %v3215_v17, %v12317_v54  ;;  %v3369_v23 = vpop.f32.mrb[39].mxu0  ;;  %v3900_v27 = vmul.f32 %v12338_v36, %v12338_v36  ;;  %v4053_v16 = vmul.f32 %v12296_v47, %v12290_v62  ;;  %v12462_v17 = vld [vmem:[#allocation2 + $0xa0] sm:$0xff] }
 0x9ce   :  { %v3405_v3 = vadd.f32 %v3387_v55, %v3385_v9  ;;  %v3388_v59 = vsub.f32 %v3369_v23, %v12320_v24  ;;  %v4052_v55 = vmul.f32 %v12292_v63, %v12288_v52 }
 0x9cf   :  { %v3395_v1 = vmul.f32 2.0, %v3389_v46  ;;  %v3404_v2 = vadd.f32 %v3386_v60, %v3384_v10  ;;  %v10569_v4 = vpack.c.bf16 %v3901_v5, %v3900_v27  ;;  %v12464_v46 = vld [vmem:[#allocation2 + $0xa8] sm:$0xff]  ;;  %v4054_v5 = vmul.f32 %v12338_v36, %v12334_v6  ;;  %v12498_v6 = vld [vmem:[#allocation7] sm:$0xff] }
 0x9d0   :  { %v3407_v8 = vadd.f32 0.0009, %v3405_v3  ;;  %v3394_v12 = vmul.f32 2.0, %v3388_v59  ;;  %v10605_v60 = vpack.c.bf16 %v4053_v16, %v4052_v55  ;;  %v10645_v23 = vpack.c.bf16 %v12464_v46, %v12462_v17  ;;  %v12557_v55 = vld [vmem:[#allocation5 + $0xb0] sm:$0xff]  ;;  %v12559_v16 = vld [vmem:[#allocation5 + $0xb8] sm:$0xff] }
 0x9d1   :  { %v3397_v21 = vadd.f32 0.0009, %v3395_v1  ;;  %v3406_v20 = vadd.f32 0.0009, %v3404_v2  ;;  %v4572_v36 = vmul.f32 %v12462_v17, %v12462_v17 }
 0x9d2   :  { %v3409_v9 = vmul.f32 %v3407_v8, %v3403_v58  ;;  %v3396_v57 = vadd.f32 0.0009, %v3394_v12 }
 0x9d3   :  { %v3399_v54 = vmul.f32 %v3397_v21, %v3393_v26  ;;  %v3408_v24 = vmul.f32 %v3406_v20, %v3402_v61  ;;  %v8735_v29 = vpop.f32.mrb[40].mxu1 }
 0x9d4   :  { %11281 = vrcp.f32 %v3409_v9  ;;  %v3398_v32 = vmul.f32 %v3396_v57, %v3392_v53  ;;  %v8781_v10 = vpop.f32.mrb[40].mxu0  ;;  %v3510_v33 = vpop.f32.mrb[41].mxu1  ;;  %v4055_v53 = vmul.f32 %v12340_v30, %v12336_v35  ;;  %v12494_v57 = vld [vmem:[#allocation2 + $0xb8] sm:$0xff]  ;;  %v12506_v35 = vld [vmem:[#allocation7 + $0x8] sm:$0xff]  ;;  %v4573_v30 = vmul.f32 %v12464_v46, %v12464_v46 }
 0x9d5   :  { %11283 = vrcp.f32 %v3408_v24  ;;  %v3660_v39 = vpop.f32.mrb[41].mxu0  ;;  %8768 = vmatprep.mubr.f32.mxu1 %v3510_v33 }
 0x9d6   :  { %8814 = vmatprep.mubr.f32.mxu0 %v3660_v39  ;;  %8769 = vmatmul.mubr.f32.vlgmr.msra.gmra.mrb[42].mxu1 %v8735_v29  ;;  %v12548_v39 = vld [vmem:[#allocation5 + $0xa8] sm:$0xff] }
 0x9d7   :  { %8815 = vmatmul.mubr.f32.vlgmr.msra.gmra.mrb[42].mxu0 %v8781_v10  ;;  %10528 = vmatpush3.bf16.msra.mxu1 %v10525_v44 }
 0x9d8   :  { %10568 = vmatpush3.bf16.msra.mxu0 %v10565_v48  ;;  %10530 = vmatprep.subr.bf16.mxu1 %v10529_v7 }
 0x9d9   :  { %10570 = vmatprep.subr.bf16.mxu0 %v10569_v4  ;;  %8825 = vmatprep.mubr.msk.f32.mxu1 %vm125_vm0, %v12022_v0 }
 0x9da   :  { %8871 = vmatprep.mubr.msk.f32.mxu0 %vm125_vm0, %v12022_v0 }
 0x9db   :  { %10532 = vmatpush3.bf16.msra.mxu1 %v10529_v7  ;;  %v12546_v7 = vld [vmem:[#allocation5 + $0xa0] sm:$0xff] }
 0x9dc   :  { %10572 = vmatpush3.bf16.msra.mxu0 %v10569_v4  ;;  %10534 = vmatprep.subr.bf16.mxu1 %v11560_v15  ;;  %v10685_v4 = vpack.c.bf16 %v12548_v39, %v12546_v7 }
 0x9dd   :  { %10574 = vmatprep.subr.bf16.mxu0 %v11560_v15 }
 0x9de   :  { %v11282_v11 = vpop.eup %11281  ;;  %8826 = vmatmul.mubr.msk.f32.vlgmr.msra.gmra.mrb[44].mxu1 %vm125_vm0, %v12030_v38 }
 0x9df   :  { %v11284_v18 = vpop.eup %11283  ;;  %v3413_v40 = vmul.f32 %v11282_v11, %v3409_v9  ;;  %8872 = vmatmul.mubr.msk.f32.vlgmr.msra.gmra.mrb[44].mxu0 %vm125_vm0, %v12030_v38  ;;  %10536 = vmatpush3.bf16.msra.mxu1 %v11560_v15  ;;  %v12492_v9 = vld [vmem:[#allocation2 + $0xb0] sm:$0xff] }
 0x9e0   :  { %v3412_v14 = vmul.f32 %v11284_v18, %v3408_v24  ;;  %10576 = vmatpush3.bf16.msra.mxu0 %v11560_v15  ;;  %10538 = vmatprep.subr.bf16.mxu1 %v11567_v19  ;;  %v10649_v33 = vpack.c.bf16 %v12494_v57, %v12492_v9 }
 0x9e1   :  { %v3415_v0 = vsub.f32 2.0, %v3413_v40  ;;  %10578 = vmatprep.subr.bf16.mxu0 %v11567_v19 }
 0x9e2   :  { %v3414_v41 = vsub.f32 2.0, %v3412_v14 }
 0x9e3   :  { %v3417_v42 = vmul.f32 %v11282_v11, %v3415_v0  ;;  %10540 = vmatpush3.bf16.msra.mxu1 %v11567_v19  ;;  %v10725_v11 = vpack.c.bf16 %v4573_v30, %v4572_v36 }
 0x9e4   :  { %v3416_v43 = vmul.f32 %v11284_v18, %v3414_v41  ;;  %10580 = vmatpush3.bf16.msra.mxu0 %v11567_v19  ;;  %10542 = vmatprep.subr.bf16.mxu1 %v11577_v22 }
 0x9e5   :  { %v3419_v38 = vmul.f32 %v3417_v42, %v3399_v54  ;;  %10582 = vmatprep.subr.bf16.mxu0 %v11577_v22 }
 0x9e6   :  { %v3418_v44 = vmul.f32 %v3416_v43, %v3398_v32  ;;  %v10609_v32 = vpack.c.bf16 %v4055_v53, %v4054_v5 }
 0x9e7   :  { %v3421_v48 = vmul.f32 %v11850_v45, %v3419_v38  ;;  %10544 = vmatpush3.bf16.msra.mxu1 %v11577_v22 }
 0x9e8   :  { %v3420_v49 = vmul.f32 %v11850_v45, %v3418_v44  ;;  %10584 = vmatpush3.bf16.msra.mxu0 %v11577_v22  ;;  %10546 = vmatprep.subr.bf16.mxu1 %v11583_v25 }
 0x9e9   :  { %10586 = vmatprep.subr.bf16.mxu0 %v11583_v25 }
 0x9ea   :  { %v3422_v50 = vadd.f32 %v3421_v48, %v3420_v49 }
 0x9eb   :  { %10548 = vmatpush3.bf16.msra.mxu1 %v11583_v25 }
 0x9ec   :  { %3423 = vadd.xlane.f32.xlu1 %v3422_v50  ;;  %10588 = vmatpush3.bf16.msra.mxu0 %v11583_v25 }
 0x9ed   :  { %10550 = vmatprep.subr.bf16.mxu1 %v11589_v28  ;;  %10590 = vmatprep.subr.bf16.mxu0 %v11589_v28 }
 0x9ef   :  { %10552 = vmatpush3.bf16.msra.mxu1 %v11589_v28 }
 0x9f0   :  { %10592 = vmatpush3.bf16.msra.mxu0 %v11589_v28  ;;  %10554 = vmatprep.subr.bf16.mxu1 %v11595_v31 }
 0x9f1   :  { %10594 = vmatprep.subr.bf16.mxu0 %v11595_v31 }
 0x9f3   :  { %10556 = vmatpush3.bf16.msra.mxu1 %v11595_v31 }
 0x9f4   :  { %10596 = vmatpush3.bf16.msra.mxu0 %v11595_v31  ;;  %10558 = vmatprep.subr.bf16.mxu1 %v11601_v34 }
 0x9f5   :  { %10598 = vmatprep.subr.bf16.mxu0 %v11601_v34 }
 0x9f7   :  { %10560 = vmatpush3.bf16.msra.mxu1 %v11601_v34 }
 0x9f8   :  { %10600 = vmatpush3.bf16.msra.mxu0 %v11601_v34  ;;  %10562 = vmatprep.subr.bf16.mxu1 %v11607_v37 }
 0x9f9   :  { %10602 = vmatprep.subr.bf16.mxu0 %v11607_v37 }
 0x9fb   :  { %10564 = vmatpush3.bf16.msra.mxu1 %v11607_v37 }
 0x9fc   :  { %10604 = vmatpush3.bf16.msra.mxu0 %v11607_v37  ;;  %10606 = vmatprep.subr.bf16.mxu1 %v10605_v60 }
 0x9fd   :  { %10646 = vmatprep.subr.bf16.mxu0 %v10645_v23 }
 0xa79   :  { %v3424_v26 = vpop.xlane.xlu1 %3423 }
 0xa7a   :  { %v3425_v51 = vrot.slane %v3424_v26, 4 }
 0xa7c   :  { %v3426_v3 = vadd.f32 %v3425_v51, %v3424_v26 }
 0xa7e   :  { %v3427_v59 = vrot.slane %v3426_v3, 2 }
 0xa80   :  { %v3428_v58 = vadd.f32 %v3427_v59, %v3426_v3 }
 0xa82   :  { %v3429_v61 = vrot.slane %v3428_v58, 1 }
 0xa84   :  { %v3430_v52 = vadd.f32 %v3429_v61, %v3428_v58 }
 0xa86   :  { %11251 = vpush %v3430_v52 }
 0xaa9   :  { %v8770_v63 = vpop.f32.mrb[42].mxu1 }
 0xaaa   :  { %v12468_v62 = vmul.f32 %v8770_v63, %v8770_v63  ;;  %v8816_v47 = vpop.f32.mrb[42].mxu0  ;;  %v3585_v1 = vpop.f32.mrb[43].mxu1 }
 0xaab   :  { %v12470_v2 = vmul.f32 %v8816_v47, %v8816_v47  ;;  %v12472_v8 = vmul.f32 %v8816_v47, %v8770_v63  ;;  %v12474_v12 = vmul.f32 %v3585_v1, %v3585_v1  ;;  %v3735_v13 = vpop.f32.mrb[43].mxu0  ;;  %v10689_v63 = vpack.c.bf16 %v12559_v16, %v12557_v55 }
 0xaac   :  { %v12476_v56 = vmul.f32 %v3735_v13, %v3735_v13  ;;  %v12478_v21 = vmul.f32 %v3735_v13, %v3585_v1  ;;  %v4726_v1 = vmul.f32 %v12546_v7, %v12546_v7  ;;  %v4881_v13 = vmul.f32 %v12548_v39, %v12464_v46 }
 0xaad   :  { %v12482_v20 = vadd.f32 %v12470_v2, %v12468_v62 }
 0xaae   :  { %v12486_v27 = vadd.f32 %v12476_v56, %v12474_v12 }
 0xaaf   :  { %v4231_v49 = vadd.f32 0.0001, %v12482_v20 }
 0xab0   :  { %v4230_v26 = vadd.f32 0.0001, %v12486_v27 }
 0xab1   :  { %v8827_v54 = vpop.f32.mrb[44].mxu1 }
 0xab2   :  { %v8873_v24 = vpop.f32.mrb[44].mxu0  ;;  %v3814_v29 = vpop.f32.mrb[45].mxu1 }
 0xab3   :  { %v3968_v10 = vpop.f32.mrb[45].mxu0  ;;  %8860 = vmatprep.mubr.f32.mxu1 %v3814_v29 }
 0xab4   :  { %8906 = vmatprep.mubr.f32.mxu0 %v3968_v10  ;;  %8861 = vmatmul.mubr.f32.vlgmr.msra.gmra.mrb[46].mxu1 %v8827_v54  ;;  %v4218_v10 = vmul.f32 2.0, %v12478_v21 }
 0xab5   :  { %8907 = vmatmul.mubr.f32.vlgmr.msra.gmra.mrb[46].mxu0 %v8873_v24  ;;  %10608 = vmatpush3.bf16.msra.mxu1 %v10605_v60  ;;  %v4574_v60 = vmul.f32 %v12492_v9, %v12492_v9 }
 0xab6   :  { %10648 = vmatpush3.bf16.msra.mxu0 %v10645_v23  ;;  %10610 = vmatprep.subr.bf16.mxu1 %v10609_v32  ;;  %v4575_v23 = vmul.f32 %v12494_v57, %v12494_v57 }
 0xab7   :  { %10650 = vmatprep.subr.bf16.mxu0 %v10649_v33  ;;  %8917 = vmatprep.mubr.msk.f32.mxu1 %vm125_vm0, %v12498_v6  ;;  %s11252_s12 = spop %11251 }
 0xab8   :  { %8963 = vmatprep.mubr.msk.f32.mxu0 %vm125_vm0, %v12498_v6  ;;  %v10729_v47 = vpack.c.bf16 %v4575_v23, %v4574_v60 }
 0xab9   :  { %10612 = vmatpush3.bf16.msra.mxu1 %v10609_v32 }
 0xaba   :  { %10652 = vmatpush3.bf16.msra.mxu0 %v10649_v33  ;;  %10614 = vmatprep.subr.bf16.mxu1 %v11560_v15 }
 0xabb   :  { %10654 = vmatprep.subr.bf16.mxu0 %v11560_v15 }
 0xabc   :  { %8918 = vmatmul.mubr.msk.f32.vlgmr.msra.gmra.mrb[48].mxu1 %vm125_vm0, %v12506_v35 }
 0xabd   :  { %8964 = vmatmul.mubr.msk.f32.vlgmr.msra.gmra.mrb[48].mxu0 %vm125_vm0, %v12506_v35  ;;  %10616 = vmatpush3.bf16.msra.mxu1 %v11560_v15 }
 0xabe   :  { %10656 = vmatpush3.bf16.msra.mxu0 %v11560_v15  ;;  %10618 = vmatprep.subr.bf16.mxu1 %v11567_v19 }
 0xabf   :  { %10658 = vmatprep.subr.bf16.mxu0 %v11567_v19 }
 0xac1   :  { %10620 = vmatpush3.bf16.msra.mxu1 %v11567_v19 }
 0xac2   :  { %10660 = vmatpush3.bf16.msra.mxu0 %v11567_v19  ;;  %10622 = vmatprep.subr.bf16.mxu1 %v11577_v22 }
 0xac3   :  { %10662 = vmatprep.subr.bf16.mxu0 %v11577_v22 }
 0xac5   :  { %10624 = vmatpush3.bf16.msra.mxu1 %v11577_v22 }
 0xac6   :  { %10664 = vmatpush3.bf16.msra.mxu0 %v11577_v22  ;;  %10626 = vmatprep.subr.bf16.mxu1 %v11583_v25 }
 0xac7   :  { %10666 = vmatprep.subr.bf16.mxu0 %v11583_v25 }
 0xac9   :  { %10628 = vmatpush3.bf16.msra.mxu1 %v11583_v25 }
 0xaca   :  { %10668 = vmatpush3.bf16.msra.mxu0 %v11583_v25  ;;  %10630 = vmatprep.subr.bf16.mxu1 %v11589_v28 }
 0xacb   :  { %10670 = vmatprep.subr.bf16.mxu0 %v11589_v28 }
 0xacd   :  { %10632 = vmatpush3.bf16.msra.mxu1 %v11589_v28 }
 0xace   :  { %10672 = vmatpush3.bf16.msra.mxu0 %v11589_v28  ;;  %10634 = vmatprep.subr.bf16.mxu1 %v11595_v31 }
 0xacf   :  { %10674 = vmatprep.subr.bf16.mxu0 %v11595_v31 }
 0xad1   :  { %10636 = vmatpush3.bf16.msra.mxu1 %v11595_v31 }
 0xad2   :  { %10676 = vmatpush3.bf16.msra.mxu0 %v11595_v31  ;;  %10638 = vmatprep.subr.bf16.mxu1 %v11601_v34 }
 0xad3   :  { %10678 = vmatprep.subr.bf16.mxu0 %v11601_v34 }
 0xad5   :  { %10640 = vmatpush3.bf16.msra.mxu1 %v11601_v34 }
 0xad6   :  { %10680 = vmatpush3.bf16.msra.mxu0 %v11601_v34  ;;  %10642 = vmatprep.subr.bf16.mxu1 %v11607_v37 }
 0xad7   :  { %10682 = vmatprep.subr.bf16.mxu0 %v11607_v37 }
 0xad9   :  { %10644 = vmatpush3.bf16.msra.mxu1 %v11607_v37 }
 0xada   :  { %10684 = vmatpush3.bf16.msra.mxu0 %v11607_v37  ;;  %10686 = vmatprep.subr.bf16.mxu1 %v10685_v4 }
 0xadb   :  { %10726 = vmatprep.subr.bf16.mxu0 %v10725_v11 }
 0xb87   :  { %v8862_v18 = vpop.f32.mrb[46].mxu1 }
 0xb88   :  { %v4213_v40 = vsub.f32 %v8862_v18, %v12468_v62  ;;  %v8908_v14 = vpop.f32.mrb[46].mxu0  ;;  %v3889_v0 = vpop.f32.mrb[47].mxu1 }
 0xb89   :  { %v4215_v41 = vsub.f32 %v8908_v14, %v12470_v2  ;;  %v4212_v42 = vsub.f32 %v3889_v0, %v12474_v12  ;;  %v4043_v43 = vpop.f32.mrb[47].mxu0  ;;  %v4727_v2 = vmul.f32 %v12548_v39, %v12548_v39  ;;  %v4880_v12 = vmul.f32 %v12546_v7, %v12462_v17 }
 0xb8a   :  { %v4214_v38 = vsub.f32 %v4043_v43, %v12476_v56  ;;  %v4219_v17 = vmul.f32 2.0, %v12472_v8  ;;  %v4220_v14 = vadd.f32 0.0001, %v4218_v10 }
 0xb8b   :  { %v4233_v44 = vadd.f32 %v4215_v41, %v4213_v40  ;;  %v10765_v56 = vpack.c.bf16 %v4727_v2, %v4726_v1  ;;  %v10805_v20 = vpack.c.bf16 %v4881_v13, %v4880_v12  ;;  %v4728_v40 = vmul.f32 %v12557_v55, %v12557_v55 }
 0xb8c   :  { %v4232_v48 = vadd.f32 %v4214_v38, %v4212_v42  ;;  %v4882_v41 = vmul.f32 %v12557_v55, %v12492_v9 }
 0xb8d   :  { %v4235_v50 = vadd.f32 0.0009, %v4233_v44 }
 0xb8e   :  { %v4234_v51 = vadd.f32 0.0009, %v4232_v48 }
 0xb8f   :  { %v12566_v3 = vmul.f32 %v4235_v50, %v4231_v49  ;;  %v8919_v59 = vpop.f32.mrb[48].mxu1 }
 0xb90   :  { %v12568_v58 = vmul.f32 %v4234_v51, %v4230_v26  ;;  %v8965_v61 = vpop.f32.mrb[48].mxu0  ;;  %v4122_v52 = vpop.f32.mrb[49].mxu1 }
 0xb91   :  { %v4338_v62 = vpop.f32.mrb[49].mxu0  ;;  %8952 = vmatprep.mubr.f32.mxu1 %v4122_v52  ;;  %11285 = vrcp.f32 %v12566_v3  ;;  %v12690_v52 = vld [vmem:[#allocation5 + $0xc8] sm:$0xff] }
 0xb92   :  { %8998 = vmatprep.mubr.f32.mxu0 %v4338_v62  ;;  %8953 = vmatmul.mubr.f32.vlgmr.msra.gmra.mrb[50].mxu1 %v8919_v59  ;;  %11287 = vrcp.f32 %v12568_v58  ;;  %v12684_v59 = vld [vmem:[#allocation2 + $0xc8] sm:$0xff] }
 0xb93   :  { %8999 = vmatmul.mubr.f32.vlgmr.msra.gmra.mrb[50].mxu0 %v8965_v61  ;;  %10688 = vmatpush3.bf16.msra.mxu1 %v10685_v4 }
 0xb94   :  { %10728 = vmatpush3.bf16.msra.mxu0 %v10725_v11  ;;  %10690 = vmatprep.subr.bf16.mxu1 %v10689_v63  ;;  %v4221_v11 = vadd.f32 0.0001, %v4219_v17 }
 0xb95   :  { %10730 = vmatprep.subr.bf16.mxu0 %v10729_v47  ;;  %9009 = vmatprep.mubr.msk.f32.mxu1 %vm125_vm0, %v12498_v6 }
 0xb96   :  { %9055 = vmatprep.mubr.msk.f32.mxu0 %vm125_vm0, %v12498_v6 }
 0xb97   :  { %10692 = vmatpush3.bf16.msra.mxu1 %v10689_v63 }
 0xb98   :  { %10732 = vmatpush3.bf16.msra.mxu0 %v10729_v47  ;;  %10694 = vmatprep.subr.bf16.mxu1 %v11560_v15 }
 0xb99   :  { %10734 = vmatprep.subr.bf16.mxu0 %v11560_v15 }
 0xb9a   :  { %9010 = vmatmul.mubr.msk.f32.vlgmr.msra.gmra.mrb[52].mxu1 %vm125_vm0, %v12506_v35 }
 0xb9b   :  { %9056 = vmatmul.mubr.msk.f32.vlgmr.msra.gmra.mrb[52].mxu0 %vm125_vm0, %v12506_v35  ;;  %10696 = vmatpush3.bf16.msra.mxu1 %v11560_v15  ;;  %v11286_v27 = vpop.eup %11285 }
 0xb9c   :  { %10736 = vmatpush3.bf16.msra.mxu0 %v11560_v15  ;;  %10698 = vmatprep.subr.bf16.mxu1 %v11567_v19  ;;  %v11288_v5 = vpop.eup %11287  ;;  %v4241_v53 = vmul.f32 %v11286_v27, %v12566_v3 }
 0xb9d   :  { %10738 = vmatprep.subr.bf16.mxu0 %v11567_v19  ;;  %v4240_v54 = vmul.f32 %v11288_v5, %v12568_v58  ;;  %v12686_v58 = vld [vmem:[#allocation5 + $0xc0] sm:$0xff] }
 0xb9e   :  { %v4243_v30 = vsub.f32 2.0, %v4241_v53  ;;  %v10885_v63 = vpack.c.bf16 %v12690_v52, %v12686_v58 }
 0xb9f   :  { %10700 = vmatpush3.bf16.msra.mxu1 %v11567_v19  ;;  %v4242_v39 = vsub.f32 2.0, %v4240_v54 }
 0xba0   :  { %10740 = vmatpush3.bf16.msra.mxu0 %v11567_v19  ;;  %10702 = vmatprep.subr.bf16.mxu1 %v11577_v22  ;;  %v4245_v43 = vmul.f32 %v11286_v27, %v4243_v30 }
 0xba1   :  { %10742 = vmatprep.subr.bf16.mxu0 %v11577_v22  ;;  %v4244_v48 = vmul.f32 %v11288_v5, %v4242_v39  ;;  %v12728_v39 = vld [vmem:[#allocation2 + $0xd0] sm:$0xff] }
 0xba3   :  { %10704 = vmatpush3.bf16.msra.mxu1 %v11577_v22 }
 0xba4   :  { %10744 = vmatpush3.bf16.msra.mxu0 %v11577_v22  ;;  %10706 = vmatprep.subr.bf16.mxu1 %v11583_v25 }
 0xba5   :  { %10746 = vmatprep.subr.bf16.mxu0 %v11583_v25 }
 0xba7   :  { %10708 = vmatpush3.bf16.msra.mxu1 %v11583_v25 }
 0xba8   :  { %10748 = vmatpush3.bf16.msra.mxu0 %v11583_v25  ;;  %10710 = vmatprep.subr.bf16.mxu1 %v11589_v28 }
 0xba9   :  { %10750 = vmatprep.subr.bf16.mxu0 %v11589_v28 }
 0xbab   :  { %10712 = vmatpush3.bf16.msra.mxu1 %v11589_v28 }
 0xbac   :  { %10752 = vmatpush3.bf16.msra.mxu0 %v11589_v28  ;;  %10714 = vmatprep.subr.bf16.mxu1 %v11595_v31 }
 0xbad   :  { %10754 = vmatprep.subr.bf16.mxu0 %v11595_v31 }
 0xbaf   :  { %10716 = vmatpush3.bf16.msra.mxu1 %v11595_v31 }
 0xbb0   :  { %10756 = vmatpush3.bf16.msra.mxu0 %v11595_v31  ;;  %10718 = vmatprep.subr.bf16.mxu1 %v11601_v34 }
 0xbb1   :  { %10758 = vmatprep.subr.bf16.mxu0 %v11601_v34 }
 0xbb3   :  { %10720 = vmatpush3.bf16.msra.mxu1 %v11601_v34 }
 0xbb4   :  { %10760 = vmatpush3.bf16.msra.mxu0 %v11601_v34  ;;  %10722 = vmatprep.subr.bf16.mxu1 %v11607_v37 }
 0xbb5   :  { %10762 = vmatprep.subr.bf16.mxu0 %v11607_v37 }
 0xbb7   :  { %10724 = vmatpush3.bf16.msra.mxu1 %v11607_v37 }
 0xbb8   :  { %10764 = vmatpush3.bf16.msra.mxu0 %v11607_v37  ;;  %10766 = vmatprep.subr.bf16.mxu1 %v10765_v56 }
 0xbb9   :  { %10806 = vmatprep.subr.bf16.mxu0 %v10805_v20 }
 0xc65   :  { %v8954_v24 = vpop.f32.mrb[50].mxu1 }
 0xc66   :  { %v4217_v29 = vsub.f32 %v8954_v24, %v12472_v8  ;;  %v4197_v46 = vpop.f32.mrb[51].mxu1  ;;  %v12626_v32 = vpop.f32.mrb[50].mxu0  ;;  %v4729_v8 = vmul.f32 %v12559_v16, %v12559_v16 }
 0xc67   :  { %v4216_v33 = vsub.f32 %v4197_v46, %v12478_v21  ;;  %v12630_v36 = vpop.f32.mrb[51].mxu0  ;;  %v4883_v21 = vmul.f32 %v12559_v16, %v12494_v57  ;;  %v12682_v16 = vld [vmem:[#allocation2 + $0xc0] sm:$0xff] }
 0xc68   :  { %v4223_v7 = vmul.f32 2.0, %v4217_v29  ;;  %v10769_v60 = vpack.c.bf16 %v4729_v8, %v4728_v40  ;;  %v10845_v61 = vpack.c.bf16 %v12684_v59, %v12682_v16  ;;  %v12700_v5 = vmul.f32 %v12630_v36, %v12630_v36 }
 0xc69   :  { %v4222_v4 = vmul.f32 2.0, %v4216_v33  ;;  %v10809_v51 = vpack.c.bf16 %v4883_v21, %v4882_v41  ;;  %v5400_v21 = vmul.f32 %v12682_v16, %v12682_v16 }
 0xc6a   :  { %v4225_v18 = vadd.f32 0.0009, %v4223_v7 }
 0xc6b   :  { %v4224_v0 = vadd.f32 0.0009, %v4222_v4  ;;  %v12730_v4 = vld [vmem:[#allocation2 + $0xd8] sm:$0xff] }
 0xc6c   :  { %v4227_v42 = vmul.f32 %v4225_v18, %v4221_v11  ;;  %v12732_v11 = vld [vmem:[#allocation5 + $0xd0] sm:$0xff] }
 0xc6d   :  { %v4226_v38 = vmul.f32 %v4224_v0, %v4220_v14  ;;  %v9011_v44 = vpop.f32.mrb[52].mxu1  ;;  %v10849_v14 = vpack.c.bf16 %v12730_v4, %v12728_v39 }
 0xc6e   :  { %v9057_v49 = vpop.f32.mrb[52].mxu0  ;;  %v4488_v50 = vpop.f32.mrb[53].mxu1  ;;  %v4247_v23 = vmul.f32 %v4245_v43, %v4227_v42  ;;  %v5401_v42 = vmul.f32 %v12684_v59, %v12684_v59  ;;  %v5554_v43 = vmul.f32 %v12686_v58, %v12686_v58 }
 0xc6f   :  { %v4642_v26 = vpop.f32.mrb[53].mxu0  ;;  %9044 = vmatprep.mubr.f32.mxu1 %v4488_v50  ;;  %v4246_v3 = vmul.f32 %v4244_v48, %v4226_v38  ;;  %v5555_v38 = vmul.f32 %v12690_v52, %v12690_v52 }
 0xc70   :  { %9090 = vmatprep.mubr.f32.mxu0 %v4642_v26  ;;  %9045 = vmatmul.mubr.f32.vlgmr.msra.gmra.mrb[54].mxu1 %v9011_v44  ;;  %v4249_v9 = vmul.f32 %v11850_v45, %v4247_v23  ;;  %v10925_v44 = vpack.c.bf16 %v5401_v42, %v5400_v21 }
 0xc71   :  { %9091 = vmatmul.mubr.f32.vlgmr.msra.gmra.mrb[54].mxu0 %v9057_v49  ;;  %10768 = vmatpush3.bf16.msra.mxu1 %v10765_v56  ;;  %v4248_v57 = vmul.f32 %v11850_v45, %v4246_v3  ;;  %v10965_v48 = vpack.c.bf16 %v5555_v38, %v5554_v43 }
 0xc72   :  { %10808 = vmatpush3.bf16.msra.mxu0 %v10805_v20  ;;  %10770 = vmatprep.subr.bf16.mxu1 %v10769_v60  ;;  %v12696_v20 = vmul.f32 %v12626_v32, %v12626_v32 }
 0xc73   :  { %10810 = vmatprep.subr.bf16.mxu0 %v10809_v51  ;;  %9101 = vmatprep.mubr.msk.f32.mxu1 %vm125_vm0, %v12498_v6  ;;  %v4250_v55 = vadd.f32 %v4249_v9, %v4248_v57 }
 0xc74   :  { %9147 = vmatprep.mubr.msk.f32.mxu0 %vm125_vm0, %v12498_v6 }
 0xc75   :  { %10772 = vmatpush3.bf16.msra.mxu1 %v10769_v60  ;;  %4251 = vadd.xlane.f32.xlu0 %v4250_v55 }
 0xc76   :  { %10812 = vmatpush3.bf16.msra.mxu0 %v10809_v51  ;;  %10774 = vmatprep.subr.bf16.mxu1 %v11560_v15 }
 0xc77   :  { %10814 = vmatprep.subr.bf16.mxu0 %v11560_v15 }
 0xc78   :  { %9102 = vmatmul.mubr.msk.f32.vlgmr.msra.gmra.mrb[56].mxu1 %vm125_vm0, %v12506_v35 }
 0xc79   :  { %9148 = vmatmul.mubr.msk.f32.vlgmr.msra.gmra.mrb[56].mxu0 %vm125_vm0, %v12506_v35  ;;  %10776 = vmatpush3.bf16.msra.mxu1 %v11560_v15 }
 0xc7a   :  { %10816 = vmatpush3.bf16.msra.mxu0 %v11560_v15  ;;  %10778 = vmatprep.subr.bf16.mxu1 %v11567_v19 }
 0xc7b   :  { %10818 = vmatprep.subr.bf16.mxu0 %v11567_v19 }
 0xc7d   :  { %10780 = vmatpush3.bf16.msra.mxu1 %v11567_v19 }
 0xc7e   :  { %10820 = vmatpush3.bf16.msra.mxu0 %v11567_v19  ;;  %10782 = vmatprep.subr.bf16.mxu1 %v11577_v22 }
 0xc7f   :  { %10822 = vmatprep.subr.bf16.mxu0 %v11577_v22 }
 0xc81   :  { %10784 = vmatpush3.bf16.msra.mxu1 %v11577_v22 }
 0xc82   :  { %10824 = vmatpush3.bf16.msra.mxu0 %v11577_v22  ;;  %10786 = vmatprep.subr.bf16.mxu1 %v11583_v25 }
 0xc83   :  { %10826 = vmatprep.subr.bf16.mxu0 %v11583_v25 }
 0xc85   :  { %10788 = vmatpush3.bf16.msra.mxu1 %v11583_v25 }
 0xc86   :  { %10828 = vmatpush3.bf16.msra.mxu0 %v11583_v25  ;;  %10790 = vmatprep.subr.bf16.mxu1 %v11589_v28 }
 0xc87   :  { %10830 = vmatprep.subr.bf16.mxu0 %v11589_v28 }
 0xc89   :  { %10792 = vmatpush3.bf16.msra.mxu1 %v11589_v28 }
 0xc8a   :  { %10832 = vmatpush3.bf16.msra.mxu0 %v11589_v28  ;;  %10794 = vmatprep.subr.bf16.mxu1 %v11595_v31 }
 0xc8b   :  { %10834 = vmatprep.subr.bf16.mxu0 %v11595_v31 }
 0xc8d   :  { %10796 = vmatpush3.bf16.msra.mxu1 %v11595_v31 }
 0xc8e   :  { %10836 = vmatpush3.bf16.msra.mxu0 %v11595_v31  ;;  %10798 = vmatprep.subr.bf16.mxu1 %v11601_v34 }
 0xc8f   :  { %10838 = vmatprep.subr.bf16.mxu0 %v11601_v34 }
 0xc91   :  { %10800 = vmatpush3.bf16.msra.mxu1 %v11601_v34 }
 0xc92   :  { %10840 = vmatpush3.bf16.msra.mxu0 %v11601_v34  ;;  %10802 = vmatprep.subr.bf16.mxu1 %v11607_v37 }
 0xc93   :  { %10842 = vmatprep.subr.bf16.mxu0 %v11607_v37 }
 0xc95   :  { %10804 = vmatpush3.bf16.msra.mxu1 %v11607_v37 }
 0xc96   :  { %10844 = vmatpush3.bf16.msra.mxu0 %v11607_v37  ;;  %10846 = vmatprep.subr.bf16.mxu1 %v10845_v61 }
 0xc97   :  { %10886 = vmatprep.subr.bf16.mxu0 %v10885_v63 }
 0xd02   :  { %v4252_v62 = vpop.xlane.xlu0 %4251 }
 0xd03   :  { %v4253_v47 = vrot.slane %v4252_v62, 4 }
 0xd05   :  { %v4254_v1 = vadd.f32 %v4253_v47, %v4252_v62 }
 0xd07   :  { %v4255_v2 = vrot.slane %v4254_v1, 2 }
 0xd09   :  { %v4256_v12 = vadd.f32 %v4255_v2, %v4254_v1 }
 0xd0b   :  { %v4257_v13 = vrot.slane %v4256_v12, 1 }
 0xd0d   :  { %v4258_v56 = vadd.f32 %v4257_v13, %v4256_v12 }
 0xd0f   :  { %11253 = vpush %v4258_v56  ;;  %v5402_v56 = vmul.f32 %v12728_v39, %v12728_v39 }
 0xd40   :  { %s11254_s1 = spop %11253 }
 0xd43   :  { %v9046_v27 = vpop.f32.mrb[54].mxu1 }
 0xd44   :  { %v12702_v53 = vmul.f32 %v9046_v27, %v9046_v27  ;;  %v12705_v54 = vmul.f32 %v9046_v27, %v12626_v32  ;;  %v12707_v24 = vpop.f32.mrb[54].mxu0  ;;  %v4563_v17 = vpop.f32.mrb[55].mxu1 }
 0xd45   :  { %v5041_v29 = vsub.f32 %v12707_v24, %v12696_v20  ;;  %v12711_v46 = vmul.f32 %v4563_v17, %v4563_v17  ;;  %v12714_v10 = vmul.f32 %v4563_v17, %v12630_v36  ;;  %v12716_v33 = vpop.f32.mrb[55].mxu0  ;;  %v12734_v36 = vld [vmem:[#allocation5 + $0xd8] sm:$0xff] }
 0xd46   :  { %v12720_v30 = vadd.f32 %v12702_v53, %v12696_v20  ;;  %v5040_v32 = vsub.f32 %v12716_v33, %v12700_v5  ;;  %v10889_v41 = vpack.c.bf16 %v12734_v36, %v12732_v11  ;;  %v5047_v49 = vmul.f32 2.0, %v12705_v54 }
 0xd47   :  { %v12726_v7 = vadd.f32 %v12711_v46, %v12700_v5  ;;  %v5046_v55 = vmul.f32 2.0, %v12714_v10  ;;  %v5403_v20 = vmul.f32 %v12730_v4, %v12730_v4  ;;  %v5557_v24 = vmul.f32 %v12734_v36, %v12734_v36 }
 0xd48   :  { %v5049_v57 = vadd.f32 0.0001, %v5047_v49  ;;  %v5059_v62 = vadd.f32 0.0001, %v12720_v30 }
 0xd49   :  { %v5058_v47 = vadd.f32 0.0001, %v12726_v7  ;;  %v5048_v17 = vadd.f32 0.0001, %v5046_v55 }
 0xd4b   :  { %v9103_v18 = vpop.f32.mrb[56].mxu1 }
 0xd4c   :  { %v9149_v40 = vpop.f32.mrb[56].mxu0  ;;  %v4796_v8 = vpop.f32.mrb[57].mxu1 }
 0xd4d   :  { %v4950_v0 = vpop.f32.mrb[57].mxu0  ;;  %9136 = vmatprep.mubr.f32.mxu1 %v4796_v8 }
 0xd4e   :  { %9182 = vmatprep.mubr.f32.mxu0 %v4950_v0  ;;  %9137 = vmatmul.mubr.f32.vlgmr.msra.gmra.mrb[58].mxu1 %v9103_v18  ;;  %v10929_v18 = vpack.c.bf16 %v5403_v20, %v5402_v56 }
 0xd4f   :  { %9183 = vmatmul.mubr.f32.vlgmr.msra.gmra.mrb[58].mxu0 %v9149_v40  ;;  %10848 = vmatpush3.bf16.msra.mxu1 %v10845_v61 }
 0xd50   :  { %10888 = vmatpush3.bf16.msra.mxu0 %v10885_v63  ;;  %10850 = vmatprep.subr.bf16.mxu1 %v10849_v14 }
 0xd51   :  { %10890 = vmatprep.subr.bf16.mxu0 %v10889_v41  ;;  %9193 = vmatprep.mubr.msk.f32.mxu1 %vm125_vm0, %v12498_v6 }
 0xd52   :  { %9239 = vmatprep.mubr.msk.f32.mxu0 %vm125_vm0, %v12498_v6 }
 0xd53   :  { %10852 = vmatpush3.bf16.msra.mxu1 %v10849_v14 }
 0xd54   :  { %10892 = vmatpush3.bf16.msra.mxu0 %v10889_v41  ;;  %10854 = vmatprep.subr.bf16.mxu1 %v11560_v15 }
 0xd55   :  { %10894 = vmatprep.subr.bf16.mxu0 %v11560_v15 }
 0xd56   :  { %9194 = vmatmul.mubr.msk.f32.vlgmr.msra.gmra.mrb[60].mxu1 %vm125_vm0, %v12506_v35 }
 0xd57   :  { %9240 = vmatmul.mubr.msk.f32.vlgmr.msra.gmra.mrb[60].mxu0 %vm125_vm0, %v12506_v35  ;;  %10856 = vmatpush3.bf16.msra.mxu1 %v11560_v15 }
 0xd58   :  { %10896 = vmatpush3.bf16.msra.mxu0 %v11560_v15  ;;  %10858 = vmatprep.subr.bf16.mxu1 %v11567_v19 }
 0xd59   :  { %10898 = vmatprep.subr.bf16.mxu0 %v11567_v19 }
 0xd5b   :  { %10860 = vmatpush3.bf16.msra.mxu1 %v11567_v19 }
 0xd5c   :  { %10900 = vmatpush3.bf16.msra.mxu0 %v11567_v19  ;;  %10862 = vmatprep.subr.bf16.mxu1 %v11577_v22 }
 0xd5d   :  { %10902 = vmatprep.subr.bf16.mxu0 %v11577_v22 }
 0xd5f   :  { %10864 = vmatpush3.bf16.msra.mxu1 %v11577_v22 }
 0xd60   :  { %10904 = vmatpush3.bf16.msra.mxu0 %v11577_v22  ;;  %10866 = vmatprep.subr.bf16.mxu1 %v11583_v25 }
 0xd61   :  { %10906 = vmatprep.subr.bf16.mxu0 %v11583_v25 }
 0xd63   :  { %10868 = vmatpush3.bf16.msra.mxu1 %v11583_v25 }
 0xd64   :  { %10908 = vmatpush3.bf16.msra.mxu0 %v11583_v25  ;;  %10870 = vmatprep.subr.bf16.mxu1 %v11589_v28 }
 0xd65   :  { %10910 = vmatprep.subr.bf16.mxu0 %v11589_v28 }
 0xd67   :  { %10872 = vmatpush3.bf16.msra.mxu1 %v11589_v28 }
 0xd68   :  { %10912 = vmatpush3.bf16.msra.mxu0 %v11589_v28  ;;  %10874 = vmatprep.subr.bf16.mxu1 %v11595_v31 }
 0xd69   :  { %10914 = vmatprep.subr.bf16.mxu0 %v11595_v31 }
 0xd6b   :  { %10876 = vmatpush3.bf16.msra.mxu1 %v11595_v31 }
 0xd6c   :  { %10916 = vmatpush3.bf16.msra.mxu0 %v11595_v31  ;;  %10878 = vmatprep.subr.bf16.mxu1 %v11601_v34 }
 0xd6d   :  { %10918 = vmatprep.subr.bf16.mxu0 %v11601_v34 }
 0xd6f   :  { %10880 = vmatpush3.bf16.msra.mxu1 %v11601_v34 }
 0xd70   :  { %10920 = vmatpush3.bf16.msra.mxu0 %v11601_v34  ;;  %10882 = vmatprep.subr.bf16.mxu1 %v11607_v37 }
 0xd71   :  { %10922 = vmatprep.subr.bf16.mxu0 %v11607_v37 }
 0xd73   :  { %10884 = vmatpush3.bf16.msra.mxu1 %v11607_v37 }
 0xd74   :  { %10924 = vmatpush3.bf16.msra.mxu0 %v11607_v37  ;;  %10926 = vmatprep.subr.bf16.mxu1 %v10925_v44 }
 0xd75   :  { %10966 = vmatprep.subr.bf16.mxu0 %v10965_v48 }
 0xe21   :  { %v9138_v50 = vpop.f32.mrb[58].mxu1 }
 0xe22   :  { %v5043_v60 = vsub.f32 %v9138_v50, %v12702_v53  ;;  %v9184_v23 = vpop.f32.mrb[58].mxu0  ;;  %v4871_v26 = vpop.f32.mrb[59].mxu1 }
 0xe23   :  { %v5045_v51 = vsub.f32 %v9184_v23, %v12705_v54  ;;  %v5042_v3 = vsub.f32 %v4871_v26, %v12711_v46  ;;  %v5025_v9 = vpop.f32.mrb[59].mxu0  ;;  %v5556_v54 = vmul.f32 %v12732_v11, %v12732_v11  ;;  %v5708_v26 = vmul.f32 %v12686_v58, %v12682_v16 }
 0xe24   :  { %v5061_v61 = vadd.f32 %v5043_v60, %v5041_v29  ;;  %v5044_v63 = vsub.f32 %v5025_v9, %v12714_v10  ;;  %v12858_v9 = vld [vmem:[#allocation2 + $0xe8] sm:$0xff] }
 0xe25   :  { %v5051_v1 = vmul.f32 2.0, %v5045_v51  ;;  %v5060_v2 = vadd.f32 %v5042_v3, %v5040_v32  ;;  %v10969_v8 = vpack.c.bf16 %v5557_v24, %v5556_v54  ;;  %v5709_v51 = vmul.f32 %v12690_v52, %v12684_v59  ;;  %v12856_v3 = vld [vmem:[#allocation2 + $0xe0] sm:$0xff] }
 0xe26   :  { %v5063_v12 = vadd.f32 0.0009, %v5061_v61  ;;  %v5050_v13 = vmul.f32 2.0, %v5044_v63  ;;  %v11045_v55 = vpack.c.bf16 %v12858_v9, %v12856_v3 }
 0xe27   :  { %v5053_v27 = vadd.f32 0.0009, %v5051_v1  ;;  %v5062_v53 = vadd.f32 0.0009, %v5060_v2 }
 0xe28   :  { %v5065_v29 = vmul.f32 %v5063_v12, %v5059_v62  ;;  %v5052_v5 = vadd.f32 0.0009, %v5050_v13 }
 0xe29   :  { %v5055_v46 = vmul.f32 %v5053_v27, %v5049_v57  ;;  %v5064_v10 = vmul.f32 %v5062_v53, %v5058_v47  ;;  %v9195_v33 = vpop.f32.mrb[60].mxu1  ;;  %v11005_v57 = vpack.c.bf16 %v5709_v51, %v5708_v26 }
 0xe2a   :  { %11289 = vrcp.f32 %v5065_v29  ;;  %v5054_v30 = vmul.f32 %v5052_v5, %v5048_v17  ;;  %v9241_v32 = vpop.f32.mrb[60].mxu0  ;;  %v5166_v7 = vpop.f32.mrb[61].mxu1  ;;  %v5711_v5 = vmul.f32 %v12734_v36, %v12730_v4  ;;  %v12938_v4 = vld [vmem:[#allocation5 + $0xe8] sm:$0xff] }
 0xe2b   :  { %11291 = vrcp.f32 %v5064_v10  ;;  %v5316_v40 = vpop.f32.mrb[61].mxu0  ;;  %9228 = vmatprep.mubr.f32.mxu1 %v5166_v7 }
 0xe2c   :  { %9274 = vmatprep.mubr.f32.mxu0 %v5316_v40  ;;  %9229 = vmatmul.mubr.f32.vlgmr.msra.gmra.mrb[62].mxu1 %v9195_v33 }
 0xe2d   :  { %9275 = vmatmul.mubr.f32.vlgmr.msra.gmra.mrb[62].mxu0 %v9241_v32  ;;  %10928 = vmatpush3.bf16.msra.mxu1 %v10925_v44 }
 0xe2e   :  { %10968 = vmatpush3.bf16.msra.mxu0 %v10965_v48  ;;  %10930 = vmatprep.subr.bf16.mxu1 %v10929_v18 }
 0xe2f   :  { %10970 = vmatprep.subr.bf16.mxu0 %v10969_v8  ;;  %9285 = vmatprep.mubr.msk.f32.mxu1 %vm125_vm0, %v12498_v6 }
 0xe30   :  { %9331 = vmatprep.mubr.msk.f32.mxu0 %vm125_vm0, %v12498_v6 }
 0xe31   :  { %10932 = vmatpush3.bf16.msra.mxu1 %v10929_v18 }
 0xe32   :  { %10972 = vmatpush3.bf16.msra.mxu0 %v10969_v8  ;;  %10934 = vmatprep.subr.bf16.mxu1 %v11560_v15 }
 0xe33   :  { %10974 = vmatprep.subr.bf16.mxu0 %v11560_v15 }
 0xe34   :  { %v11290_v14 = vpop.eup %11289  ;;  %9286 = vmatmul.mubr.msk.f32.vlgmr.msra.gmra.mrb[64].mxu1 %vm125_vm0, %v12506_v35 }
 0xe35   :  { %v11292_v0 = vpop.eup %11291  ;;  %v5069_v41 = vmul.f32 %v11290_v14, %v5065_v29  ;;  %9332 = vmatmul.mubr.msk.f32.vlgmr.msra.gmra.mrb[64].mxu0 %vm125_vm0, %v12506_v35  ;;  %10936 = vmatpush3.bf16.msra.mxu1 %v11560_v15  ;;  %v5710_v29 = vmul.f32 %v12732_v11, %v12728_v39  ;;  %v12936_v39 = vld [vmem:[#allocation5 + $0xe0] sm:$0xff] }
 0xe36   :  { %v5068_v21 = vmul.f32 %v11292_v0, %v5064_v10  ;;  %10976 = vmatpush3.bf16.msra.mxu0 %v11560_v15  ;;  %10938 = vmatprep.subr.bf16.mxu1 %v11567_v19  ;;  %v12888_v10 = vld [vmem:[#allocation2 + $0xf8] sm:$0xff]  ;;  %v11085_v11 = vpack.c.bf16 %v12938_v4, %v12936_v39 }
 0xe37   :  { %v5071_v42 = vsub.f32 2.0, %v5069_v41  ;;  %10978 = vmatprep.subr.bf16.mxu0 %v11567_v19  ;;  %v11009_v7 = vpack.c.bf16 %v5711_v5, %v5710_v29  ;;  %v6231_v51 = vmul.f32 %v12888_v10, %v12888_v10 }
 0xe38   :  { %v5070_v43 = vsub.f32 2.0, %v5068_v21 }
 0xe39   :  { %v5073_v38 = vmul.f32 %v11290_v14, %v5071_v42  ;;  %10940 = vmatpush3.bf16.msra.mxu1 %v11567_v19 }
 0xe3a   :  { %v5072_v44 = vmul.f32 %v11292_v0, %v5070_v43  ;;  %10980 = vmatpush3.bf16.msra.mxu0 %v11567_v19  ;;  %10942 = vmatprep.subr.bf16.mxu1 %v11577_v22 }
 0xe3b   :  { %v5075_v48 = vmul.f32 %v5073_v38, %v5055_v46  ;;  %10982 = vmatprep.subr.bf16.mxu0 %v11577_v22  ;;  %v12886_v46 = vld [vmem:[#allocation2 + $0xf0] sm:$0xff] }
 0xe3c   :  { %v5074_v49 = vmul.f32 %v5072_v44, %v5054_v30  ;;  %v11049_v40 = vpack.c.bf16 %v12888_v10, %v12886_v46  ;;  %v6230_v26 = vmul.f32 %v12886_v46, %v12886_v46 }
 0xe3d   :  { %v5077_v50 = vmul.f32 %v11850_v45, %v5075_v48  ;;  %10944 = vmatpush3.bf16.msra.mxu1 %v11577_v22 }
 0xe3e   :  { %v5076_v60 = vmul.f32 %v11850_v45, %v5074_v49  ;;  %10984 = vmatpush3.bf16.msra.mxu0 %v11577_v22  ;;  %10946 = vmatprep.subr.bf16.mxu1 %v11583_v25 }
 0xe3f   :  { %10986 = vmatprep.subr.bf16.mxu0 %v11583_v25 }
 0xe40   :  { %v5078_v23 = vadd.f32 %v5077_v50, %v5076_v60  ;;  %v12947_v60 = vld [vmem:[#allocation5 + $0xf0] sm:$0xff] }
 0xe41   :  { %10948 = vmatpush3.bf16.msra.mxu1 %v11583_v25 }
 0xe42   :  { %5079 = vadd.xlane.f32.xlu1 %v5078_v23  ;;  %10988 = vmatpush3.bf16.msra.mxu0 %v11583_v25  ;;  %v12949_v23 = vld [vmem:[#allocation5 + $0xf8] sm:$0xff] }
 0xe43   :  { %10950 = vmatprep.subr.bf16.mxu1 %v11589_v28  ;;  %10990 = vmatprep.subr.bf16.mxu0 %v11589_v28 }
 0xe45   :  { %10952 = vmatpush3.bf16.msra.mxu1 %v11589_v28 }
 0xe46   :  { %10992 = vmatpush3.bf16.msra.mxu0 %v11589_v28  ;;  %10954 = vmatprep.subr.bf16.mxu1 %v11595_v31 }
 0xe47   :  { %10994 = vmatprep.subr.bf16.mxu0 %v11595_v31 }
 0xe49   :  { %10956 = vmatpush3.bf16.msra.mxu1 %v11595_v31 }
 0xe4a   :  { %10996 = vmatpush3.bf16.msra.mxu0 %v11595_v31  ;;  %10958 = vmatprep.subr.bf16.mxu1 %v11601_v34 }
 0xe4b   :  { %10998 = vmatprep.subr.bf16.mxu0 %v11601_v34 }
 0xe4d   :  { %10960 = vmatpush3.bf16.msra.mxu1 %v11601_v34 }
 0xe4e   :  { %11000 = vmatpush3.bf16.msra.mxu0 %v11601_v34  ;;  %10962 = vmatprep.subr.bf16.mxu1 %v11607_v37 }
 0xe4f   :  { %11002 = vmatprep.subr.bf16.mxu0 %v11607_v37 }
 0xe51   :  { %10964 = vmatpush3.bf16.msra.mxu1 %v11607_v37 }
 0xe52   :  { %11004 = vmatpush3.bf16.msra.mxu0 %v11607_v37  ;;  %11006 = vmatprep.subr.bf16.mxu1 %v11005_v57 }
 0xe53   :  { %11046 = vmatprep.subr.bf16.mxu0 %v11045_v55 }
 0xecf   :  { %v5080_v61 = vpop.xlane.xlu1 %5079 }
 0xed0   :  { %v5081_v63 = vrot.slane %v5080_v61, 4 }
 0xed2   :  { %v5082_v62 = vadd.f32 %v5081_v63, %v5080_v61 }
 0xed4   :  { %v5083_v47 = vrot.slane %v5082_v62, 2 }
 0xed6   :  { %v5084_v1 = vadd.f32 %v5083_v47, %v5082_v62 }
 0xed8   :  { %v5085_v2 = vrot.slane %v5084_v1, 1 }
 0xeda   :  { %v5086_v16 = vadd.f32 %v5085_v2, %v5084_v1  ;;  %v11089_v2 = vpack.c.bf16 %v12949_v23, %v12947_v60 }
 0xedc   :  { %11255 = vpush %v5086_v16 }
 0xeff   :  { %v9230_v58 = vpop.f32.mrb[62].mxu1 }
 0xf00   :  { %v12862_v59 = vmul.f32 %v9230_v58, %v9230_v58  ;;  %v9276_v52 = vpop.f32.mrb[62].mxu0  ;;  %v5241_v12 = vpop.f32.mrb[63].mxu1 }
 0xf01   :  { %v12864_v13 = vmul.f32 %v9276_v52, %v9276_v52  ;;  %v12866_v56 = vmul.f32 %v9276_v52, %v9230_v58  ;;  %v12868_v20 = vmul.f32 %v5241_v12, %v5241_v12  ;;  %v5391_v27 = vpop.f32.mrb[63].mxu0  ;;  %v11129_v58 = vpack.c.bf16 %v6231_v51, %v6230_v26  ;;  %v12970_v52 = vld [vmem:[#allocation7 + $0x8] sm:$0xff] }
 0xf02   :  { %v12870_v53 = vmul.f32 %v5391_v27, %v5391_v27  ;;  %v12872_v54 = vmul.f32 %v5391_v27, %v5241_v12  ;;  %v6382_v12 = vmul.f32 %v12936_v39, %v12936_v39  ;;  %v6537_v27 = vmul.f32 %v12938_v4, %v12858_v9 }
 0xf03   :  { %v12876_v24 = vadd.f32 %v12864_v13, %v12862_v59 }
 0xf04   :  { %v12880_v17 = vadd.f32 %v12870_v53, %v12868_v20 }
 0xf05   :  { %v5887_v49 = vadd.f32 0.0001, %v12876_v24 }
 0xf07   :  { %v9287_v33 = vpop.f32.mrb[64].mxu1 }
 0xf08   :  { %v9333_v30 = vpop.f32.mrb[64].mxu0  ;;  %v5470_v32 = vpop.f32.mrb[65].mxu1 }
 0xf09   :  { %v5624_v18 = vpop.f32.mrb[65].mxu0  ;;  %9320 = vmatprep.mubr.f32.mxu1 %v5470_v32 }
 0xf0a   :  { %9366 = vmatprep.mubr.f32.mxu0 %v5624_v18  ;;  %9321 = vmatmul.mubr.f32.vlgmr.msra.gmra.mrb[66].mxu1 %v9287_v33  ;;  %v5874_v18 = vmul.f32 2.0, %v12872_v54 }
 0xf0b   :  { %9367 = vmatmul.mubr.f32.vlgmr.msra.gmra.mrb[66].mxu0 %v9333_v30  ;;  %11008 = vmatpush3.bf16.msra.mxu1 %v11005_v57  ;;  %v5886_v57 = vadd.f32 0.0001, %v12880_v17 }
 0xf0c   :  { %11048 = vmatpush3.bf16.msra.mxu0 %v11045_v55  ;;  %11010 = vmatprep.subr.bf16.mxu1 %v11009_v7 }
 0xf0d   :  { %11050 = vmatprep.subr.bf16.mxu0 %v11049_v40  ;;  %9377 = vmatprep.mubr.msk.f32.mxu1 %vm125_vm0, %v12498_v6  ;;  %s11256_s13 = spop %11255 }
 0xf0e   :  { %9423 = vmatprep.mubr.msk.f32.mxu0 %vm125_vm0, %v12498_v6  ;;  %v6228_v6 = vmul.f32 %v12856_v3, %v12856_v3 }
 0xf0f   :  { %11012 = vmatpush3.bf16.msra.mxu1 %v11009_v7 }
 0xf10   :  { %11052 = vmatpush3.bf16.msra.mxu0 %v11049_v40  ;;  %11014 = vmatprep.subr.bf16.mxu1 %v11560_v15 }
 0xf11   :  { %11054 = vmatprep.subr.bf16.mxu0 %v11560_v15 }
 0xf12   :  { %9378 = vmatmul.mubr.msk.f32.vlgmr.msra.gmra.mrb[68].mxu1 %vm125_vm0, %v12506_v35 }
 0xf13   :  { %9424 = vmatmul.mubr.msk.f32.vlgmr.msra.gmra.mrb[68].mxu0 %vm125_vm0, %v12506_v35  ;;  %11016 = vmatpush3.bf16.msra.mxu1 %v11560_v15  ;;  %v6229_v35 = vmul.f32 %v12858_v9, %v12858_v9 }
 0xf14   :  { %11056 = vmatpush3.bf16.msra.mxu0 %v11560_v15  ;;  %11018 = vmatprep.subr.bf16.mxu1 %v11567_v19 }
 0xf15   :  { %11058 = vmatprep.subr.bf16.mxu0 %v11567_v19  ;;  %v11125_v36 = vpack.c.bf16 %v6229_v35, %v6228_v6 }
 0xf17   :  { %11020 = vmatpush3.bf16.msra.mxu1 %v11567_v19 }
 0xf18   :  { %11060 = vmatpush3.bf16.msra.mxu0 %v11567_v19  ;;  %11022 = vmatprep.subr.bf16.mxu1 %v11577_v22 }
 0xf19   :  { %11062 = vmatprep.subr.bf16.mxu0 %v11577_v22 }
 0xf1b   :  { %11024 = vmatpush3.bf16.msra.mxu1 %v11577_v22 }
 0xf1c   :  { %11064 = vmatpush3.bf16.msra.mxu0 %v11577_v22  ;;  %11026 = vmatprep.subr.bf16.mxu1 %v11583_v25 }
 0xf1d   :  { %11066 = vmatprep.subr.bf16.mxu0 %v11583_v25 }
 0xf1f   :  { %11028 = vmatpush3.bf16.msra.mxu1 %v11583_v25 }
 0xf20   :  { %11068 = vmatpush3.bf16.msra.mxu0 %v11583_v25  ;;  %11030 = vmatprep.subr.bf16.mxu1 %v11589_v28 }
 0xf21   :  { %11070 = vmatprep.subr.bf16.mxu0 %v11589_v28 }
 0xf23   :  { %11032 = vmatpush3.bf16.msra.mxu1 %v11589_v28 }
 0xf24   :  { %11072 = vmatpush3.bf16.msra.mxu0 %v11589_v28  ;;  %11034 = vmatprep.subr.bf16.mxu1 %v11595_v31 }
 0xf25   :  { %11074 = vmatprep.subr.bf16.mxu0 %v11595_v31 }
 0xf27   :  { %11036 = vmatpush3.bf16.msra.mxu1 %v11595_v31 }
 0xf28   :  { %11076 = vmatpush3.bf16.msra.mxu0 %v11595_v31  ;;  %11038 = vmatprep.subr.bf16.mxu1 %v11601_v34 }
 0xf29   :  { %11078 = vmatprep.subr.bf16.mxu0 %v11601_v34 }
 0xf2b   :  { %11040 = vmatpush3.bf16.msra.mxu1 %v11601_v34 }
 0xf2c   :  { %11080 = vmatpush3.bf16.msra.mxu0 %v11601_v34  ;;  %11042 = vmatprep.subr.bf16.mxu1 %v11607_v37 }
 0xf2d   :  { %11082 = vmatprep.subr.bf16.mxu0 %v11607_v37 }
 0xf2f   :  { %11044 = vmatpush3.bf16.msra.mxu1 %v11607_v37 }
 0xf30   :  { %11084 = vmatpush3.bf16.msra.mxu0 %v11607_v37  ;;  %11086 = vmatprep.subr.bf16.mxu1 %v11085_v11 }
 0xf31   :  { %11126 = vmatprep.subr.bf16.mxu0 %v11125_v36 }
 0xfdd   :  { %v9322_v8 = vpop.f32.mrb[66].mxu1 }
 0xfde   :  { %v5869_v14 = vsub.f32 %v9322_v8, %v12862_v59  ;;  %v9368_v0 = vpop.f32.mrb[66].mxu0  ;;  %v5545_v41 = vpop.f32.mrb[67].mxu1  ;;  %v12962_v59 = vld [vmem:[#allocation7] sm:$0xff] }
 0xfdf   :  { %v5871_v21 = vsub.f32 %v9368_v0, %v12864_v13  ;;  %v5868_v42 = vsub.f32 %v5545_v41, %v12868_v20  ;;  %v5699_v43 = vpop.f32.mrb[67].mxu0  ;;  %v6383_v13 = vmul.f32 %v12938_v4, %v12938_v4  ;;  %v6536_v20 = vmul.f32 %v12936_v39, %v12856_v3 }
 0xfe0   :  { %v5870_v38 = vsub.f32 %v5699_v43, %v12870_v53  ;;  %v5875_v3 = vmul.f32 2.0, %v12866_v56  ;;  %v5876_v0 = vadd.f32 0.0001, %v5874_v18 }
 0xfe1   :  { %v5889_v44 = vadd.f32 %v5871_v21, %v5869_v14  ;;  %v11165_v53 = vpack.c.bf16 %v6383_v13, %v6382_v12  ;;  %v11205_v24 = vpack.c.bf16 %v6537_v27, %v6536_v20  ;;  %v6384_v14 = vmul.f32 %v12947_v60, %v12947_v60 }
 0xfe2   :  { %v5888_v48 = vadd.f32 %v5870_v38, %v5868_v42  ;;  %v6538_v21 = vmul.f32 %v12947_v60, %v12886_v46 }
 0xfe3   :  { %v5891_v50 = vadd.f32 0.0009, %v5889_v44 }
 0xfe4   :  { %v5890_v55 = vadd.f32 0.0009, %v5888_v48 }
 0xfe5   :  { %v12956_v61 = vmul.f32 %v5891_v50, %v5887_v49  ;;  %v9379_v63 = vpop.f32.mrb[68].mxu1 }
 0xfe6   :  { %v12958_v62 = vmul.f32 %v5890_v55, %v5886_v57  ;;  %v9425_v47 = vpop.f32.mrb[68].mxu0  ;;  %v5778_v1 = vpop.f32.mrb[69].mxu1 }
 0xfe7   :  { %v5994_v16 = vpop.f32.mrb[69].mxu0  ;;  %9412 = vmatprep.mubr.f32.mxu1 %v5778_v1  ;;  %11293 = vrcp.f32 %v12956_v61 }
 0xfe8   :  { %9458 = vmatprep.mubr.f32.mxu0 %v5994_v16  ;;  %9413 = vmatmul.mubr.f32.vlgmr.msra.gmra.mrb[70].mxu1 %v9379_v63  ;;  %11295 = vrcp.f32 %v12958_v62 }
 0xfe9   :  { %9459 = vmatmul.mubr.f32.vlgmr.msra.gmra.mrb[70].mxu0 %v9425_v47  ;;  %11088 = vmatpush3.bf16.msra.mxu1 %v11085_v11 }
 0xfea   :  { %11128 = vmatpush3.bf16.msra.mxu0 %v11125_v36  ;;  %11090 = vmatprep.subr.bf16.mxu1 %v11089_v2  ;;  %v5877_v36 = vadd.f32 0.0001, %v5875_v3 }
 0xfeb   :  { %11130 = vmatprep.subr.bf16.mxu0 %v11129_v58  ;;  %9469 = vmatprep.mubr.msk.f32.mxu1 %vm125_vm0, %v12962_v59 }
 0xfec   :  { %9515 = vmatprep.mubr.msk.f32.mxu0 %vm125_vm0, %v12962_v59 }
 0xfed   :  { %11092 = vmatpush3.bf16.msra.mxu1 %v11089_v2 }
 0xfee   :  { %11132 = vmatpush3.bf16.msra.mxu0 %v11129_v58  ;;  %11094 = vmatprep.subr.bf16.mxu1 %v11560_v15 }
 0xfef   :  { %11134 = vmatprep.subr.bf16.mxu0 %v11560_v15 }
 0xff0   :  { %9470 = vmatmul.mubr.msk.f32.vlgmr.msra.gmra.mrb[72].mxu1 %vm125_vm0, %v12970_v52 }
 0xff1   :  { %9516 = vmatmul.mubr.msk.f32.vlgmr.msra.gmra.mrb[72].mxu0 %vm125_vm0, %v12970_v52  ;;  %11096 = vmatpush3.bf16.msra.mxu1 %v11560_v15  ;;  %v11294_v17 = vpop.eup %11293 }
 0xff2   :  { %11136 = vmatpush3.bf16.msra.mxu0 %v11560_v15  ;;  %11098 = vmatprep.subr.bf16.mxu1 %v11567_v19  ;;  %v11296_v29 = vpop.eup %11295  ;;  %v5897_v5 = vmul.f32 %v11294_v17, %v12956_v61 }
 0xff3   :  { %11138 = vmatprep.subr.bf16.mxu0 %v11567_v19  ;;  %v5896_v33 = vmul.f32 %v11296_v29, %v12958_v62 }
 0xff4   :  { %v5899_v35 = vsub.f32 2.0, %v5897_v5 }
 0xff5   :  { %11100 = vmatpush3.bf16.msra.mxu1 %v11567_v19  ;;  %v5898_v4 = vsub.f32 2.0, %v5896_v33 }
 0xff6   :  { %11140 = vmatpush3.bf16.msra.mxu0 %v11567_v19  ;;  %11102 = vmatprep.subr.bf16.mxu1 %v11577_v22  ;;  %v5901_v43 = vmul.f32 %v11294_v17, %v5899_v35 }
 0xff7   :  { %11142 = vmatprep.subr.bf16.mxu0 %v11577_v22  ;;  %v5900_v48 = vmul.f32 %v11296_v29, %v5898_v4 }
 0xff9   :  { %11104 = vmatpush3.bf16.msra.mxu1 %v11577_v22 }
 0xffa   :  { %11144 = vmatpush3.bf16.msra.mxu0 %v11577_v22  ;;  %11106 = vmatprep.subr.bf16.mxu1 %v11583_v25 }
 0xffb   :  { %11146 = vmatprep.subr.bf16.mxu0 %v11583_v25 }
 0xffd   :  { %11108 = vmatpush3.bf16.msra.mxu1 %v11583_v25 }
 0xffe   :  { %11148 = vmatpush3.bf16.msra.mxu0 %v11583_v25  ;;  %11110 = vmatprep.subr.bf16.mxu1 %v11589_v28 }
 0xfff   :  { %11150 = vmatprep.subr.bf16.mxu0 %v11589_v28 }
0x1001   :  { %11112 = vmatpush3.bf16.msra.mxu1 %v11589_v28 }
0x1002   :  { %11152 = vmatpush3.bf16.msra.mxu0 %v11589_v28  ;;  %11114 = vmatprep.subr.bf16.mxu1 %v11595_v31 }
0x1003   :  { %11154 = vmatprep.subr.bf16.mxu0 %v11595_v31 }
0x1005   :  { %11116 = vmatpush3.bf16.msra.mxu1 %v11595_v31 }
0x1006   :  { %11156 = vmatpush3.bf16.msra.mxu0 %v11595_v31  ;;  %11118 = vmatprep.subr.bf16.mxu1 %v11601_v34 }
0x1007   :  { %11158 = vmatprep.subr.bf16.mxu0 %v11601_v34 }
0x1009   :  { %11120 = vmatpush3.bf16.msra.mxu1 %v11601_v34 }
0x100a   :  { %11160 = vmatpush3.bf16.msra.mxu0 %v11601_v34  ;;  %11122 = vmatprep.subr.bf16.mxu1 %v11607_v37 }
0x100b   :  { %11162 = vmatprep.subr.bf16.mxu0 %v11607_v37 }
0x100d   :  { %11124 = vmatpush3.bf16.msra.mxu1 %v11607_v37 }
0x100e   :  { %11164 = vmatpush3.bf16.msra.mxu0 %v11607_v37  ;;  %11166 = vmatprep.subr.bf16.mxu1 %v11165_v53 }
0x100f   :  { %11206 = vmatprep.subr.bf16.mxu0 %v11205_v24 }
0x10bb   :  { %v9414_v30 = vpop.f32.mrb[70].mxu1 }
0x10bc   :  { %v5873_v32 = vsub.f32 %v9414_v30, %v12866_v56  ;;  %v5853_v9 = vpop.f32.mrb[71].mxu1  ;;  %v13020_v7 = vpop.f32.mrb[70].mxu0  ;;  %v6385_v56 = vmul.f32 %v12949_v23, %v12949_v23 }
0x10bd   :  { %v5872_v40 = vsub.f32 %v5853_v9, %v12872_v54  ;;  %v13024_v6 = vpop.f32.mrb[71].mxu0  ;;  %v6539_v54 = vmul.f32 %v12949_v23, %v12888_v10  ;;  %v6691_v63 = vmul.f32 %v13020_v7, %v13020_v7 }
0x10be   :  { %v5879_v39 = vmul.f32 2.0, %v5873_v32  ;;  %v11169_v26 = vpack.c.bf16 %v6385_v56, %v6384_v14  ;;  %v6690_v62 = vmul.f32 %v13024_v6, %v13024_v6 }
0x10bf   :  { %v5878_v11 = vmul.f32 2.0, %v5872_v40  ;;  %v11209_v55 = vpack.c.bf16 %v6539_v54, %v6538_v21 }
0x10c0   :  { %v5881_v8 = vadd.f32 0.0009, %v5879_v39 }
0x10c1   :  { %v5880_v41 = vadd.f32 0.0009, %v5878_v11 }
0x10c2   :  { %v5883_v42 = vmul.f32 %v5881_v8, %v5877_v36 }
0x10c3   :  { %v5882_v38 = vmul.f32 %v5880_v41, %v5876_v0  ;;  %v9471_v44 = vpop.f32.mrb[72].mxu1 }
0x10c4   :  { %v9517_v49 = vpop.f32.mrb[72].mxu0  ;;  %v6144_v50 = vpop.f32.mrb[73].mxu1  ;;  %v5903_v51 = vmul.f32 %v5901_v43, %v5883_v42 }
0x10c5   :  { %v6298_v57 = vpop.f32.mrb[73].mxu0  ;;  %9504 = vmatprep.mubr.f32.mxu1 %v6144_v50  ;;  %v5902_v61 = vmul.f32 %v5900_v48, %v5882_v38 }
0x10c6   :  { %9550 = vmatprep.mubr.f32.mxu0 %v6298_v57  ;;  %9505 = vmatmul.mubr.f32.vlgmr.msra.gmra.mrb[74].mxu1 %v9471_v44  ;;  %v5905_v46 = vmul.f32 %v11850_v45, %v5903_v51 }
0x10c7   :  { %9551 = vmatmul.mubr.f32.vlgmr.msra.gmra.mrb[74].mxu0 %v9517_v49  ;;  %11168 = vmatpush3.bf16.msra.mxu1 %v11165_v53  ;;  %v5904_v10 = vmul.f32 %v11850_v45, %v5902_v61 }
0x10c8   :  { %11208 = vmatpush3.bf16.msra.mxu0 %v11205_v24  ;;  %11170 = vmatprep.subr.bf16.mxu1 %v11169_v26 }
0x10c9   :  { %11210 = vmatprep.subr.bf16.mxu0 %v11209_v55  ;;  %9561 = vmatprep.mubr.msk.f32.mxu1 %vm125_vm0, %v12962_v59  ;;  %v5906_v60 = vadd.f32 %v5905_v46, %v5904_v10 }
0x10ca   :  { %9607 = vmatprep.mubr.msk.f32.mxu0 %vm125_vm0, %v12962_v59 }
0x10cb   :  { %11172 = vmatpush3.bf16.msra.mxu1 %v11169_v26  ;;  %5907 = vadd.xlane.f32.xlu0 %v5906_v60 }
0x10cc   :  { %11212 = vmatpush3.bf16.msra.mxu0 %v11209_v55  ;;  %11174 = vmatprep.subr.bf16.mxu1 %v11560_v15 }
0x10cd   :  { %11214 = vmatprep.subr.bf16.mxu0 %v11560_v15 }
0x10ce   :  { %9562 = vmatmul.mubr.msk.f32.vlgmr.msra.gmra.mrb[76].mxu1 %vm125_vm0, %v12970_v52 }
0x10cf   :  { %9608 = vmatmul.mubr.msk.f32.vlgmr.msra.gmra.mrb[76].mxu0 %vm125_vm0, %v12970_v52  ;;  %11176 = vmatpush3.bf16.msra.mxu1 %v11560_v15 }
0x10d0   :  { %11216 = vmatpush3.bf16.msra.mxu0 %v11560_v15  ;;  %11178 = vmatprep.subr.bf16.mxu1 %v11567_v19 }
0x10d1   :  { %11218 = vmatprep.subr.bf16.mxu0 %v11567_v19 }
0x10d3   :  { %11180 = vmatpush3.bf16.msra.mxu1 %v11567_v19 }
0x10d4   :  { %11220 = vmatpush3.bf16.msra.mxu0 %v11567_v19  ;;  %11182 = vmatprep.subr.bf16.mxu1 %v11577_v22 }
0x10d5   :  { %11222 = vmatprep.subr.bf16.mxu0 %v11577_v22 }
0x10d7   :  { %11184 = vmatpush3.bf16.msra.mxu1 %v11577_v22 }
0x10d8   :  { %11224 = vmatpush3.bf16.msra.mxu0 %v11577_v22  ;;  %11186 = vmatprep.subr.bf16.mxu1 %v11583_v25 }
0x10d9   :  { %11226 = vmatprep.subr.bf16.mxu0 %v11583_v25 }
0x10db   :  { %11188 = vmatpush3.bf16.msra.mxu1 %v11583_v25 }
0x10dc   :  { %11228 = vmatpush3.bf16.msra.mxu0 %v11583_v25  ;;  %11190 = vmatprep.subr.bf16.mxu1 %v11589_v28 }
0x10dd   :  { %11230 = vmatprep.subr.bf16.mxu0 %v11589_v28 }
0x10df   :  { %11192 = vmatpush3.bf16.msra.mxu1 %v11589_v28 }
0x10e0   :  { %11232 = vmatpush3.bf16.msra.mxu0 %v11589_v28  ;;  %11194 = vmatprep.subr.bf16.mxu1 %v11595_v31 }
0x10e1   :  { %11234 = vmatprep.subr.bf16.mxu0 %v11595_v31 }
0x10e3   :  { %11196 = vmatpush3.bf16.msra.mxu1 %v11595_v31 }
0x10e4   :  { %11236 = vmatpush3.bf16.msra.mxu0 %v11595_v31  ;;  %11198 = vmatprep.subr.bf16.mxu1 %v11601_v34 }
0x10e5   :  { %11238 = vmatprep.subr.bf16.mxu0 %v11601_v34 }
0x10e7   :  { %11200 = vmatpush3.bf16.msra.mxu1 %v11601_v34 }
0x10e8   :  { %11240 = vmatpush3.bf16.msra.mxu0 %v11601_v34  ;;  %11202 = vmatprep.subr.bf16.mxu1 %v11607_v37 }
0x10e9   :  { %11242 = vmatprep.subr.bf16.mxu0 %v11607_v37 }
0x10eb   :  { %11204 = vmatpush3.bf16.msra.mxu1 %v11607_v37 }
0x10ec   :  { %11244 = vmatpush3.bf16.msra.mxu0 %v11607_v37 }
0x1158   :  { %v5908_v15 = vpop.xlane.xlu0 %5907 }
0x1159   :  { %v5909_v19 = vrot.slane %v5908_v15, 4 }
0x115b   :  { %v5910_v22 = vadd.f32 %v5909_v19, %v5908_v15 }
0x115d   :  { %v5911_v25 = vrot.slane %v5910_v22, 2 }
0x115f   :  { %v5912_v28 = vadd.f32 %v5911_v25, %v5910_v22 }
0x1161   :  { %v5913_v31 = vrot.slane %v5912_v28, 1 }
0x1163   :  { %v5914_v23 = vadd.f32 %v5913_v31, %v5912_v28 }
0x1165   :  { %11257 = vpush %v5914_v23 }
0x1196   :  { %s11258_s14 = spop %11257 }
0x1199   :  { %v9506_v34 = vpop.f32.mrb[74].mxu1 }
0x119a   :  { %v6693_v47 = vmul.f32 %v9506_v34, %v9506_v34  ;;  %v6695_v1 = vmul.f32 %v9506_v34, %v13020_v7  ;;  %v9552_v2 = vpop.f32.mrb[74].mxu0  ;;  %v6219_v37 = vpop.f32.mrb[75].mxu1  ;;  %v1776_v34 = vstv %s11248_s27 }
0x119b   :  { %v6697_v16 = vsub.f32 %v9552_v2, %v6691_v63  ;;  %v6692_v58 = vmul.f32 %v6219_v37, %v6219_v37  ;;  %v6694_v59 = vmul.f32 %v6219_v37, %v13024_v6  ;;  %v6373_v52 = vpop.f32.mrb[75].mxu0  ;;  %v4260_v37 = vstv %s11254_s1 }
0x119c   :  { %v6713_v12 = vadd.f32 %v6693_v47, %v6691_v63  ;;  %v6696_v13 = vsub.f32 %v6373_v52, %v6690_v62  ;;  %v6703_v29 = vmul.f32 2.0, %v6695_v1  ;;  %v5916_v52 = vstv %s11258_s14 }
0x119d   :  { %v6712_v20 = vadd.f32 %v6692_v58, %v6690_v62  ;;  %v6702_v18 = vmul.f32 2.0, %v6694_v59  ;;  %v948_v62 = vstv %s11246_s3 }
0x119e   :  { %v6705_v35 = vadd.f32 0.0001, %v6703_v29  ;;  %v6715_v11 = vadd.f32 0.0001, %v6713_v12 }
0x119f   :  { %v6714_v14 = vadd.f32 0.0001, %v6712_v20  ;;  %v6704_v41 = vadd.f32 0.0001, %v6702_v18 }
0x11a1   :  { %v9563_v27 = vpop.f32.mrb[76].mxu1 }
0x11a2   :  { %v9609_v53 = vpop.f32.mrb[76].mxu0  ;;  %v6452_v24 = vpop.f32.mrb[77].mxu1 }
0x11a3   :  { %v6606_v17 = vpop.f32.mrb[77].mxu0  ;;  %9596 = vmatprep.mubr.f32.mxu1 %v6452_v24 }
0x11a4   :  { %9642 = vmatprep.mubr.f32.mxu0 %v6606_v17  ;;  %9597 = vmatmul.mubr.f32.vlgmr.msra.gmra.mrb[78].mxu1 %v9563_v27 }
0x11a5   :  { %9643 = vmatmul.mubr.f32.vlgmr.msra.gmra.mrb[78].mxu0 %v9609_v53 }
0x1277   :  { %v9598_v5 = vpop.f32.mrb[78].mxu1 }
0x1278   :  { %v6699_v33 = vsub.f32 %v9598_v5, %v6693_v47  ;;  %v9644_v30 = vpop.f32.mrb[78].mxu0  ;;  %v6527_v3 = vpop.f32.mrb[79].mxu1  ;;  %v2604_v47 = vstv %s11250_s28 }
0x1279   :  { %v6701_v32 = vsub.f32 %v9644_v30, %v6695_v1  ;;  %v6698_v9 = vsub.f32 %v6527_v3, %v6692_v58  ;;  %v6681_v7 = vpop.f32.mrb[79].mxu0  ;;  %v1777_v1 = vadd.f32 %v1776_v34, %v948_v62  ;;  %v5088_v58 = vstv %s11256_s13 }
0x127a   :  { %v6717_v40 = vadd.f32 %v6699_v33, %v6697_v16  ;;  %v6700_v6 = vsub.f32 %v6681_v7, %v6694_v59 }
0x127b   :  { %v6707_v39 = vmul.f32 2.0, %v6701_v32  ;;  %v6716_v4 = vadd.f32 %v6698_v9, %v6696_v13  ;;  %v2605_v2 = vadd.f32 %v2604_v47, %v1777_v1 }
0x127c   :  { %v6719_v36 = vadd.f32 0.0009, %v6717_v40  ;;  %v6706_v8 = vmul.f32 2.0, %v6700_v6 }
0x127d   :  { %v6709_v56 = vadd.f32 0.0009, %v6707_v39  ;;  %v6718_v0 = vadd.f32 0.0009, %v6716_v4 }
0x127e   :  { %v6721_v21 = vmul.f32 %v6719_v36, %v6715_v11  ;;  %v6708_v54 = vadd.f32 0.0009, %v6706_v8 }
0x127f   :  { %v6711_v42 = vmul.f32 %v6709_v56, %v6705_v35  ;;  %v6720_v43 = vmul.f32 %v6718_v0, %v6714_v14 }
0x1280   :  { %11297 = vrcp.f32 %v6721_v21  ;;  %v6710_v38 = vmul.f32 %v6708_v54, %v6704_v41 }
0x1281   :  { %11299 = vrcp.f32 %v6720_v43 }
0x128a   :  { %v11298_v44 = vpop.eup %11297 }
0x128b   :  { %v11300_v48 = vpop.eup %11299  ;;  %v6725_v49 = vmul.f32 %v11298_v44, %v6721_v21 }
0x128c   :  { %v6724_v50 = vmul.f32 %v11300_v48, %v6720_v43 }
0x128d   :  { %v6727_v26 = vsub.f32 2.0, %v6725_v49 }
0x128e   :  { %v6726_v51 = vsub.f32 2.0, %v6724_v50 }
0x128f   :  { %v6729_v57 = vmul.f32 %v11298_v44, %v6727_v26 }
0x1290   :  { %v6728_v55 = vmul.f32 %v11300_v48, %v6726_v51 }
0x1291   :  { %v6731_v61 = vmul.f32 %v6729_v57, %v6711_v42 }
0x1292   :  { %v6730_v46 = vmul.f32 %v6728_v55, %v6710_v38 }
0x1293   :  { %v6733_v10 = vmul.f32 %v11850_v45, %v6731_v61 }
0x1294   :  { %v6732_v60 = vmul.f32 %v11850_v45, %v6730_v46  ;;  %v3432_v45 = vstv %s11252_s12 }
0x1295   :  { %v3433_v16 = vadd.f32 %v3432_v45, %v2605_v2 }
0x1296   :  { %v6734_v15 = vadd.f32 %v6733_v10, %v6732_v60 }
0x1297   :  { %v4261_v59 = vadd.f32 %v4260_v37, %v3433_v16 }
0x1298   :  { %6735 = vadd.xlane.f32.xlu1 %v6734_v15 }
0x1299   :  { %v5089_v12 = vadd.f32 %v5088_v58, %v4261_v59 }
0x129b   :  { %v5917_v13 = vadd.f32 %v5916_v52, %v5089_v12 }
0x1325   :  { %v6736_v19 = vpop.xlane.xlu1 %6735 }
0x1326   :  { %v6737_v22 = vrot.slane %v6736_v19, 4 }
0x1328   :  { %v6738_v25 = vadd.f32 %v6737_v22, %v6736_v19 }
0x132a   :  { %v6739_v28 = vrot.slane %v6738_v25, 2 }
0x132c   :  { %v6740_v31 = vadd.f32 %v6739_v28, %v6738_v25 }
0x132e   :  { %v6741_v23 = vrot.slane %v6740_v31, 1 }
0x1330   :  { %v6742_v63 = vadd.f32 %v6741_v23, %v6740_v31 }
0x1332   :  { %11259 = vpush %v6742_v63 }
0x1363   :  { %s11260_s17 = spop %11259 }
0x1364   :  { %v6744_v20 = vstv %s11260_s17 }
0x1365   :  { %v6745_v27 = vadd.f32 %v6744_v20, %v5917_v13 }
0x1367   :  { %6746 = vst [vmem:[#allocation10] sm:$0xff] %v6745_v27 }
0x1368   :  { %11406 = shalt.err (!%p11403_p8)
}
0x1369   :  { %s11407_s22 = scalar_lea.hbm %s13100_s4, 128 }
0x136a   :  { %p11408_p9 = scmp.ne.s32.totalorder %s13100_s4, %s11407_s22  ;;  %p11411_p10 = scmp.lt.u32.totalorder %s11407_s22, %s13100_s4 }
0x136c   :  { %p11413_p11 = pnand %p11411_p10, %p11408_p9 }
0x136e   :  { %11416 = shalt.err (!%p11413_p11)
}
0x136f   :  { %6756 = dma.vmem_to_hbm [thread:$0]  %s6754_s16, 128, %s13100_s4, [#allocation4]  }
0x1370   :  { %11423 = dma.done.wait [#allocation4], 128  }
0x1371   :  { %11424 = vsyncadd [#allocation4], 4294967168 }
0x1372   :  { %6760 = vsyncpa [#allocation3], 1 }
0x1373   :  { %6761 = vsyncpa [#allocation6], 1 }
0x1374   :  { %6762 = vsyncpa [#allocation9], 1 }
0x1375   :  { %6763 = vsyncpa [#allocation4], 1 }

</bundles_post_ra>
